<compile_context>
chip_gen: v5e
topology: v5e:2x2
jax: 0.10.0
libtpu: 0.0.40
codegen_flags: <defaults>
</compile_context>

<pallas_src>
import numpy as np

import jax
import jax.numpy as jnp
from jax.experimental import pallas as pl
from jax.experimental.pallas import tpu as pltpu

KH = 7        # effective kernel size (2x2 avg-pool folded into the 5x5 conv)
STRIDE = 4    # effective stride: conv stride 2 * pool stride 2
PAD = 2       # effective padding (= the conv's padding)


# ---------------------------------------------------------------------------
# Once-per-weight-set preparation (pure numpy -> zero per-call HLO glue).
# ---------------------------------------------------------------------------
def _effective_weight(w):
    """PyTorch OIHW (Cout,Cin,5,5) -> effective (7,7,Cin,Cout) weights with the
    following 2x2 average pool folded in (pooling is linear)."""
    wt = np.transpose(np.asarray(w, np.float32), (2, 3, 1, 0))  # (5,5,Cin,Cout)
    we = np.zeros((KH, KH) + wt.shape[2:], np.float32)
    for ph in range(2):
        for pw in range(2):
            we[2 * ph:2 * ph + 5, 2 * pw:2 * pw + 5] += wt
    return we * 0.25


def _band_stack(weff, w_in, w_out):
    """Per-kernel-row banded (im2col-absorbing) weight matrices.

    B[oh, w*Cin + ci, j*Cout + co] = weff[oh, w + PAD - 4*j, ci, co]
    (0 where the W index falls outside the kernel -> implicit W padding), so
    slab(H_rows, W*Cin) @ B[oh] performs the whole W/Cin contraction of the
    effective conv for kernel-row offset oh.
    """
    _, KW, cin, cout = weff.shape
    b = np.zeros((KH, w_in, cin, w_out, cout), np.float32)
    for j in range(w_out):
        lo = STRIDE * j - PAD
        ws, we_ = max(0, lo), min(w_in, lo + KW)
        b[:, ws:we_, :, j, :] = weff[:, ws - lo:we_ - lo, :, :]
    return b.reshape(KH, w_in * cin, w_out * cout)


def _selectors(h_out, rows_in, out_pad):
    """S[oh, out_pad+i, 4*i+oh] = 1 : stride-4 row selection (plus re-inserted
    zero-padding rows) expressed as tiny MXU matmuls."""
    s = np.zeros((KH, h_out + 2 * out_pad, rows_in), np.float32)
    i = np.arange(h_out)
    for oh in range(KH):
        s[oh, out_pad + i, STRIDE * i + oh] = 1.0
    return s


def prepare_params(w1, b1, w2, b2, H, W):
    """Build all weight-side constants ONCE per (weights, input-size) pair."""
    assert H % 16 == 0 and W % 16 == 0, "fused formulation needs H, W % 16 == 0"
    w1 = np.asarray(w1, np.float32); b1 = np.asarray(b1, np.float32)
    w2 = np.asarray(w2, np.float32); b2 = np.asarray(b2, np.float32)
    c1 = w1.shape[0]
    c2 = w2.shape[0]
    h1, w1o = H // 4, W // 4
    h2, w2o = h1 // 4, w1o // 4
    n1, n2 = w1o * c1, w2o * c2

    B1 = _band_stack(_effective_weight(w1), W, w1o)          # (7, W*cin, n1)
    B2 = _band_stack(_effective_weight(w2), w1o, w2o)        # (7, n1,    n2)
    S1 = _selectors(h1, H + 2 * PAD, PAD)                    # (7, h1+4, H+4)
    S2 = _selectors(h2, h1 + 2 * PAD, 0)                     # (7, h2,   h1+4)

    pb1 = np.zeros((h1 + 2 * PAD, n1), np.float32)           # layer-2 input bias
    pb1[PAD:PAD + h1, :] = np.tile(b1 - 0.5, w1o)            # (-0.5 folded in)
    bias2 = np.tile(b2 - 1.0, w2o).reshape(1, n2)            # (-1 folded in)

    return (jnp.asarray(B1, jnp.bfloat16), jnp.asarray(S1), jnp.asarray(pb1),
            jnp.asarray(B2, jnp.bfloat16), jnp.asarray(S2), jnp.asarray(bias2))


# ---------------------------------------------------------------------------
# Fused kernel: both conv+pool stages, biases/constants and ReLU in one call.
# ---------------------------------------------------------------------------
def _fused_kernel(x_ref, b1_ref, s1_ref, pb1_ref, b2_ref, s2_ref, bias2_ref,
                  o_ref):
    f32 = jnp.float32
    x = x_ref[...]                                    # (H+4, W*cin) bf16

    # Layer 1: conv1 + avgpool1 + (-0.5).  Per kernel-row banded matmul with
    # the stride-4 row selection done on the MXU; consumed immediately.
    acc1 = pb1_ref[...]                               # (h1+4, n1) f32
    for oh in range(KH):
        z = jnp.dot(x, b1_ref[oh], preferred_element_type=f32)
        acc1 = acc1 + jnp.dot(s1_ref[oh], z, preferred_element_type=f32)

    # Layer 2: conv2 + avgpool2 + (-1) + ReLU.
    v3 = acc1.astype(jnp.bfloat16)                    # H-padded layer-2 slab
    acc2 = jnp.zeros(o_ref.shape, f32)
    for oh in range(KH):
        z = jnp.dot(v3, b2_ref[oh], preferred_element_type=f32)
        acc2 = acc2 + jnp.dot(s2_ref[oh], z, preferred_element_type=f32)

    o_ref[...] = jnp.maximum(acc2 + bias2_ref[...], 0.0)


@jax.jit
def model_forward(x, params):
    """x: (1, cin, H, W) NCHW.  params: prepare_params(...) for same (H, W)."""
    B1, S1, pb1, B2, S2, bias2 = params
    _, cin, H, W = x.shape
    h2, w2o = H // 16, W // 16
    n2 = bias2.shape[1]
    c2 = n2 // w2o
    assert S1.shape[2] == H + 2 * PAD, "params were prepared for another size"

    # NCHW -> H-padded row-major (H+4, W*cin) slab, bf16 for the MXU.
    x2d = jnp.transpose(x[0], (1, 2, 0)).reshape(H, W * cin)
    x2d = jnp.pad(x2d, ((PAD, PAD), (0, 0))).astype(jnp.bfloat16)

    vmem = pltpu.MemorySpace.VMEM
    out2d = pl.pallas_call(
        _fused_kernel,
        out_shape=jax.ShapeDtypeStruct((h2, n2), jnp.float32),
        in_specs=[pl.BlockSpec(memory_space=vmem)] * 7,
        out_specs=pl.BlockSpec(memory_space=vmem),
    )(x2d, B1, S1, pb1, B2, S2, bias2)

    # (h2, w2o*c2) -> (c2, h2, w2o); 256 elements, negligible.
    return out2d.reshape(h2, w2o, c2).transpose(2, 0, 1)


# ---------------------------------------------------------------------------
# Plain-JAX reference (sanity check)
# ---------------------------------------------------------------------------
def ref_forward(x, w1, b1, w2, b2):
    def conv(x, w, b):
        y = jax.lax.conv_general_dilated(
            x, w, (2, 2), ((2, 2), (2, 2)),
            dimension_numbers=("NCHW", "OIHW", "NCHW"))
        return y + b[None, :, None, None]

    def pool(x):
        n, c, h, w = x.shape
        return x.reshape(n, c, h // 2, 2, w // 2, 2).mean(axis=(3, 5))

    v3 = pool(conv(x, w1, b1)) - 0.5
    v6 = pool(conv(v3, w2, b2)) - 1.0
    return jnp.squeeze(jnp.maximum(v6, 0.0), 0)


if __name__ == "__main__":
    key = jax.random.PRNGKey(0)
    kx, k1, k2, k3, k4 = jax.random.split(key, 5)

    # Small input consistent with the module (batch must be 1 for squeeze(0)).
    H = W = 64
    x = jax.random.normal(kx, (1, 3, H, W), dtype=jnp.float32)

    # PyTorch-layout parameters: OIHW weights, (Cout,) biases.
    w1 = jax.random.normal(k1, (10, 3, 5, 5), dtype=jnp.float32) * 0.1
    b1 = jax.random.normal(k2, (10,), dtype=jnp.float32) * 0.1
    w2 = jax.random.normal(k3, (16, 10, 5, 5), dtype=jnp.float32) * 0.1
    b2 = jax.random.normal(k4, (16,), dtype=jnp.float32) * 0.1

    # Weight-side prep is done ONCE here (not per forward call).
    params = prepare_params(w1, b1, w2, b2, H, W)

    out = jax.block_until_ready(model_forward(x, params))
    ref = jax.block_until_ready(ref_forward(x, w1, b1, w2, b2))

    assert out.shape == ref.shape == (16, 4, 4), (out.shape, ref.shape)
    err = float(jnp.max(jnp.abs(out - ref)))
    # bf16 band matrices / bf16 layer-2 slab (f32 accumulation) -> looser
    # tolerance than a pure-f32 pipeline; structural bugs would be O(1).
    assert err < 5e-2, f"max abs err {err}"

    print("KERNEL_OK")
</pallas_src>

<mosaic_0001>
module attributes {stable_mosaic.version = 11 : i64} {
  func.func @_fused_kernel(%arg0: memref<68x192xbf16, #tpu.memory_space<vmem>>, %arg1: memref<7x192x160xbf16, #tpu.memory_space<vmem>>, %arg2: memref<7x20x68xf32, #tpu.memory_space<vmem>>, %arg3: memref<20x160xf32, #tpu.memory_space<vmem>>, %arg4: memref<7x160x64xbf16, #tpu.memory_space<vmem>>, %arg5: memref<7x4x20xf32, #tpu.memory_space<vmem>>, %arg6: memref<1x64xf32, #tpu.memory_space<vmem>>, %arg7: memref<4x64xf32, #tpu.memory_space<vmem>>) attributes {dimension_semantics = [], scalar_prefetch = 0 : i64, scratch_operands = 0 : i64, tpu.core_type = #tpu.core_type<tc>} {
    %c0 = arith.constant 0 : index
    %c0_0 = arith.constant 0 : index
    %0 = vector.load %arg0[%c0, %c0_0] : memref<68x192xbf16, #tpu.memory_space<vmem>>, vector<68x192xbf16>
    %c0_1 = arith.constant 0 : index
    %c0_2 = arith.constant 0 : index
    %1 = vector.load %arg3[%c0_1, %c0_2] : memref<20x160xf32, #tpu.memory_space<vmem>>, vector<20x160xf32>
    %c0_3 = arith.constant 0 : index
    %c0_4 = arith.constant 0 : index
    %c0_5 = arith.constant 0 : index
    %2 = vector.load %arg1[%c0_3, %c0_4, %c0_5] : memref<7x192x160xbf16, #tpu.memory_space<vmem>>, vector<1x192x160xbf16>
    %3 = vector.shape_cast %2 : vector<1x192x160xbf16> to vector<192x160xbf16>
    %cst = arith.constant dense<0.000000e+00> : vector<68x160xf32>
    %4 = tpu.matmul %0, %3, %cst {dimension_numbers = #tpu.dot_dimension_numbers<[1], [0], [0], [1], [0, 0, 1, 1], [], []>} : vector<68x192xbf16>, vector<192x160xbf16>, vector<68x160xf32> -> vector<68x160xf32>
    %c0_6 = arith.constant 0 : index
    %c0_7 = arith.constant 0 : index
    %c0_8 = arith.constant 0 : index
    %5 = vector.load %arg2[%c0_6, %c0_7, %c0_8] : memref<7x20x68xf32, #tpu.memory_space<vmem>>, vector<1x20x68xf32>
    %6 = vector.shape_cast %5 : vector<1x20x68xf32> to vector<20x68xf32>
    %cst_9 = arith.constant dense<0.000000e+00> : vector<20x160xf32>
    %7 = tpu.matmul %6, %4, %cst_9 {dimension_numbers = #tpu.dot_dimension_numbers<[1], [0], [0], [1], [0, 0, 1, 1], [], []>} : vector<20x68xf32>, vector<68x160xf32>, vector<20x160xf32> -> vector<20x160xf32>
    %8 = arith.addf %1, %7 : vector<20x160xf32>
    %c1 = arith.constant 1 : index
    %c0_10 = arith.constant 0 : index
    %c0_11 = arith.constant 0 : index
    %9 = vector.load %arg1[%c1, %c0_10, %c0_11] : memref<7x192x160xbf16, #tpu.memory_space<vmem>>, vector<1x192x160xbf16>
    %10 = vector.shape_cast %9 : vector<1x192x160xbf16> to vector<192x160xbf16>
    %cst_12 = arith.constant dense<0.000000e+00> : vector<68x160xf32>
    %11 = tpu.matmul %0, %10, %cst_12 {dimension_numbers = #tpu.dot_dimension_numbers<[1], [0], [0], [1], [0, 0, 1, 1], [], []>} : vector<68x192xbf16>, vector<192x160xbf16>, vector<68x160xf32> -> vector<68x160xf32>
    %c1_13 = arith.constant 1 : index
    %c0_14 = arith.constant 0 : index
    %c0_15 = arith.constant 0 : index
    %12 = vector.load %arg2[%c1_13, %c0_14, %c0_15] : memref<7x20x68xf32, #tpu.memory_space<vmem>>, vector<1x20x68xf32>
    %13 = vector.shape_cast %12 : vector<1x20x68xf32> to vector<20x68xf32>
    %cst_16 = arith.constant dense<0.000000e+00> : vector<20x160xf32>
    %14 = tpu.matmul %13, %11, %cst_16 {dimension_numbers = #tpu.dot_dimension_numbers<[1], [0], [0], [1], [0, 0, 1, 1], [], []>} : vector<20x68xf32>, vector<68x160xf32>, vector<20x160xf32> -> vector<20x160xf32>
    %15 = arith.addf %8, %14 : vector<20x160xf32>
    %c2 = arith.constant 2 : index
    %c0_17 = arith.constant 0 : index
    %c0_18 = arith.constant 0 : index
    %16 = vector.load %arg1[%c2, %c0_17, %c0_18] : memref<7x192x160xbf16, #tpu.memory_space<vmem>>, vector<1x192x160xbf16>
    %17 = vector.shape_cast %16 : vector<1x192x160xbf16> to vector<192x160xbf16>
    %cst_19 = arith.constant dense<0.000000e+00> : vector<68x160xf32>
    %18 = tpu.matmul %0, %17, %cst_19 {dimension_numbers = #tpu.dot_dimension_numbers<[1], [0], [0], [1], [0, 0, 1, 1], [], []>} : vector<68x192xbf16>, vector<192x160xbf16>, vector<68x160xf32> -> vector<68x160xf32>
    %c2_20 = arith.constant 2 : index
    %c0_21 = arith.constant 0 : index
    %c0_22 = arith.constant 0 : index
    %19 = vector.load %arg2[%c2_20, %c0_21, %c0_22] : memref<7x20x68xf32, #tpu.memory_space<vmem>>, vector<1x20x68xf32>
    %20 = vector.shape_cast %19 : vector<1x20x68xf32> to vector<20x68xf32>
    %cst_23 = arith.constant dense<0.000000e+00> : vector<20x160xf32>
    %21 = tpu.matmul %20, %18, %cst_23 {dimension_numbers = #tpu.dot_dimension_numbers<[1], [0], [0], [1], [0, 0, 1, 1], [], []>} : vector<20x68xf32>, vector<68x160xf32>, vector<20x160xf32> -> vector<20x160xf32>
    %22 = arith.addf %15, %21 : vector<20x160xf32>
    %c3 = arith.constant 3 : index
    %c0_24 = arith.constant 0 : index
    %c0_25 = arith.constant 0 : index
    %23 = vector.load %arg1[%c3, %c0_24, %c0_25] : memref<7x192x160xbf16, #tpu.memory_space<vmem>>, vector<1x192x160xbf16>
    %24 = vector.shape_cast %23 : vector<1x192x160xbf16> to vector<192x160xbf16>
    %cst_26 = arith.constant dense<0.000000e+00> : vector<68x160xf32>
    %25 = tpu.matmul %0, %24, %cst_26 {dimension_numbers = #tpu.dot_dimension_numbers<[1], [0], [0], [1], [0, 0, 1, 1], [], []>} : vector<68x192xbf16>, vector<192x160xbf16>, vector<68x160xf32> -> vector<68x160xf32>
    %c3_27 = arith.constant 3 : index
    %c0_28 = arith.constant 0 : index
    %c0_29 = arith.constant 0 : index
    %26 = vector.load %arg2[%c3_27, %c0_28, %c0_29] : memref<7x20x68xf32, #tpu.memory_space<vmem>>, vector<1x20x68xf32>
    %27 = vector.shape_cast %26 : vector<1x20x68xf32> to vector<20x68xf32>
    %cst_30 = arith.constant dense<0.000000e+00> : vector<20x160xf32>
    %28 = tpu.matmul %27, %25, %cst_30 {dimension_numbers = #tpu.dot_dimension_numbers<[1], [0], [0], [1], [0, 0, 1, 1], [], []>} : vector<20x68xf32>, vector<68x160xf32>, vector<20x160xf32> -> vector<20x160xf32>
    %29 = arith.addf %22, %28 : vector<20x160xf32>
    %c4 = arith.constant 4 : index
    %c0_31 = arith.constant 0 : index
    %c0_32 = arith.constant 0 : index
    %30 = vector.load %arg1[%c4, %c0_31, %c0_32] : memref<7x192x160xbf16, #tpu.memory_space<vmem>>, vector<1x192x160xbf16>
    %31 = vector.shape_cast %30 : vector<1x192x160xbf16> to vector<192x160xbf16>
    %cst_33 = arith.constant dense<0.000000e+00> : vector<68x160xf32>
    %32 = tpu.matmul %0, %31, %cst_33 {dimension_numbers = #tpu.dot_dimension_numbers<[1], [0], [0], [1], [0, 0, 1, 1], [], []>} : vector<68x192xbf16>, vector<192x160xbf16>, vector<68x160xf32> -> vector<68x160xf32>
    %c4_34 = arith.constant 4 : index
    %c0_35 = arith.constant 0 : index
    %c0_36 = arith.constant 0 : index
    %33 = vector.load %arg2[%c4_34, %c0_35, %c0_36] : memref<7x20x68xf32, #tpu.memory_space<vmem>>, vector<1x20x68xf32>
    %34 = vector.shape_cast %33 : vector<1x20x68xf32> to vector<20x68xf32>
    %cst_37 = arith.constant dense<0.000000e+00> : vector<20x160xf32>
    %35 = tpu.matmul %34, %32, %cst_37 {dimension_numbers = #tpu.dot_dimension_numbers<[1], [0], [0], [1], [0, 0, 1, 1], [], []>} : vector<20x68xf32>, vector<68x160xf32>, vector<20x160xf32> -> vector<20x160xf32>
    %36 = arith.addf %29, %35 : vector<20x160xf32>
    %c5 = arith.constant 5 : index
    %c0_38 = arith.constant 0 : index
    %c0_39 = arith.constant 0 : index
    %37 = vector.load %arg1[%c5, %c0_38, %c0_39] : memref<7x192x160xbf16, #tpu.memory_space<vmem>>, vector<1x192x160xbf16>
    %38 = vector.shape_cast %37 : vector<1x192x160xbf16> to vector<192x160xbf16>
    %cst_40 = arith.constant dense<0.000000e+00> : vector<68x160xf32>
    %39 = tpu.matmul %0, %38, %cst_40 {dimension_numbers = #tpu.dot_dimension_numbers<[1], [0], [0], [1], [0, 0, 1, 1], [], []>} : vector<68x192xbf16>, vector<192x160xbf16>, vector<68x160xf32> -> vector<68x160xf32>
    %c5_41 = arith.constant 5 : index
    %c0_42 = arith.constant 0 : index
    %c0_43 = arith.constant 0 : index
    %40 = vector.load %arg2[%c5_41, %c0_42, %c0_43] : memref<7x20x68xf32, #tpu.memory_space<vmem>>, vector<1x20x68xf32>
    %41 = vector.shape_cast %40 : vector<1x20x68xf32> to vector<20x68xf32>
    %cst_44 = arith.constant dense<0.000000e+00> : vector<20x160xf32>
    %42 = tpu.matmul %41, %39, %cst_44 {dimension_numbers = #tpu.dot_dimension_numbers<[1], [0], [0], [1], [0, 0, 1, 1], [], []>} : vector<20x68xf32>, vector<68x160xf32>, vector<20x160xf32> -> vector<20x160xf32>
    %43 = arith.addf %36, %42 : vector<20x160xf32>
    %c6 = arith.constant 6 : index
    %c0_45 = arith.constant 0 : index
    %c0_46 = arith.constant 0 : index
    %44 = vector.load %arg1[%c6, %c0_45, %c0_46] : memref<7x192x160xbf16, #tpu.memory_space<vmem>>, vector<1x192x160xbf16>
    %45 = vector.shape_cast %44 : vector<1x192x160xbf16> to vector<192x160xbf16>
    %cst_47 = arith.constant dense<0.000000e+00> : vector<68x160xf32>
    %46 = tpu.matmul %0, %45, %cst_47 {dimension_numbers = #tpu.dot_dimension_numbers<[1], [0], [0], [1], [0, 0, 1, 1], [], []>} : vector<68x192xbf16>, vector<192x160xbf16>, vector<68x160xf32> -> vector<68x160xf32>
    %c6_48 = arith.constant 6 : index
    %c0_49 = arith.constant 0 : index
    %c0_50 = arith.constant 0 : index
    %47 = vector.load %arg2[%c6_48, %c0_49, %c0_50] : memref<7x20x68xf32, #tpu.memory_space<vmem>>, vector<1x20x68xf32>
    %48 = vector.shape_cast %47 : vector<1x20x68xf32> to vector<20x68xf32>
    %cst_51 = arith.constant dense<0.000000e+00> : vector<20x160xf32>
    %49 = tpu.matmul %48, %46, %cst_51 {dimension_numbers = #tpu.dot_dimension_numbers<[1], [0], [0], [1], [0, 0, 1, 1], [], []>} : vector<20x68xf32>, vector<68x160xf32>, vector<20x160xf32> -> vector<20x160xf32>
    %50 = arith.addf %43, %49 : vector<20x160xf32>
    %51 = arith.truncf %50 : vector<20x160xf32> to vector<20x160xbf16>
    %cst_52 = arith.constant 0.000000e+00 : f32
    %52 = vector.broadcast %cst_52 : f32 to vector<4x64xf32>
    %c0_53 = arith.constant 0 : index
    %c0_54 = arith.constant 0 : index
    %c0_55 = arith.constant 0 : index
    %53 = vector.load %arg4[%c0_53, %c0_54, %c0_55] : memref<7x160x64xbf16, #tpu.memory_space<vmem>>, vector<1x160x64xbf16>
    %54 = vector.shape_cast %53 : vector<1x160x64xbf16> to vector<160x64xbf16>
    %cst_56 = arith.constant dense<0.000000e+00> : vector<20x64xf32>
    %55 = tpu.matmul %51, %54, %cst_56 {dimension_numbers = #tpu.dot_dimension_numbers<[1], [0], [0], [1], [0, 0, 1, 1], [], []>} : vector<20x160xbf16>, vector<160x64xbf16>, vector<20x64xf32> -> vector<20x64xf32>
    %c0_57 = arith.constant 0 : index
    %c0_58 = arith.constant 0 : index
    %c0_59 = arith.constant 0 : index
    %56 = vector.load %arg5[%c0_57, %c0_58, %c0_59] : memref<7x4x20xf32, #tpu.memory_space<vmem>>, vector<1x4x20xf32>
    %57 = vector.shape_cast %56 : vector<1x4x20xf32> to vector<4x20xf32>
    %cst_60 = arith.constant dense<0.000000e+00> : vector<4x64xf32>
    %58 = tpu.matmul %57, %55, %cst_60 {dimension_numbers = #tpu.dot_dimension_numbers<[1], [0], [0], [1], [0, 0, 1, 1], [], []>} : vector<4x20xf32>, vector<20x64xf32>, vector<4x64xf32> -> vector<4x64xf32>
    %59 = arith.addf %52, %58 : vector<4x64xf32>
    %c1_61 = arith.constant 1 : index
    %c0_62 = arith.constant 0 : index
    %c0_63 = arith.constant 0 : index
    %60 = vector.load %arg4[%c1_61, %c0_62, %c0_63] : memref<7x160x64xbf16, #tpu.memory_space<vmem>>, vector<1x160x64xbf16>
    %61 = vector.shape_cast %60 : vector<1x160x64xbf16> to vector<160x64xbf16>
    %cst_64 = arith.constant dense<0.000000e+00> : vector<20x64xf32>
    %62 = tpu.matmul %51, %61, %cst_64 {dimension_numbers = #tpu.dot_dimension_numbers<[1], [0], [0], [1], [0, 0, 1, 1], [], []>} : vector<20x160xbf16>, vector<160x64xbf16>, vector<20x64xf32> -> vector<20x64xf32>
    %c1_65 = arith.constant 1 : index
    %c0_66 = arith.constant 0 : index
    %c0_67 = arith.constant 0 : index
    %63 = vector.load %arg5[%c1_65, %c0_66, %c0_67] : memref<7x4x20xf32, #tpu.memory_space<vmem>>, vector<1x4x20xf32>
    %64 = vector.shape_cast %63 : vector<1x4x20xf32> to vector<4x20xf32>
    %cst_68 = arith.constant dense<0.000000e+00> : vector<4x64xf32>
    %65 = tpu.matmul %64, %62, %cst_68 {dimension_numbers = #tpu.dot_dimension_numbers<[1], [0], [0], [1], [0, 0, 1, 1], [], []>} : vector<4x20xf32>, vector<20x64xf32>, vector<4x64xf32> -> vector<4x64xf32>
    %66 = arith.addf %59, %65 : vector<4x64xf32>
    %c2_69 = arith.constant 2 : index
    %c0_70 = arith.constant 0 : index
    %c0_71 = arith.constant 0 : index
    %67 = vector.load %arg4[%c2_69, %c0_70, %c0_71] : memref<7x160x64xbf16, #tpu.memory_space<vmem>>, vector<1x160x64xbf16>
    %68 = vector.shape_cast %67 : vector<1x160x64xbf16> to vector<160x64xbf16>
    %cst_72 = arith.constant dense<0.000000e+00> : vector<20x64xf32>
    %69 = tpu.matmul %51, %68, %cst_72 {dimension_numbers = #tpu.dot_dimension_numbers<[1], [0], [0], [1], [0, 0, 1, 1], [], []>} : vector<20x160xbf16>, vector<160x64xbf16>, vector<20x64xf32> -> vector<20x64xf32>
    %c2_73 = arith.constant 2 : index
    %c0_74 = arith.constant 0 : index
    %c0_75 = arith.constant 0 : index
    %70 = vector.load %arg5[%c2_73, %c0_74, %c0_75] : memref<7x4x20xf32, #tpu.memory_space<vmem>>, vector<1x4x20xf32>
    %71 = vector.shape_cast %70 : vector<1x4x20xf32> to vector<4x20xf32>
    %cst_76 = arith.constant dense<0.000000e+00> : vector<4x64xf32>
    %72 = tpu.matmul %71, %69, %cst_76 {dimension_numbers = #tpu.dot_dimension_numbers<[1], [0], [0], [1], [0, 0, 1, 1], [], []>} : vector<4x20xf32>, vector<20x64xf32>, vector<4x64xf32> -> vector<4x64xf32>
    %73 = arith.addf %66, %72 : vector<4x64xf32>
    %c3_77 = arith.constant 3 : index
    %c0_78 = arith.constant 0 : index
    %c0_79 = arith.constant 0 : index
    %74 = vector.load %arg4[%c3_77, %c0_78, %c0_79] : memref<7x160x64xbf16, #tpu.memory_space<vmem>>, vector<1x160x64xbf16>
    %75 = vector.shape_cast %74 : vector<1x160x64xbf16> to vector<160x64xbf16>
    %cst_80 = arith.constant dense<0.000000e+00> : vector<20x64xf32>
    %76 = tpu.matmul %51, %75, %cst_80 {dimension_numbers = #tpu.dot_dimension_numbers<[1], [0], [0], [1], [0, 0, 1, 1], [], []>} : vector<20x160xbf16>, vector<160x64xbf16>, vector<20x64xf32> -> vector<20x64xf32>
    %c3_81 = arith.constant 3 : index
    %c0_82 = arith.constant 0 : index
    %c0_83 = arith.constant 0 : index
    %77 = vector.load %arg5[%c3_81, %c0_82, %c0_83] : memref<7x4x20xf32, #tpu.memory_space<vmem>>, vector<1x4x20xf32>
    %78 = vector.shape_cast %77 : vector<1x4x20xf32> to vector<4x20xf32>
    %cst_84 = arith.constant dense<0.000000e+00> : vector<4x64xf32>
    %79 = tpu.matmul %78, %76, %cst_84 {dimension_numbers = #tpu.dot_dimension_numbers<[1], [0], [0], [1], [0, 0, 1, 1], [], []>} : vector<4x20xf32>, vector<20x64xf32>, vector<4x64xf32> -> vector<4x64xf32>
    %80 = arith.addf %73, %79 : vector<4x64xf32>
    %c4_85 = arith.constant 4 : index
    %c0_86 = arith.constant 0 : index
    %c0_87 = arith.constant 0 : index
    %81 = vector.load %arg4[%c4_85, %c0_86, %c0_87] : memref<7x160x64xbf16, #tpu.memory_space<vmem>>, vector<1x160x64xbf16>
    %82 = vector.shape_cast %81 : vector<1x160x64xbf16> to vector<160x64xbf16>
    %cst_88 = arith.constant dense<0.000000e+00> : vector<20x64xf32>
    %83 = tpu.matmul %51, %82, %cst_88 {dimension_numbers = #tpu.dot_dimension_numbers<[1], [0], [0], [1], [0, 0, 1, 1], [], []>} : vector<20x160xbf16>, vector<160x64xbf16>, vector<20x64xf32> -> vector<20x64xf32>
    %c4_89 = arith.constant 4 : index
    %c0_90 = arith.constant 0 : index
    %c0_91 = arith.constant 0 : index
    %84 = vector.load %arg5[%c4_89, %c0_90, %c0_91] : memref<7x4x20xf32, #tpu.memory_space<vmem>>, vector<1x4x20xf32>
    %85 = vector.shape_cast %84 : vector<1x4x20xf32> to vector<4x20xf32>
    %cst_92 = arith.constant dense<0.000000e+00> : vector<4x64xf32>
    %86 = tpu.matmul %85, %83, %cst_92 {dimension_numbers = #tpu.dot_dimension_numbers<[1], [0], [0], [1], [0, 0, 1, 1], [], []>} : vector<4x20xf32>, vector<20x64xf32>, vector<4x64xf32> -> vector<4x64xf32>
    %87 = arith.addf %80, %86 : vector<4x64xf32>
    %c5_93 = arith.constant 5 : index
    %c0_94 = arith.constant 0 : index
    %c0_95 = arith.constant 0 : index
    %88 = vector.load %arg4[%c5_93, %c0_94, %c0_95] : memref<7x160x64xbf16, #tpu.memory_space<vmem>>, vector<1x160x64xbf16>
    %89 = vector.shape_cast %88 : vector<1x160x64xbf16> to vector<160x64xbf16>
    %cst_96 = arith.constant dense<0.000000e+00> : vector<20x64xf32>
    %90 = tpu.matmul %51, %89, %cst_96 {dimension_numbers = #tpu.dot_dimension_numbers<[1], [0], [0], [1], [0, 0, 1, 1], [], []>} : vector<20x160xbf16>, vector<160x64xbf16>, vector<20x64xf32> -> vector<20x64xf32>
    %c5_97 = arith.constant 5 : index
    %c0_98 = arith.constant 0 : index
    %c0_99 = arith.constant 0 : index
    %91 = vector.load %arg5[%c5_97, %c0_98, %c0_99] : memref<7x4x20xf32, #tpu.memory_space<vmem>>, vector<1x4x20xf32>
    %92 = vector.shape_cast %91 : vector<1x4x20xf32> to vector<4x20xf32>
    %cst_100 = arith.constant dense<0.000000e+00> : vector<4x64xf32>
    %93 = tpu.matmul %92, %90, %cst_100 {dimension_numbers = #tpu.dot_dimension_numbers<[1], [0], [0], [1], [0, 0, 1, 1], [], []>} : vector<4x20xf32>, vector<20x64xf32>, vector<4x64xf32> -> vector<4x64xf32>
    %94 = arith.addf %87, %93 : vector<4x64xf32>
    %c6_101 = arith.constant 6 : index
    %c0_102 = arith.constant 0 : index
    %c0_103 = arith.constant 0 : index
    %95 = vector.load %arg4[%c6_101, %c0_102, %c0_103] : memref<7x160x64xbf16, #tpu.memory_space<vmem>>, vector<1x160x64xbf16>
    %96 = vector.shape_cast %95 : vector<1x160x64xbf16> to vector<160x64xbf16>
    %cst_104 = arith.constant dense<0.000000e+00> : vector<20x64xf32>
    %97 = tpu.matmul %51, %96, %cst_104 {dimension_numbers = #tpu.dot_dimension_numbers<[1], [0], [0], [1], [0, 0, 1, 1], [], []>} : vector<20x160xbf16>, vector<160x64xbf16>, vector<20x64xf32> -> vector<20x64xf32>
    %c6_105 = arith.constant 6 : index
    %c0_106 = arith.constant 0 : index
    %c0_107 = arith.constant 0 : index
    %98 = vector.load %arg5[%c6_105, %c0_106, %c0_107] : memref<7x4x20xf32, #tpu.memory_space<vmem>>, vector<1x4x20xf32>
    %99 = vector.shape_cast %98 : vector<1x4x20xf32> to vector<4x20xf32>
    %cst_108 = arith.constant dense<0.000000e+00> : vector<4x64xf32>
    %100 = tpu.matmul %99, %97, %cst_108 {dimension_numbers = #tpu.dot_dimension_numbers<[1], [0], [0], [1], [0, 0, 1, 1], [], []>} : vector<4x20xf32>, vector<20x64xf32>, vector<4x64xf32> -> vector<4x64xf32>
    %101 = arith.addf %94, %100 : vector<4x64xf32>
    %c0_109 = arith.constant 0 : index
    %c0_110 = arith.constant 0 : index
    %102 = vector.load %arg6[%c0_109, %c0_110] : memref<1x64xf32, #tpu.memory_space<vmem>>, vector<1x64xf32>
    %103 = vector.broadcast %102 : vector<1x64xf32> to vector<4x64xf32>
    %104 = arith.addf %101, %103 : vector<4x64xf32>
    %cst_111 = arith.constant 0.000000e+00 : f32
    %105 = vector.broadcast %cst_111 : f32 to vector<4x64xf32>
    %106 = arith.maximumf %104, %105 : vector<4x64xf32>
    %c0_112 = arith.constant 0 : index
    %c0_113 = arith.constant 0 : index
    %107 = vector.load %arg7[%c0_112, %c0_113] : memref<4x64xf32, #tpu.memory_space<vmem>>, vector<4x64xf32>
    tpu.vector_store %arg7[%c0_112, %c0_113], %106 {strides = array<i32>} : memref<4x64xf32, #tpu.memory_space<vmem>>, vector<4x64xf32>,
    return
  }
}

</mosaic_0001>

<bundles_post_ra>
// kernel: model_forward.1
= control target key start
LH: loop header
LB: loop body
LE: loop exit
PB: predicated region body
PF: predicated region fallthrough
CT: control target
= control target key end

     0   :  { %vm228_vm0 = vcmask 523264   ;;  %vm389_vm1 = vcmask 1043456   ;;  %vm379_vm2 = vcmask 556032   ;;  %vm2662_vm3 = vcmask 261120   ;;  %s7562_s1 = inlined_call_operand.vmem [shape: bf16[7,192,160], index: 1, kind: input, shape index: {}]   ;;  %s7563_s0 = inlined_call_operand.vmem [shape: bf16[68,192], index: 0, kind: input, shape index: {}]   ;;  %s7564_s2 = inlined_call_operand.vmem [shape: f32[7,20,68], index: 2, kind: input, shape index: {}]   ;;  %s7565_s3 = inlined_call_operand.vmem [shape: f32[20,160], index: 3, kind: input, shape index: {}]   ;;  %s7566_s4 = inlined_call_operand.vmem [shape: bf16[7,160,64], index: 4, kind: input, shape index: {}]   ;;  %s7567_s5 = inlined_call_operand.vmem [shape: f32[7,4,20], index: 5, kind: input, shape index: {}]   ;;  %s7568_s6 = inlined_call_operand.vmem [shape: f32[1,64], index: 6, kind: input, shape index: {}]   ;;  %s7569_s7 = inlined_call_operand.vmem [shape: f32[4,64], index: 7, kind: output, shape index: {}]  }
   0x1   :  { %v3710_v0 = vld [vmem:[%s7562_s1 + $0x70] sm:$0xf]  ;;  %v5069_v1 = vld [vmem:[%s7562_s1 + $0x74] sm:$0xf0]  ;;  %v5068_v2 = vld [vmem:[%s7562_s1 + $0x74] sm:$0xf] }
   0x2   :  { %v3711_v3 = vor.u32 %v5069_v1, %v3710_v0  ;;  %v3712_v4 = vld [vmem:[%s7562_s1 + $0x78] sm:$0xf0]  ;;  %v3702_v5 = vld [vmem:[%s7562_s1 + $0x60] sm:$0xf]  ;;  %v5067_v6 = vld [vmem:[%s7562_s1 + $0x64] sm:$0xf0] }
   0x3   :  { %v3715_v7 = vor.u32 %v5068_v2, %v3712_v4  ;;  %v5066_v8 = vld [vmem:[%s7562_s1 + $0x64] sm:$0xf]  ;;  %v3704_v9 = vld [vmem:[%s7562_s1 + $0x68] sm:$0xf0]  ;;  %v3703_v10 = vor.u32 %v5067_v6, %v3702_v5  ;;  %v3694_v11 = vld [vmem:[%s7562_s1 + $0x50] sm:$0xf] }
   0x4   :  { %244 = vmatpush.bf16.msra.mxu0 %v3711_v3  ;;  %v3707_v12 = vor.u32 %v5066_v8, %v3704_v9  ;;  %v5065_v13 = vld [vmem:[%s7562_s1 + $0x54] sm:$0xf0]  ;;  %v5076_v14 = vld [vmem:[%s7562_s1 + $0xb4] sm:$0xf]  ;;  %v3744_v15 = vld [vmem:[%s7562_s1 + $0xb8] sm:$0xf0] }
   0x5   :  { %310 = vmatpush.bf16.msra.mxu2 %v3715_v7  ;;  %v5064_v16 = vld [vmem:[%s7562_s1 + $0x54] sm:$0xf]  ;;  %v3696_v17 = vld [vmem:[%s7562_s1 + $0x58] sm:$0xf0]  ;;  %v3747_v18 = vor.u32 %v5076_v14, %v3744_v15  ;;  %v5074_v19 = vld [vmem:[%s7562_s1 + $0xa4] sm:$0xf]  ;;  %v3695_v22 = vor.u32 %v5065_v13, %v3694_v11 }
   0x6   :  { %v3736_v20 = vld [vmem:[%s7562_s1 + $0xa8] sm:$0xf0]  ;;  %v3742_v21 = vld [vmem:[%s7562_s1 + $0xb0] sm:$0xf]  ;;  %v3686_v23 = vld [vmem:[%s7562_s1 + $0x40] sm:$0xf]  ;;  %v3699_v27 = vor.u32 %v5064_v16, %v3696_v17 }
   0x7   :  { %347 = vmatpush.bf16.msra.mxu3 %v3747_v18  ;;  %v5063_v24 = vld [vmem:[%s7562_s1 + $0x44] sm:$0xf0]  ;;  %v3739_v25 = vor.u32 %v5074_v19, %v3736_v20  ;;  %v5077_v26 = vld [vmem:[%s7562_s1 + $0xb4] sm:$0xf0]  ;;  %v5062_v28 = vld [vmem:[%s7562_s1 + $0x44] sm:$0xf] }
   0x8   :  { %245 = vmatpush.bf16.msra.mxu0 %v3703_v10  ;;  %v3688_v29 = vld [vmem:[%s7562_s1 + $0x48] sm:$0xf0]  ;;  %v3743_v30 = vor.u32 %v5077_v26, %v3742_v21  ;;  %v5072_v31 = vld [vmem:[%s7562_s1 + $0x94] sm:$0xf]  ;;  %v3728_v32 = vld [vmem:[%s7562_s1 + $0x98] sm:$0xf0]  ;;  %v3687_v36 = vor.u32 %v5063_v24, %v3686_v23 }
   0x9   :  { %311 = vmatpush.bf16.msra.mxu2 %v3707_v12  ;;  %v3734_v33 = vld [vmem:[%s7562_s1 + $0xa0] sm:$0xf]  ;;  %v5075_v34 = vld [vmem:[%s7562_s1 + $0xa4] sm:$0xf0]  ;;  %v3678_v37 = vld [vmem:[%s7562_s1 + $0x30] sm:$0xf]  ;;  %v3731_v39 = vor.u32 %v5072_v31, %v3728_v32  ;;  %v3691_v41 = vor.u32 %v5062_v28, %v3688_v29 }
   0xa   :  { %281 = vmatpush.bf16.msra.mxu1 %v3743_v30  ;;  %v3735_v35 = vor.u32 %v5075_v34, %v3734_v33  ;;  %v5061_v38 = vld [vmem:[%s7562_s1 + $0x34] sm:$0xf0]  ;;  %v5070_v40 = vld [vmem:[%s7562_s1 + $0x84] sm:$0xf]  ;;  %v3720_v42 = vld [vmem:[%s7562_s1 + $0x88] sm:$0xf0] }
   0xb   :  { %348 = vmatpush.bf16.msra.mxu3 %v3739_v25  ;;  %v3726_v43 = vld [vmem:[%s7562_s1 + $0x90] sm:$0xf]  ;;  %v5073_v44 = vld [vmem:[%s7562_s1 + $0x94] sm:$0xf0]  ;;  %v5060_v45 = vld [vmem:[%s7562_s1 + $0x34] sm:$0xf]  ;;  %v3679_v49 = vor.u32 %v5061_v38, %v3678_v37  ;;  %v3723_v50 = vor.u32 %v5070_v40, %v3720_v42 }
   0xc   :  { %246 = vmatpush.bf16.msra.mxu0 %v3695_v22  ;;  %v3680_v46 = vld [vmem:[%s7562_s1 + $0x38] sm:$0xf0]  ;;  %v3727_v47 = vor.u32 %v5073_v44, %v3726_v43  ;;  %v5046_v48 = vld [vmem:[%s7563_s0 + $0x4] sm:$0xf]  ;;  %v3624_v51 = vld [vmem:[%s7563_s0 + $0x8] sm:$0xf0] }
   0xd   :  { %312 = vmatpush.bf16.msra.mxu2 %v3699_v27  ;;  %v3718_v52 = vld [vmem:[%s7562_s1 + $0x80] sm:$0xf]  ;;  %v5071_v53 = vld [vmem:[%s7562_s1 + $0x84] sm:$0xf0]  ;;  %v3683_v54 = vor.u32 %v5060_v45, %v3680_v46  ;;  %v5058_v57 = vld [vmem:[%s7562_s1 + $0x24] sm:$0xf]  ;;  %v5461_v59 = vor.u32 %v5046_v48, %v3624_v51 }
   0xe   :  { %282 = vmatpush.bf16.msra.mxu1 %v3735_v35  ;;  %v3670_v55 = vld [vmem:[%s7562_s1 + $0x20] sm:$0xf]  ;;  %v5059_v56 = vld [vmem:[%s7562_s1 + $0x24] sm:$0xf0]  ;;  %v3672_v58 = vld [vmem:[%s7562_s1 + $0x28] sm:$0xf0]  ;;  %v3719_v60 = vor.u32 %v5071_v53, %v3718_v52 }
   0xf   :  { %349 = vmatpush.bf16.msra.mxu3 %v3731_v39  ;;  %v3671_v61 = vor.u32 %v5059_v56, %v3670_v55  ;;  %v3675_v62 = vor.u32 %v5058_v57, %v3672_v58  ;;  %v3662_v63 = vld [vmem:[%s7562_s1 + $0x10] sm:$0xf]  ;;  %v5057_v0 = vld [vmem:[%s7562_s1 + $0x14] sm:$0xf0]  ;;  %v5056_v1 = vld [vmem:[%s7562_s1 + $0x14] sm:$0xf] }
  0x10   :  { %247 = vmatpush.bf16.msra.mxu0 %v3687_v36  ;;  %v3664_v2 = vld [vmem:[%s7562_s1 + $0x18] sm:$0xf0]  ;;  %v3663_v3 = vor.u32 %v5057_v0, %v3662_v63  ;;  %v3654_v5 = vld [vmem:[%s7562_s1] sm:$0xf]  ;;  %v5055_v6 = vld [vmem:[%s7562_s1 + $0x4] sm:$0xf0] }
  0x11   :  { %313 = vmatpush.bf16.msra.mxu2 %v3691_v41  ;;  %v3667_v4 = vor.u32 %v5056_v1, %v3664_v2  ;;  %v5054_v7 = vld [vmem:[%s7562_s1 + $0x4] sm:$0xf]  ;;  %v3656_v8 = vld [vmem:[%s7562_s1 + $0x8] sm:$0xf0]  ;;  %v3655_v9 = vor.u32 %v5055_v6, %v3654_v5  ;;  %v3622_v10 = vld [vmem:[%s7563_s0] sm:$0xf] }
  0x12   :  { %283 = vmatpush.bf16.msra.mxu1 %v3727_v47  ;;  %v5047_v11 = vld [vmem:[%s7563_s0 + $0x4] sm:$0xf0]  ;;  %v3659_v12 = vor.u32 %v5054_v7, %v3656_v8  ;;  %v5048_v14 = vld [vmem:[%s7563_s0 + $0x14] sm:$0xf]  ;;  %v3632_v15 = vld [vmem:[%s7563_s0 + $0x18] sm:$0xf0] }
  0x13   :  { %350 = vmatpush.bf16.msra.mxu3 %v3723_v50  ;;  %v5497_v13 = vor.u32 %v5047_v11, %v3622_v10  ;;  %v5506_v16 = vor.u32 %v5048_v14, %v3632_v15  ;;  %v3630_v17 = vld [vmem:[%s7563_s0 + $0x10] sm:$0xf]  ;;  %v5049_v18 = vld [vmem:[%s7563_s0 + $0x14] sm:$0xf0]  ;;  %v5050_v20 = vld [vmem:[%s7563_s0 + $0x24] sm:$0xf] }
  0x14   :  { %248 = vmatpush.bf16.msra.mxu0 %v3679_v49  ;;  %v5519_v19 = vor.u32 %v5049_v18, %v3630_v17  ;;  %v3640_v21 = vld [vmem:[%s7563_s0 + $0x28] sm:$0xf0]  ;;  %v3848_v23 = vld [vmem:[%s7562_s1 + $0x130] sm:$0xf]  ;;  %v5093_v24 = vld [vmem:[%s7562_s1 + $0x134] sm:$0xf0] }
  0x15   :  { %314 = vmatpush.bf16.msra.mxu2 %v3683_v54  ;;  %v5528_v22 = vor.u32 %v5050_v20, %v3640_v21  ;;  %v3849_v25 = vor.u32 %v5093_v24, %v3848_v23  ;;  %v3840_v26 = vld [vmem:[%s7562_s1 + $0x120] sm:$0xf]  ;;  %v5091_v27 = vld [vmem:[%s7562_s1 + $0x124] sm:$0xf0]  ;;  %v3832_v29 = vld [vmem:[%s7562_s1 + $0x110] sm:$0xf] }
  0x16   :  { %3753 = vmatmul.msk.bf16.vlgmr.msra.gmra.mxu3 %vm228_vm0, %v5461_v59  ;;  %284 = vmatpush.bf16.msra.mxu1 %v3719_v60  ;;  %v3841_v28 = vor.u32 %v5091_v27, %v3840_v26  ;;  %v5089_v30 = vld [vmem:[%s7562_s1 + $0x114] sm:$0xf0]  ;;  %v3638_v32 = vld [vmem:[%s7563_s0 + $0x20] sm:$0xf]  ;;  %v5051_v33 = vld [vmem:[%s7563_s0 + $0x24] sm:$0xf0] }
  0x17   :  { %v3833_v31 = vor.u32 %v5089_v30, %v3832_v29  ;;  %v5559_v34 = vor.u32 %v5051_v33, %v3638_v32  ;;  %v5052_v35 = vld [vmem:[%s7563_s0 + $0x34] sm:$0xf]  ;;  %v3648_v36 = vld [vmem:[%s7563_s0 + $0x38] sm:$0xf0]  ;;  %v3880_v37 = vld [vmem:[%s7562_s1 + $0x170] sm:$0xf] }
  0x18   :  { %249 = vmatpush.bf16.msra.mxu0 %v3671_v61  ;;  %v5101_v38 = vld [vmem:[%s7562_s1 + $0x174] sm:$0xf0]  ;;  %v5574_v39 = vor.u32 %v5052_v35, %v3648_v36  ;;  %v3824_v41 = vld [vmem:[%s7562_s1 + $0x100] sm:$0xf]  ;;  %v5087_v42 = vld [vmem:[%s7562_s1 + $0x104] sm:$0xf0] }
  0x19   :  { %315 = vmatpush.bf16.msra.mxu2 %v3675_v62  ;;  %3748 = vmatmul.msk.bf16.vlgmr.msra.gmra.mxu1 %vm228_vm0, %v5461_v59  ;;  %v3881_v40 = vor.u32 %v5101_v38, %v3880_v37  ;;  %v3872_v43 = vld [vmem:[%s7562_s1 + $0x160] sm:$0xf]  ;;  %v3825_v44 = vor.u32 %v5087_v42, %v3824_v41  ;;  %v5099_v45 = vld [vmem:[%s7562_s1 + $0x164] sm:$0xf0]  ;;  %v3816_v46 = vld [vmem:[%s7562_s1 + $0xf0] sm:$0xf] }
  0x1a   :  { %v5085_v47 = vld [vmem:[%s7562_s1 + $0xf4] sm:$0xf0]  ;;  %v3873_v48 = vor.u32 %v5099_v45, %v3872_v43  ;;  %v3864_v49 = vld [vmem:[%s7562_s1 + $0x150] sm:$0xf]  ;;  %v3808_v52 = vld [vmem:[%s7562_s1 + $0xe0] sm:$0xf] }
  0x1b   :  { %v5097_v50 = vld [vmem:[%s7562_s1 + $0x154] sm:$0xf0]  ;;  %v3817_v51 = vor.u32 %v5085_v47, %v3816_v46  ;;  %v5083_v53 = vld [vmem:[%s7562_s1 + $0xe4] sm:$0xf0]  ;;  %v3856_v55 = vld [vmem:[%s7562_s1 + $0x140] sm:$0xf] }
  0x1c   :  { %250 = vmatpush.bf16.msra.mxu0 %v3663_v3  ;;  %v3865_v54 = vor.u32 %v5097_v50, %v3864_v49  ;;  %v5095_v56 = vld [vmem:[%s7562_s1 + $0x144] sm:$0xf0]  ;;  %v3809_v57 = vor.u32 %v5083_v53, %v3808_v52  ;;  %v3646_v58 = vld [vmem:[%s7563_s0 + $0x30] sm:$0xf]  ;;  %v5053_v60 = vld [vmem:[%s7563_s0 + $0x34] sm:$0xf0] }
  0x1d   :  { %316 = vmatpush.bf16.msra.mxu2 %v3667_v4  ;;  %v35_v61 = vld [vmem:[%s7563_s0 + $0x40] sm:$0x33]  ;;  %v3857_v62 = vor.u32 %v5095_v56, %v3856_v55  ;;  %v3800_v63 = vld [vmem:[%s7562_s1 + $0xd0] sm:$0xf]  ;;  %v5081_v0 = vld [vmem:[%s7562_s1 + $0xd4] sm:$0xf0]  ;;  %v5632_v1 = vor.u32 %v5053_v60, %v3646_v58 }
  0x1e   :  { %v92_v2 = vunpack.c.h.b16 %v35_v61  ;;  %v3801_v3 = vor.u32 %v5081_v0, %v3800_v63  ;;  %v3792_v5 = vld [vmem:[%s7562_s1 + $0xc0] sm:$0xf]  ;;  %v5079_v6 = vld [vmem:[%s7562_s1 + $0xc4] sm:$0xf0]  ;;  %v91_v8 = vunpack.c.l.b16 %v35_v61  ;;  %vm2825_vm4 = vcmask 162816  }
  0x1f   :  { %v3793_v7 = vor.u32 %v5079_v6, %v3792_v5  ;;  %v5092_v6 = vld [vmem:[%s7562_s1 + $0x134] sm:$0xf]  ;;  %vm3614_vm5 = vcmask 519168  }
  0x20   :  { %251 = vmatpush.bf16.msra.mxu0 %v3655_v9  ;;  %v5635_v4 = vpack.c.b16 %v92_v2, %v92_v2  ;;  %v5648_v9 = vpack.c.b16 %v91_v8, %v91_v8 }
  0x21   :  { %317 = vmatpush.bf16.msra.mxu2 %v3659_v12 }
  0x23   :  { %252 = vmatmul.bf16.vlgmr.msra.gmra.mxu0 %v5497_v13 }
  0x24   :  { %318 = vmatmul.bf16.vlgmr.msra.gmra.mxu2 %v5497_v13  ;;  %599 = vmatpush.bf16.msrb.mxu0 %v3849_v25 }
  0x25   :  { %636 = vmatpush.bf16.msrb.mxu2 %v3881_v40 }
  0x26   :  { %3754 = vmatmul.msk.bf16.gmra.mxu3 %vm228_vm0, %v5506_v16 }
  0x28   :  { %600 = vmatpush.bf16.msrb.mxu0 %v3841_v28 }
  0x29   :  { %3749 = vmatmul.msk.bf16.gmra.mxu1 %vm228_vm0, %v5506_v16  ;;  %637 = vmatpush.bf16.msrb.mxu2 %v3873_v48 }
  0x2c   :  { %601 = vmatpush.bf16.msrb.mxu0 %v3833_v31 }
  0x2d   :  { %638 = vmatpush.bf16.msrb.mxu2 %v3865_v54 }
  0x30   :  { %602 = vmatpush.bf16.msrb.mxu0 %v3825_v44 }
  0x31   :  { %639 = vmatpush.bf16.msrb.mxu2 %v3857_v62 }
  0x33   :  { %257 = vmatmul.bf16.gmra.mxu0 %v5519_v19 }
  0x34   :  { %323 = vmatmul.bf16.gmra.mxu2 %v5519_v19  ;;  %603 = vmatpush.bf16.msrb.mxu0 %v3817_v51 }
  0x36   :  { %3755 = vmatmul.msk.bf16.gmra.mxu3 %vm228_vm0, %v5528_v22 }
  0x38   :  { %604 = vmatpush.bf16.msrb.mxu0 %v3809_v57 }
  0x39   :  { %3750 = vmatmul.msk.bf16.gmra.mxu1 %vm228_vm0, %v5528_v22 }
  0x3c   :  { %605 = vmatpush.bf16.msrb.mxu0 %v3801_v3 }
  0x40   :  { %606 = vmatpush.bf16.msrb.mxu0 %v3793_v7  ;;  %v3850_v7 = vld [vmem:[%s7562_s1 + $0x138] sm:$0xf0] }
  0x43   :  { %262 = vmatmul.bf16.gmra.mxu0 %v5559_v34 }
  0x44   :  { %328 = vmatmul.bf16.gmra.mxu2 %v5559_v34 }
  0x46   :  { %3756 = vmatmul.msk.bf16.gmra.mxu3 %vm228_vm0, %v5574_v39 }
  0x49   :  { %3751 = vmatmul.msk.bf16.gmra.mxu1 %vm228_vm0, %v5574_v39 }
  0x53   :  { %267 = vmatmul.bf16.gmra.mxu0 %v5632_v1 }
  0x54   :  { %333 = vmatmul.bf16.gmra.mxu2 %v5632_v1 }
  0x56   :  { %3757 = vmatmul.msk.bf16.gmra.mxu3 %vm228_vm0, %v5635_v4 }
  0x59   :  { %3752 = vmatmul.msk.bf16.gmra.mxu1 %vm228_vm0, %v5635_v4 }
  0x63   :  { %272 = vmatmul.bf16.gmra.mxu0 %v5648_v9 }
  0x64   :  { %338 = vmatmul.bf16.gmra.mxu2 %v5648_v9 }
  0x73   :  { %607 = vmatmul.bf16.vlgmr.msrb.gmra.mxu0 %v5497_v13 }
  0x74   :  { %3886 = vmatmul.msk.bf16.vlgmr.msrb.gmra.mxu2 %vm228_vm0, %v5461_v59 }
  0x83   :  { %612 = vmatmul.bf16.gmra.mxu0 %v5519_v19 }
  0x84   :  { %3887 = vmatmul.msk.bf16.gmra.mxu2 %vm228_vm0, %v5506_v16 }
  0x93   :  { %617 = vmatmul.bf16.gmra.mxu0 %v5559_v34 }
  0x94   :  { %3888 = vmatmul.msk.bf16.gmra.mxu2 %vm228_vm0, %v5528_v22 }
  0x96   :  { %v5661_v10 = vpop.f32.mrf.mxu1 }
  0x99   :  { %v5663_v11 = vpop.f32.mrf.mxu3 }
  0x9e   :  { %v288_v12 = vpop.f32.mrf.mxu1 }
  0xa0   :  { %v5665_v14 = vpop.f32.mrf.mxu0 }
  0xa1   :  { %v354_v15 = vpop.f32.mrf.mxu3 }
  0xa3   :  { %622 = vmatmul.bf16.gmra.mxu0 %v5632_v1 }
  0xa4   :  { %3889 = vmatmul.msk.bf16.gmra.mxu2 %vm228_vm0, %v5574_v39 }
  0xa6   :  { %v291_v18 = vpop.f32.mrf.mxu1 }
  0xa7   :  { %v5670_v17 = vpop.f32.mrf.mxu2 }
  0xa8   :  { %v255_v20 = vpop.f32.mrf.mxu0 }
  0xa9   :  { %v5672_v21 = vadd.f32 %v288_v12, %v255_v20  ;;  %v5674_v23 = vpop.f32.mrf.mxu3  ;;  %v3853_v20 = vor.u32 %v5092_v6, %v3850_v7 }
  0xae   :  { %v293_v25 = vpop.f32.mrf.mxu1 }
  0xaf   :  { %v321_v24 = vpop.f32.mrf.mxu2 }
  0xb0   :  { %v5676_v26 = vadd.f32 %v354_v15, %v321_v24  ;;  %v258_v27 = vpop.f32.mrf.mxu0 }
  0xb1   :  { %v5678_v28 = vpop.f32.mrf.mxu3  ;;  %v292_v5 = vadd.f32 %v291_v18, %v258_v27  ;;  %v287_v18 = vadd.f32 %v5661_v10, %v5665_v14  ;;  %v3842_v27 = vld [vmem:[%s7562_s1 + $0x128] sm:$0xf0] }
  0xb3   :  { %627 = vmatmul.bf16.gmra.mxu0 %v5648_v9 }
  0xb4   :  { %3890 = vmatmul.msk.bf16.gmra.mxu2 %vm228_vm0, %v5635_v4 }
  0xb6   :  { %v296_v30 = vpop.f32.mrf.mxu1 }
  0xb7   :  { %v5683_v29 = vpop.f32.mrf.mxu2 }
  0xb8   :  { %v260_v31 = vpop.f32.mrf.mxu0  ;;  %v358_v10 = vadd.f32 %v5674_v23, %v5683_v29  ;;  %v353_v29 = vadd.f32 %v5663_v11, %v5670_v17  ;;  %v377_v11 = vld [vmem:[%s7564_s2 + $0x8] sm:$0xff] }
  0xb9   :  { %v362_v32 = vpop.f32.mrf.mxu3  ;;  %v294_v2 = vadd.f32 %v293_v25, %v260_v31  ;;  %v5090_v25 = vld [vmem:[%s7562_s1 + $0x124] sm:$0xf] }
  0xba   :  { %v376_v31 = vld [vmem:[%s7564_s2] sm:$0xff]  ;;  %v3845_v14 = vor.u32 %v5090_v25, %v3842_v27  ;;  %v5117_v25 = vld [vmem:[%s7562_s1 + $0x1f4] sm:$0xf0] }
  0xbe   :  { %v298_v35 = vpop.f32.mrf.mxu1 }
  0xbf   :  { %v326_v33 = vpop.f32.mrf.mxu2 }
  0xc0   :  { %v263_v36 = vpop.f32.mrf.mxu0 }
  0xc1   :  { %v364_v37 = vpop.f32.mrf.mxu3  ;;  %v297_v63 = vadd.f32 %v296_v30, %v263_v36  ;;  %v360_v30 = vadd.f32 %v5678_v28, %v326_v33  ;;  %v3834_v28 = vld [vmem:[%s7562_s1 + $0x118] sm:$0xf0] }
  0xc2   :  { %v3882_v33 = vld [vmem:[%s7562_s1 + $0x178] sm:$0xf0] }
  0xc6   :  { %v301_v40 = vpop.f32.mrf.mxu1 }
  0xc7   :  { %v329_v38 = vpop.f32.mrf.mxu2 }
  0xc8   :  { %v265_v41 = vpop.f32.mrf.mxu0  ;;  %v363_v15 = vadd.f32 %v362_v32, %v329_v38  ;;  %v5100_v32 = vld [vmem:[%s7562_s1 + $0x174] sm:$0xf] }
  0xc9   :  { %v367_v42 = vpop.f32.mrf.mxu3  ;;  %v299_v58 = vadd.f32 %v298_v35, %v265_v41  ;;  %v3885_v38 = vor.u32 %v5100_v32, %v3882_v33  ;;  %v5098_v41 = vld [vmem:[%s7562_s1 + $0x164] sm:$0xf]  ;;  %v5113_v32 = vld [vmem:[%s7562_s1 + $0x1d4] sm:$0xf0] }
  0xce   :  { %v303_v44 = vpop.f32.mrf.mxu1 }
  0xcf   :  { %v331_v43 = vpop.f32.mrf.mxu2 }
  0xd0   :  { %v268_v45 = vpop.f32.mrf.mxu0  ;;  %v365_v8 = vadd.f32 %v364_v37, %v331_v43  ;;  %v5086_v37 = vld [vmem:[%s7562_s1 + $0x104] sm:$0xf] }
  0xd1   :  { %v369_v46 = vpop.f32.mrf.mxu3  ;;  %v302_v57 = vadd.f32 %v301_v40, %v268_v45  ;;  %v3826_v40 = vld [vmem:[%s7562_s1 + $0x108] sm:$0xf0]  ;;  %v5096_v45 = vld [vmem:[%s7562_s1 + $0x154] sm:$0xf] }
  0xd2   :  { %v3829_v17 = vor.u32 %v5086_v37, %v3826_v40  ;;  %v3957_v40 = vld [vmem:[%s7562_s1 + $0x1b0] sm:$0xf] }
  0xd6   :  { %v306_v48 = vpop.f32.mrf.mxu1 }
  0xd7   :  { %v334_v47 = vpop.f32.mrf.mxu2 }
  0xd8   :  { %v270_v49 = vpop.f32.mrf.mxu0  ;;  %v368_v3 = vadd.f32 %v367_v42, %v334_v47  ;;  %v5084_v42 = vld [vmem:[%s7562_s1 + $0xf4] sm:$0xf] }
  0xd9   :  { %v372_v50 = vpop.f32.mrf.mxu3  ;;  %v304_v56 = vadd.f32 %v303_v44, %v270_v49  ;;  %v3818_v44 = vld [vmem:[%s7562_s1 + $0xf8] sm:$0xf0] }
  0xda   :  { %v3821_v49 = vor.u32 %v5084_v42, %v3818_v44  ;;  %v4021_v42 = vld [vmem:[%s7562_s1 + $0x230] sm:$0xf]  ;;  %v5125_v44 = vld [vmem:[%s7562_s1 + $0x234] sm:$0xf0] }
  0xde   :  { %v308_v52 = vpop.f32.mrf.mxu1 }
  0xdf   :  { %v336_v51 = vpop.f32.mrf.mxu2 }
  0xe0   :  { %v273_v53 = vpop.f32.mrf.mxu0  ;;  %v370_v0 = vadd.f32 %v369_v46, %v336_v51  ;;  %v3866_v46 = vld [vmem:[%s7562_s1 + $0x158] sm:$0xf0]  ;;  %v5082_v51 = vld [vmem:[%s7562_s1 + $0xe4] sm:$0xf] }
  0xe1   :  { %v307_v54 = vadd.f32 %v306_v48, %v273_v53  ;;  %v374_v55 = vpop.f32.mrf.mxu3  ;;  %v3869_v52 = vor.u32 %v5096_v45, %v3866_v46  ;;  %v3810_v53 = vld [vmem:[%s7562_s1 + $0xe8] sm:$0xf0]  ;;  %v4022_v45 = vor.u32 %v5125_v44, %v4021_v42  ;;  %v5116_v42 = vld [vmem:[%s7562_s1 + $0x1f4] sm:$0xf] }
  0xe2   :  { %v3858_v55 = vld [vmem:[%s7562_s1 + $0x148] sm:$0xf0] }
  0xe3   :  { %3758 = vmatpush.msk.msrb.mxu1 %vm389_vm1, %v307_v54  ;;  %v5094_v54 = vld [vmem:[%s7562_s1 + $0x144] sm:$0xf] }
  0xe5   :  { %404 = vmatpush.msrb.mxu1 %v304_v56  ;;  %v378_v56 = vld [vmem:[%s7564_s2 + $0x10] sm:$0xf] }
  0xe7   :  { %v339_v60 = vpop.f32.mrf.mxu2  ;;  %405 = vmatpush.msrb.mxu1 %v302_v57  ;;  %v3813_v57 = vor.u32 %v5082_v51, %v3810_v53  ;;  %v5105_v53 = vld [vmem:[%s7562_s1 + $0x194] sm:$0xf0] }
  0xe8   :  { %v373_v61 = vadd.f32 %v372_v50, %v339_v60  ;;  %v275_v62 = vpop.f32.mrf.mxu0  ;;  %v5080_v60 = vld [vmem:[%s7562_s1 + $0xd4] sm:$0xf] }
  0xe9   :  { %406 = vmatpush.msrb.mxu1 %v299_v58  ;;  %v3861_v58 = vor.u32 %v5094_v54, %v3858_v55 }
  0xea   :  { %3762 = vmatpush.msk.msrb.mxu3 %vm389_vm1, %v373_v61  ;;  %v3802_v61 = vld [vmem:[%s7562_s1 + $0xd8] sm:$0xf0] }
  0xeb   :  { %407 = vmatpush.msrb.mxu1 %v297_v63  ;;  %v3805_v63 = vor.u32 %v5080_v60, %v3802_v61 }
  0xec   :  { %430 = vmatpush.msrb.mxu3 %v370_v0 }
  0xed   :  { %408 = vmatpush.msrb.mxu1 %v294_v2  ;;  %v5078_v2 = vld [vmem:[%s7562_s1 + $0xc4] sm:$0xf] }
  0xee   :  { %431 = vmatpush.msrb.mxu3 %v368_v3  ;;  %v3794_v3 = vld [vmem:[%s7562_s1 + $0xc8] sm:$0xf0] }
  0xef   :  { %v341_v12 = vpop.f32.mrf.mxu2  ;;  %409 = vmatpush.msrb.mxu1 %v292_v5  ;;  %v3797_v5 = vor.u32 %v5078_v2, %v3794_v3  ;;  %v4005_v2 = vld [vmem:[%s7562_s1 + $0x210] sm:$0xf]  ;;  %v5121_v3 = vld [vmem:[%s7562_s1 + $0x214] sm:$0xf0] }
  0xf0   :  { %432 = vmatpush.msrb.mxu3 %v365_v8  ;;  %v5693_v24 = vpop.f32.mrf.mxu0 }
  0xf1   :  { %410 = vmatpush.msrb.mxu1 %v5672_v21  ;;  %v5088_v21 = vld [vmem:[%s7562_s1 + $0x114] sm:$0xf] }
  0xf2   :  { %433 = vmatpush.msrb.mxu3 %v363_v15  ;;  %v3837_v35 = vor.u32 %v5088_v21, %v3834_v28  ;;  %v3973_v28 = vld [vmem:[%s7562_s1 + $0x1d0] sm:$0xf] }
  0xf3   :  { %411 = vmatpush.msrb.mxu1 %v287_v18  ;;  %v3989_v18 = vld [vmem:[%s7562_s1 + $0x1f0] sm:$0xf]  ;;  %v3974_v33 = vor.u32 %v5113_v32, %v3973_v28 }
  0xf4   :  { %434 = vmatpush.msrb.mxu3 %v360_v30  ;;  %3759 = vmatmul.msk.f32.vlgmr.msrb.gmra.mxu1 %vm379_vm2, %v376_v31  ;;  %v3990_v27 = vor.u32 %v5117_v25, %v3989_v18  ;;  %v3981_v30 = vld [vmem:[%s7562_s1 + $0x1e0] sm:$0xf] }
  0xf5   :  { %665 = vmatpush.bf16.msra.mxu1 %v3853_v20 }
  0xf6   :  { %435 = vmatpush.msrb.mxu3 %v358_v10 }
  0xf7   :  { %v5723_v23 = vpop.f32.mrf.mxu2 }
  0xf8   :  { %436 = vmatpush.msrb.mxu3 %v5676_v26  ;;  %v610_v36 = vpop.f32.mrf.mxu0  ;;  %v3874_v26 = vld [vmem:[%s7562_s1 + $0x168] sm:$0xf0] }
  0xf9   :  { %666 = vmatpush.bf16.msra.mxu1 %v3845_v14  ;;  %v3877_v43 = vor.u32 %v5098_v41, %v3874_v26  ;;  %v5109_v41 = vld [vmem:[%s7562_s1 + $0x1b4] sm:$0xf0] }
  0xfa   :  { %437 = vmatpush.msrb.mxu3 %v353_v29  ;;  %v3965_v29 = vld [vmem:[%s7562_s1 + $0x1c0] sm:$0xf]  ;;  %v3958_v26 = vor.u32 %v5109_v41, %v3957_v40 }
  0xfb   :  { %3763 = vmatmul.msk.f32.vlgmr.msrb.gmra.mxu3 %vm379_vm2, %v376_v31  ;;  %v5115_v31 = vld [vmem:[%s7562_s1 + $0x1e4] sm:$0xf0] }
  0xfc   :  { %702 = vmatpush.bf16.msra.mxu3 %v3885_v38  ;;  %3760 = vmatmul.msk.f32.gmra.mxu1 %vm379_vm2, %v377_v11  ;;  %v3982_v10 = vor.u32 %v5115_v31, %v3981_v30 }
  0xfd   :  { %667 = vmatpush.bf16.msra.mxu1 %v3837_v35  ;;  %v5111_v35 = vld [vmem:[%s7562_s1 + $0x1c4] sm:$0xf0] }
  0xff   :  { %v643_v47 = vpop.f32.mrf.mxu2 }
 0x100   :  { %v5757_v48 = vadd.f32 %v643_v47, %v610_v36  ;;  %v5759_v50 = vpop.f32.mrf.mxu0  ;;  %703 = vmatpush.bf16.msra.mxu3 %v3877_v43  ;;  %v3966_v36 = vor.u32 %v5111_v35, %v3965_v29 }
 0x101   :  { %668 = vmatpush.bf16.msra.mxu1 %v3829_v17  ;;  %v5107_v17 = vld [vmem:[%s7562_s1 + $0x1a4] sm:$0xf0] }
 0x103   :  { %3764 = vmatmul.msk.f32.gmra.mxu3 %vm379_vm2, %v377_v11  ;;  %v3949_v11 = vld [vmem:[%s7562_s1 + $0x1a0] sm:$0xf] }
 0x104   :  { %704 = vmatpush.bf16.msra.mxu3 %v3869_v52  ;;  %3761 = vmatmul.msk.f32.gmra.mxu1 %vm379_vm2, %v378_v56  ;;  %v3950_v43 = vor.u32 %v5107_v17, %v3949_v11  ;;  %v3941_v52 = vld [vmem:[%s7562_s1 + $0x190] sm:$0xf] }
 0x105   :  { %669 = vmatpush.bf16.msra.mxu1 %v3821_v49  ;;  %v3942_v55 = vor.u32 %v5105_v53, %v3941_v52  ;;  %v5112_v52 = vld [vmem:[%s7562_s1 + $0x1d4] sm:$0xf]  ;;  %v3975_v53 = vld [vmem:[%s7562_s1 + $0x1d8] sm:$0xf0] }
 0x107   :  { %v5784_v62 = vpop.f32.mrf.mxu2 }
 0x108   :  { %v5786_v0 = vpop.f32.mrf.mxu0  ;;  %705 = vmatpush.bf16.msra.mxu3 %v3861_v58  ;;  %v3933_v58 = vld [vmem:[%s7562_s1 + $0x180] sm:$0xf]  ;;  %v647_v25 = vadd.f32 %v5784_v62, %v5759_v50  ;;  %v642_v50 = vadd.f32 %v5723_v23, %v5693_v24  ;;  %v5895_v62 = vld [vmem:[%s7564_s2 + $0x18] sm:$0xff]  ;;  %v5912_v24 = vld [vmem:[%s7564_s2 + $0x28] sm:$0xf] }
 0x109   :  { %670 = vmatpush.bf16.msra.mxu1 %v3813_v57  ;;  %v5123_v57 = vld [vmem:[%s7562_s1 + $0x224] sm:$0xf0] }
 0x10b   :  { %3765 = vmatmul.msk.f32.gmra.mxu3 %vm379_vm2, %v378_v56  ;;  %v4013_v56 = vld [vmem:[%s7562_s1 + $0x220] sm:$0xf] }
 0x10c   :  { %953 = vmatpush.bf16.msrb.mxu3 %v3990_v27  ;;  %v4014_v61 = vor.u32 %v5123_v57, %v4013_v56  ;;  %v5110_v56 = vld [vmem:[%s7562_s1 + $0x1c4] sm:$0xf]  ;;  %v3967_v57 = vld [vmem:[%s7562_s1 + $0x1c8] sm:$0xf0] }
 0x10d   :  { %671 = vmatpush.bf16.msra.mxu1 %v3805_v63  ;;  %v5103_v63 = vld [vmem:[%s7562_s1 + $0x184] sm:$0xf0] }
 0x10f   :  { %v5795_v6 = vpop.f32.mrf.mxu2 }
 0x110   :  { %v5797_v7 = vpop.f32.mrf.mxu0  ;;  %954 = vmatpush.bf16.msrb.mxu3 %v3982_v10  ;;  %v649_v18 = vadd.f32 %v5795_v6, %v5786_v0  ;;  %v5119_v0 = vld [vmem:[%s7562_s1 + $0x204] sm:$0xf0] }
 0x111   :  { %672 = vmatpush.bf16.msra.mxu1 %v3797_v5  ;;  %v3934_v5 = vor.u32 %v5103_v63, %v3933_v58  ;;  %v41_v10 = vld [vmem:[%s7565_s3 + $0x28] sm:$0xf]  ;;  %v3970_v58 = vor.u32 %v5110_v56, %v3967_v57  ;;  %v3959_v63 = vld [vmem:[%s7562_s1 + $0x1b8] sm:$0xf0] }
 0x113   :  { %3891 = vmatmul.msk.bf16.vlgmr.msra.gmra.mxu3 %vm228_vm0, %v5461_v59 }
 0x114   :  { %673 = vmatmul.bf16.vlgmr.msra.gmra.mxu1 %v5497_v13  ;;  %955 = vmatpush.bf16.msrb.mxu3 %v3974_v33 }
 0x115   :  { %990 = vmatpush.bf16.msrb.mxu1 %v4022_v45 }
 0x117   :  { %v651_v8 = vpop.f32.mrf.mxu2 }
 0x118   :  { %v620_v12 = vpop.f32.mrf.mxu0  ;;  %956 = vmatpush.bf16.msrb.mxu3 %v3966_v36 }
 0x119   :  { %991 = vmatpush.bf16.msrb.mxu1 %v4014_v61  ;;  %v5108_v61 = vld [vmem:[%s7562_s1 + $0x1b4] sm:$0xf] }
 0x11c   :  { %957 = vmatpush.bf16.msrb.mxu3 %v3958_v26 }
 0x11f   :  { %v653_v15 = vpop.f32.mrf.mxu2 }
 0x120   :  { %v623_v20 = vpop.f32.mrf.mxu0  ;;  %958 = vmatpush.bf16.msrb.mxu3 %v3950_v43  ;;  %v654_v60 = vadd.f32 %v653_v15, %v620_v12  ;;  %v4006_v12 = vor.u32 %v5121_v3, %v4005_v2  ;;  %v3991_v43 = vld [vmem:[%s7562_s1 + $0x1f8] sm:$0xf0]  ;;  %v3962_v2 = vor.u32 %v5108_v61, %v3959_v63 }
 0x121   :  { %v3994_v44 = vor.u32 %v5116_v42, %v3991_v43 }
 0x122   :  { %992 = vmatpush.bf16.msrb.mxu1 %v4006_v12 }
 0x123   :  { %3892 = vmatmul.msk.bf16.gmra.mxu3 %vm228_vm0, %v5506_v16 }
 0x124   :  { %678 = vmatmul.bf16.gmra.mxu1 %v5519_v19  ;;  %959 = vmatpush.bf16.msrb.mxu3 %v3942_v55 }
 0x127   :  { %v656_v14 = vpop.f32.mrf.mxu2 }
 0x128   :  { %v625_v21 = vpop.f32.mrf.mxu0  ;;  %v657_v54 = vadd.f32 %v656_v14, %v623_v20  ;;  %v652_v20 = vadd.f32 %v651_v8, %v5797_v7  ;;  %960 = vmatpush.bf16.msrb.mxu3 %v3934_v5  ;;  %v3997_v7 = vld [vmem:[%s7562_s1 + $0x200] sm:$0xf]  ;;  %v5106_v5 = vld [vmem:[%s7562_s1 + $0x1a4] sm:$0xf] }
 0x129   :  { %v3998_v6 = vor.u32 %v5119_v0, %v3997_v7  ;;  %v5902_v8 = vld [vmem:[%s7564_s2 + $0x20] sm:$0xff] }
 0x12b   :  { %993 = vmatpush.bf16.msrb.mxu1 %v3998_v6 }
 0x12f   :  { %v658_v37 = vpop.f32.mrf.mxu2 }
 0x130   :  { %v628_v38 = vpop.f32.mrf.mxu0  ;;  %v659_v47 = vadd.f32 %v658_v37, %v625_v21 }
 0x133   :  { %3893 = vmatmul.msk.bf16.gmra.mxu3 %vm228_vm0, %v5528_v22 }
 0x134   :  { %683 = vmatmul.bf16.gmra.mxu1 %v5559_v34 }
 0x137   :  { %v661_v46 = vpop.f32.mrf.mxu2 }
 0x138   :  { %v662_v49 = vadd.f32 %v661_v46, %v628_v38  ;;  %v630_v51 = vpop.f32.mrf.mxu0  ;;  %v5114_v46 = vld [vmem:[%s7562_s1 + $0x1e4] sm:$0xf] }
 0x13a   :  { %3899 = vmatpush.msk.msra.mxu0 %vm389_vm1, %v662_v49 }
 0x13c   :  { %758 = vmatpush.msra.mxu0 %v659_v47  ;;  %v3983_v47 = vld [vmem:[%s7562_s1 + $0x1e8] sm:$0xf0] }
 0x13d   :  { %v3986_v49 = vor.u32 %v5114_v46, %v3983_v47 }
 0x13e   :  { %759 = vmatpush.msra.mxu0 %v657_v54  ;;  %v3978_v54 = vor.u32 %v5112_v52, %v3975_v53  ;;  %v5118_v53 = vld [vmem:[%s7562_s1 + $0x204] sm:$0xf] }
 0x13f   :  { %v663_v15 = vpop.f32.mrf.mxu2 }
 0x140   :  { %760 = vmatpush.msra.mxu0 %v654_v60 }
 0x142   :  { %761 = vmatpush.msra.mxu0 %v652_v20  ;;  %v3951_v20 = vld [vmem:[%s7562_s1 + $0x1a8] sm:$0xf0] }
 0x143   :  { %3894 = vmatmul.msk.bf16.gmra.mxu3 %vm228_vm0, %v5574_v39  ;;  %v3954_v12 = vor.u32 %v5106_v5, %v3951_v20  ;;  %v4122_v20 = vld [vmem:[%s7562_s1 + $0x2a0] sm:$0xf] }
 0x144   :  { %688 = vmatmul.bf16.gmra.mxu1 %v5632_v1  ;;  %762 = vmatpush.msra.mxu0 %v649_v18  ;;  %v5104_v18 = vld [vmem:[%s7562_s1 + $0x194] sm:$0xf] }
 0x146   :  { %763 = vmatpush.msra.mxu0 %v647_v25  ;;  %v3943_v25 = vld [vmem:[%s7562_s1 + $0x198] sm:$0xf0] }
 0x147   :  { %v3946_v0 = vor.u32 %v5104_v18, %v3943_v25  ;;  %v4114_v25 = vld [vmem:[%s7562_s1 + $0x290] sm:$0xf] }
 0x148   :  { %764 = vmatpush.msra.mxu0 %v5757_v48 }
 0x14a   :  { %765 = vmatpush.msra.mxu0 %v642_v50 }
 0x14b   :  { %3900 = vmatmul.msk.f32.vlgmr.msra.gmra.mxu0 %vm379_vm2, %v5895_v62 }
 0x14c   :  { %1019 = vmatpush.bf16.msrb.mxu0 %v3994_v44 }
 0x150   :  { %1020 = vmatpush.bf16.msrb.mxu0 %v3986_v49 }
 0x153   :  { %3895 = vmatmul.msk.bf16.gmra.mxu3 %vm228_vm0, %v5635_v4  ;;  %3901 = vmatmul.msk.f32.gmra.mxu0 %vm379_vm2, %v5902_v8 }
 0x154   :  { %693 = vmatmul.bf16.gmra.mxu1 %v5648_v9  ;;  %1021 = vmatpush.bf16.msrb.mxu0 %v3978_v54 }
 0x158   :  { %1022 = vmatpush.bf16.msrb.mxu0 %v3970_v58 }
 0x15b   :  { %3902 = vmatmul.msk.f32.gmra.mxu0 %vm379_vm2, %v5912_v24 }
 0x15c   :  { %1023 = vmatpush.bf16.msrb.mxu0 %v3962_v2  ;;  %v4130_v2 = vld [vmem:[%s7562_s1 + $0x2b0] sm:$0xf] }
 0x160   :  { %1024 = vmatpush.bf16.msrb.mxu0 %v3954_v12  ;;  %v5139_v12 = vld [vmem:[%s7562_s1 + $0x2a4] sm:$0xf0] }
 0x163   :  { %961 = vmatmul.bf16.vlgmr.msrb.gmra.mxu3 %v5497_v13 }
 0x164   :  { %4027 = vmatmul.msk.bf16.vlgmr.msrb.gmra.mxu1 %vm228_vm0, %v5461_v59  ;;  %1025 = vmatpush.bf16.msrb.mxu0 %v3946_v0 }
 0x171   :  { %v5919_v23 = vpop.f32.mrf.mxu1 }
 0x173   :  { %966 = vmatmul.bf16.gmra.mxu3 %v5519_v19 }
 0x174   :  { %4028 = vmatmul.msk.bf16.gmra.mxu1 %vm228_vm0, %v5506_v16 }
 0x179   :  { %v5924_v48 = vpop.f32.mrf.mxu1 }
 0x17e   :  { %v5926_v27 = vpop.f32.mrf.mxu3 }
 0x181   :  { %v5933_v31 = vpop.f32.mrf.mxu1 }
 0x183   :  { %971 = vmatmul.bf16.gmra.mxu3 %v5559_v34 }
 0x184   :  { %4029 = vmatmul.msk.bf16.gmra.mxu1 %vm228_vm0, %v5528_v22 }
 0x186   :  { %v5931_v30 = vpop.f32.mrf.mxu3 }
 0x18e   :  { %v445_v14 = vpop.f32.mrf.mxu3 }
 0x18f   :  { %v5938_v21 = vadd.f32 %v445_v14, %v41_v10  ;;  %v5102_v10 = vld [vmem:[%s7562_s1 + $0x184] sm:$0xf]  ;;  %v3935_v14 = vld [vmem:[%s7562_s1 + $0x188] sm:$0xf0] }
 0x191   :  { %v5940_v28 = vpop.f32.mrf.mxu1 }
 0x193   :  { %976 = vmatmul.bf16.gmra.mxu3 %v5632_v1 }
 0x194   :  { %4030 = vmatmul.msk.bf16.gmra.mxu1 %vm228_vm0, %v5574_v39 }
 0x196   :  { %v5945_v32 = vpop.f32.mrf.mxu3 }
 0x199   :  { %v676_v33 = vpop.f32.mrf.mxu1 }
 0x19e   :  { %v709_v29 = vpop.f32.mrf.mxu3 }
 0x19f   :  { %v5947_v35 = vadd.f32 %v709_v29, %v676_v33  ;;  %v3938_v29 = vor.u32 %v5102_v10, %v3935_v14  ;;  %v5135_v10 = vld [vmem:[%s7562_s1 + $0x284] sm:$0xf0] }
 0x1a1   :  { %v5949_v36 = vpop.f32.mrf.mxu1  ;;  %1026 = vmatpush.bf16.msrb.mxu0 %v3938_v29  ;;  %v4098_v29 = vld [vmem:[%s7562_s1 + $0x270] sm:$0xf] }
 0x1a3   :  { %981 = vmatmul.bf16.gmra.mxu3 %v5648_v9 }
 0x1a4   :  { %4031 = vmatmul.msk.bf16.gmra.mxu1 %vm228_vm0, %v5635_v4  ;;  %1027 = vmatmul.bf16.vlgmr.msrb.gmra.mxu0 %v5497_v13 }
 0x1a6   :  { %v712_v37 = vpop.f32.mrf.mxu3 }
 0x1a7   :  { %v713_v49 = vadd.f32 %v712_v37, %v5949_v36  ;;  %v5122_v36 = vld [vmem:[%s7562_s1 + $0x224] sm:$0xf]  ;;  %v4015_v37 = vld [vmem:[%s7562_s1 + $0x228] sm:$0xf0] }
 0x1a9   :  { %v681_v38 = vpop.f32.mrf.mxu1 }
 0x1ae   :  { %v714_v40 = vpop.f32.mrf.mxu3 }
 0x1af   :  { %v715_v46 = vadd.f32 %v714_v40, %v681_v38  ;;  %v708_v38 = vadd.f32 %v5945_v32, %v5940_v28  ;;  %v5120_v28 = vld [vmem:[%s7562_s1 + $0x214] sm:$0xf]  ;;  %v4007_v32 = vld [vmem:[%s7562_s1 + $0x218] sm:$0xf0] }
 0x1b0   :  { %v4010_v52 = vor.u32 %v5120_v28, %v4007_v32  ;;  %v5129_v28 = vld [vmem:[%s7562_s1 + $0x254] sm:$0xf0] }
 0x1b1   :  { %v684_v41 = vpop.f32.mrf.mxu1 }
 0x1b4   :  { %1032 = vmatmul.bf16.gmra.mxu0 %v5519_v19 }
 0x1b6   :  { %v717_v26 = vpop.f32.mrf.mxu3 }
 0x1b7   :  { %v718_v44 = vadd.f32 %v717_v26, %v684_v41 }
 0x1b9   :  { %v686_v11 = vpop.f32.mrf.mxu1 }
 0x1be   :  { %v719_v17 = vpop.f32.mrf.mxu3 }
 0x1bf   :  { %v720_v42 = vadd.f32 %v719_v17, %v686_v11  ;;  %v4023_v11 = vld [vmem:[%s7562_s1 + $0x238] sm:$0xf0]  ;;  %v4018_v17 = vor.u32 %v5122_v36, %v4015_v37 }
 0x1c1   :  { %v689_v45 = vpop.f32.mrf.mxu1 }
 0x1c4   :  { %1037 = vmatmul.bf16.gmra.mxu0 %v5559_v34 }
 0x1c6   :  { %v722_v51 = vpop.f32.mrf.mxu3 }
 0x1c7   :  { %v723_v33 = vadd.f32 %v722_v51, %v689_v45  ;;  %v5124_v45 = vld [vmem:[%s7562_s1 + $0x234] sm:$0xf] }
 0x1c8   :  { %v4026_v40 = vor.u32 %v5124_v45, %v4023_v11  ;;  %v4162_v45 = vld [vmem:[%s7562_s1 + $0x2f0] sm:$0xf] }
 0x1c9   :  { %v691_v55 = vpop.f32.mrf.mxu1 }
 0x1ce   :  { %v724_v60 = vpop.f32.mrf.mxu3 }
 0x1cf   :  { %v725_v6 = vadd.f32 %v724_v60, %v691_v55 }
 0x1d1   :  { %v694_v3 = vpop.f32.mrf.mxu1 }
 0x1d4   :  { %1042 = vmatmul.bf16.gmra.mxu0 %v5632_v1 }
 0x1d6   :  { %v727_v15 = vpop.f32.mrf.mxu3 }
 0x1d7   :  { %v728_v7 = vadd.f32 %v727_v15, %v694_v3  ;;  %v4123_v15 = vor.u32 %v5139_v12, %v4122_v20  ;;  %v5145_v20 = vld [vmem:[%s7562_s1 + $0x2d4] sm:$0xf0] }
 0x1d9   :  { %v696_v50 = vpop.f32.mrf.mxu1  ;;  %3903 = vmatpush.msk.msra.mxu2 %vm389_vm1, %v728_v7  ;;  %v5137_v7 = vld [vmem:[%s7562_s1 + $0x294] sm:$0xf0] }
 0x1da   :  { %v4106_v50 = vld [vmem:[%s7562_s1 + $0x280] sm:$0xf] }
 0x1db   :  { %784 = vmatpush.msra.mxu2 %v725_v6  ;;  %v4115_v6 = vor.u32 %v5137_v7, %v4114_v25  ;;  %v4107_v14 = vor.u32 %v5135_v10, %v4106_v50 }
 0x1dd   :  { %785 = vmatpush.msra.mxu2 %v723_v33 }
 0x1de   :  { %v729_v43 = vpop.f32.mrf.mxu3 }
 0x1df   :  { %786 = vmatpush.msra.mxu2 %v720_v42  ;;  %v5133_v42 = vld [vmem:[%s7562_s1 + $0x274] sm:$0xf0] }
 0x1e1   :  { %787 = vmatpush.msra.mxu2 %v718_v44  ;;  %v6004_v47 = vpop.f32.mrf.mxu1  ;;  %v4099_v44 = vor.u32 %v5133_v42, %v4098_v29 }
 0x1e3   :  { %788 = vmatpush.msra.mxu2 %v715_v46  ;;  %v4090_v46 = vld [vmem:[%s7562_s1 + $0x260] sm:$0xf] }
 0x1e4   :  { %1047 = vmatmul.bf16.gmra.mxu0 %v5648_v9 }
 0x1e5   :  { %789 = vmatpush.msra.mxu2 %v713_v49  ;;  %v5131_v49 = vld [vmem:[%s7562_s1 + $0x264] sm:$0xf0] }
 0x1e6   :  { %v6013_v41 = vpop.f32.mrf.mxu3  ;;  %v4091_v11 = vor.u32 %v5131_v49, %v4090_v46 }
 0x1e7   :  { %790 = vmatpush.msra.mxu2 %v5947_v35 }
 0x1e9   :  { %791 = vmatpush.msra.mxu2 %v708_v38  ;;  %v997_v26 = vpop.f32.mrf.mxu1  ;;  %v5149_v38 = vld [vmem:[%s7562_s1 + $0x2f4] sm:$0xf0] }
 0x1ea   :  { %3904 = vmatmul.msk.f32.vlgmr.msra.gmra.mxu2 %vm379_vm2, %v5895_v62  ;;  %v3999_v62 = vld [vmem:[%s7562_s1 + $0x208] sm:$0xf0] }
 0x1eb   :  { %1056 = vmatpush.bf16.msrb.mxu2 %v4026_v40  ;;  %v4002_v55 = vor.u32 %v5118_v53, %v3999_v62  ;;  %v4163_v40 = vor.u32 %v5149_v38, %v4162_v45  ;;  %v4154_v53 = vld [vmem:[%s7562_s1 + $0x2e0] sm:$0xf]  ;;  %v5147_v62 = vld [vmem:[%s7562_s1 + $0x2e4] sm:$0xf0] }
 0x1ed   :  { %1344 = vmatpush.bf16.msra.mxu0 %v4163_v40 }
 0x1ee   :  { %v964_v35 = vpop.f32.mrf.mxu3 }
 0x1ef   :  { %v6032_v51 = vadd.f32 %v997_v26, %v964_v35  ;;  %1057 = vmatpush.bf16.msrb.mxu2 %v4018_v17  ;;  %v4082_v17 = vld [vmem:[%s7562_s1 + $0x250] sm:$0xf] }
 0x1f0   :  { %v4083_v35 = vor.u32 %v5129_v28, %v4082_v17 }
 0x1f1   :  { %v6041_v54 = vpop.f32.mrf.mxu1 }
 0x1f2   :  { %3905 = vmatmul.msk.f32.gmra.mxu2 %vm379_vm2, %v5902_v8 }
 0x1f3   :  { %1058 = vmatpush.bf16.msrb.mxu2 %v4010_v52 }
 0x1f6   :  { %v6045_v56 = vpop.f32.mrf.mxu3 }
 0x1f7   :  { %1059 = vmatpush.bf16.msrb.mxu2 %v4002_v55  ;;  %v4074_v55 = vld [vmem:[%s7562_s1 + $0x240] sm:$0xf]  ;;  %v1001_v25 = vadd.f32 %v6041_v54, %v6045_v56  ;;  %v6147_v54 = vld [vmem:[%s7564_s2 + $0x30] sm:$0xff] }
 0x1f9   :  { %v6047_v57 = vpop.f32.mrf.mxu1 }
 0x1fa   :  { %3906 = vmatmul.msk.f32.gmra.mxu2 %vm379_vm2, %v5912_v24  ;;  %v5141_v24 = vld [vmem:[%s7562_s1 + $0x2b4] sm:$0xf0] }
 0x1fb   :  { %v4131_v5 = vor.u32 %v5141_v24, %v4130_v2  ;;  %v4155_v24 = vor.u32 %v5147_v62, %v4154_v53  ;;  %v5136_v62 = vld [vmem:[%s7562_s1 + $0x294] sm:$0xf] }
 0x1fd   :  { %1307 = vmatpush.bf16.msra.mxu2 %v4131_v5  ;;  %v4146_v5 = vld [vmem:[%s7562_s1 + $0x2d0] sm:$0xf]  ;;  %1345 = vmatpush.bf16.msra.mxu0 %v4155_v24 }
 0x1fe   :  { %v6051_v58 = vpop.f32.mrf.mxu3 }
 0x201   :  { %v1005_v60 = vpop.f32.mrf.mxu1  ;;  %1308 = vmatpush.bf16.msra.mxu2 %v4123_v15 }
 0x202   :  { %4032 = vmatmul.msk.bf16.vlgmr.msrb.gmra.mxu2 %vm228_vm0, %v5461_v59 }
 0x205   :  { %1309 = vmatpush.bf16.msra.mxu2 %v4115_v6 }
 0x206   :  { %v972_v61 = vpop.f32.mrf.mxu3 }
 0x207   :  { %v1006_v15 = vadd.f32 %v1005_v60, %v972_v61  ;;  %v4138_v60 = vld [vmem:[%s7562_s1 + $0x2c0] sm:$0xf]  ;;  %v5143_v61 = vld [vmem:[%s7562_s1 + $0x2c4] sm:$0xf0] }
 0x209   :  { %v1007_v8 = vpop.f32.mrf.mxu1  ;;  %1310 = vmatpush.bf16.msra.mxu2 %v4107_v14 }
 0x20d   :  { %1311 = vmatpush.bf16.msra.mxu2 %v4099_v44 }
 0x20e   :  { %v974_v63 = vpop.f32.mrf.mxu3 }
 0x20f   :  { %v1008_v2 = vadd.f32 %v1007_v8, %v974_v63  ;;  %v4147_v8 = vor.u32 %v5145_v20, %v4146_v5  ;;  %v4108_v5 = vld [vmem:[%s7562_s1 + $0x288] sm:$0xf0] }
 0x211   :  { %v1010_v3 = vpop.f32.mrf.mxu1  ;;  %1312 = vmatpush.bf16.msra.mxu2 %v4091_v11  ;;  %1346 = vmatpush.bf16.msra.mxu0 %v4147_v8 }
 0x212   :  { %4033 = vmatmul.msk.bf16.gmra.mxu2 %vm228_vm0, %v5506_v16 }
 0x215   :  { %1313 = vmatpush.bf16.msra.mxu2 %v4083_v35  ;;  %v5138_v35 = vld [vmem:[%s7562_s1 + $0x2a4] sm:$0xf] }
 0x216   :  { %v977_v18 = vpop.f32.mrf.mxu3 }
 0x217   :  { %v1011_v32 = vadd.f32 %v1010_v3, %v977_v18  ;;  %v5127_v3 = vld [vmem:[%s7562_s1 + $0x244] sm:$0xf0]  ;;  %v1003_v18 = vadd.f32 %v6047_v57, %v6051_v58  ;;  %v4139_v57 = vor.u32 %v5143_v61, %v4138_v60  ;;  %v996_v58 = vadd.f32 %v6004_v47, %v6013_v41  ;;  %v6156_v47 = vld [vmem:[%s7564_s2 + $0x38] sm:$0xff]  ;;  %v6158_v41 = vpop.f32.mrf.mxu0  ;;  %v4092_v60 = vld [vmem:[%s7562_s1 + $0x268] sm:$0xf0] }
 0x218   :  { %v4075_v12 = vor.u32 %v5127_v3, %v4074_v55  ;;  %v4116_v55 = vld [vmem:[%s7562_s1 + $0x298] sm:$0xf0]  ;;  %v5134_v3 = vld [vmem:[%s7562_s1 + $0x284] sm:$0xf] }
 0x219   :  { %v1012_v0 = vpop.f32.mrf.mxu1  ;;  %1347 = vmatpush.bf16.msra.mxu0 %v4139_v57  ;;  %v4111_v20 = vor.u32 %v5134_v3, %v4108_v5  ;;  %v5128_v57 = vld [vmem:[%s7562_s1 + $0x254] sm:$0xf] }
 0x21a   :  { %1314 = vmatpush.bf16.msra.mxu2 %v4075_v12  ;;  %v5132_v12 = vld [vmem:[%s7562_s1 + $0x274] sm:$0xf] }
 0x21c   :  { %4168 = vmatmul.msk.bf16.vlgmr.msra.gmra.mxu0 %vm228_vm0, %v5461_v59 }
 0x21e   :  { %v979_v33 = vpop.f32.mrf.mxu3 }
 0x21f   :  { %v1013_v37 = vadd.f32 %v1012_v0, %v979_v33  ;;  %v6173_v56 = vpop.f32.mrf.mxu0 }
 0x221   :  { %v1015_v43 = vpop.f32.mrf.mxu1 }
 0x222   :  { %4034 = vmatmul.msk.bf16.gmra.mxu2 %vm228_vm0, %v5528_v22 }
 0x226   :  { %v982_v36 = vpop.f32.mrf.mxu3 }
 0x227   :  { %v1016_v26 = vadd.f32 %v1015_v43, %v982_v36  ;;  %v6176_v7 = vpop.f32.mrf.mxu0 }
 0x229   :  { %4040 = vmatpush.msk.msra.mxu3 %vm389_vm1, %v1016_v26  ;;  %v1017_v52 = vpop.f32.mrf.mxu1  ;;  %v4132_v26 = vld [vmem:[%s7562_s1 + $0x2b8] sm:$0xf0] }
 0x22a   :  { %v4124_v52 = vld [vmem:[%s7562_s1 + $0x2a8] sm:$0xf0] }
 0x22b   :  { %1112 = vmatpush.msra.mxu3 %v1013_v37  ;;  %v4127_v53 = vor.u32 %v5138_v35, %v4124_v52 }
 0x22c   :  { %4169 = vmatmul.msk.bf16.gmra.mxu0 %vm228_vm0, %v5506_v16 }
 0x22d   :  { %1113 = vmatpush.msra.mxu3 %v1011_v32 }
 0x22e   :  { %v984_v63 = vpop.f32.mrf.mxu3 }
 0x22f   :  { %1114 = vmatpush.msra.mxu3 %v1008_v2  ;;  %v6180_v0 = vpop.f32.mrf.mxu0  ;;  %v4119_v2 = vor.u32 %v5136_v62, %v4116_v55 }
 0x231   :  { %1115 = vmatpush.msra.mxu3 %v1006_v15  ;;  %v4100_v15 = vld [vmem:[%s7562_s1 + $0x278] sm:$0xf0] }
 0x232   :  { %4035 = vmatmul.msk.bf16.gmra.mxu2 %vm228_vm0, %v5574_v39  ;;  %v4103_v8 = vor.u32 %v5132_v12, %v4100_v15 }
 0x233   :  { %1116 = vmatpush.msra.mxu3 %v1003_v18 }
 0x235   :  { %1117 = vmatpush.msra.mxu3 %v1001_v25  ;;  %v5130_v25 = vld [vmem:[%s7562_s1 + $0x264] sm:$0xf] }
 0x236   :  { %v4095_v61 = vor.u32 %v5130_v25, %v4092_v60 }
 0x237   :  { %1118 = vmatpush.msra.mxu3 %v6032_v51  ;;  %v6167_v51 = vld [vmem:[%s7564_s2 + $0x40] sm:$0xf]  ;;  %v1030_v6 = vpop.f32.mrf.mxu0 }
 0x239   :  { %1119 = vmatpush.msra.mxu3 %v996_v58  ;;  %v4084_v58 = vld [vmem:[%s7562_s1 + $0x258] sm:$0xf0] }
 0x23a   :  { %4041 = vmatmul.msk.f32.vlgmr.msra.gmra.mxu3 %vm379_vm2, %v6147_v54 }
 0x23c   :  { %4170 = vmatmul.msk.bf16.gmra.mxu0 %vm228_vm0, %v5528_v22 }
 0x23f   :  { %v6187_v10 = vpop.f32.mrf.mxu0 }
 0x242   :  { %4036 = vmatmul.msk.bf16.gmra.mxu2 %vm228_vm0, %v5635_v4  ;;  %4042 = vmatmul.msk.f32.gmra.mxu3 %vm379_vm2, %v6156_v47 }
 0x247   :  { %v6192_v33 = vpop.f32.mrf.mxu0 }
 0x24a   :  { %4043 = vmatmul.msk.f32.gmra.mxu3 %vm379_vm2, %v6167_v51 }
 0x24c   :  { %4171 = vmatmul.msk.bf16.gmra.mxu0 %vm228_vm0, %v5574_v39 }
 0x24f   :  { %v6196_v42 = vpop.f32.mrf.mxu0 }
 0x252   :  { %1315 = vmatmul.bf16.vlgmr.msra.gmra.mxu2 %v5497_v13 }
 0x257   :  { %v1040_v46 = vpop.f32.mrf.mxu0 }
 0x25c   :  { %4172 = vmatmul.msk.bf16.gmra.mxu0 %vm228_vm0, %v5635_v4 }
 0x25f   :  { %v1043_v45 = vpop.f32.mrf.mxu0 }
 0x262   :  { %1320 = vmatmul.bf16.gmra.mxu2 %v5519_v19 }
 0x267   :  { %v1045_v40 = vpop.f32.mrf.mxu0 }
 0x26d   :  { %v6185_v50 = vpop.f32.mrf.mxu2 }
 0x26e   :  { %7570 = vst [vmem:[#allocation2_spill] sm:$0xff] %v6185_v50 }
 0x26f   :  { %v1048_v37 = vpop.f32.mrf.mxu0 }
 0x272   :  { %1325 = vmatmul.bf16.gmra.mxu2 %v5559_v34 }
 0x275   :  { %v6190_v14 = vpop.f32.mrf.mxu2 }
 0x277   :  { %v1050_v32 = vpop.f32.mrf.mxu0 }
 0x27d   :  { %v799_v29 = vpop.f32.mrf.mxu2 }
 0x27e   :  { %v6199_v43 = vadd.f32 %v799_v29, %v5938_v21  ;;  %v5140_v21 = vld [vmem:[%s7562_s1 + $0x2b4] sm:$0xf] }
 0x27f   :  { %v4135_v17 = vor.u32 %v5140_v21, %v4132_v26  ;;  %v4076_v21 = vld [vmem:[%s7562_s1 + $0x248] sm:$0xf0] }
 0x281   :  { %1373 = vmatpush.bf16.msrb.mxu3 %v4135_v17 }
 0x282   :  { %1330 = vmatmul.bf16.gmra.mxu2 %v5632_v1 }
 0x285   :  { %v6202_v44 = vpop.f32.mrf.mxu2  ;;  %1374 = vmatpush.bf16.msrb.mxu3 %v4127_v53 }
 0x289   :  { %1375 = vmatpush.bf16.msrb.mxu3 %v4119_v2 }
 0x28d   :  { %v1063_v49 = vpop.f32.mrf.mxu2  ;;  %1376 = vmatpush.bf16.msrb.mxu3 %v4111_v20 }
 0x28e   :  { %v6204_v11 = vadd.f32 %v1063_v49, %v1030_v6  ;;  %v4087_v6 = vor.u32 %v5128_v57, %v4084_v58  ;;  %v5126_v49 = vld [vmem:[%s7562_s1 + $0x244] sm:$0xf] }
 0x28f   :  { %v4079_v17 = vor.u32 %v5126_v49, %v4076_v21  ;;  %v4271_v49 = vld [vmem:[%s7562_s1 + $0x370] sm:$0xf] }
 0x291   :  { %1377 = vmatpush.bf16.msrb.mxu3 %v4103_v8  ;;  %v4140_v8 = vld [vmem:[%s7562_s1 + $0x2c8] sm:$0xf0] }
 0x292   :  { %1335 = vmatmul.bf16.gmra.mxu2 %v5648_v9 }
 0x295   :  { %v1066_v38 = vpop.f32.mrf.mxu2  ;;  %1378 = vmatpush.bf16.msrb.mxu3 %v4095_v61 }
 0x299   :  { %v6237_v18 = vpop.f32.mrf.mxu0  ;;  %1379 = vmatpush.bf16.msrb.mxu3 %v4087_v6 }
 0x29d   :  { %v1068_v36 = vpop.f32.mrf.mxu2  ;;  %1380 = vmatpush.bf16.msrb.mxu3 %v4079_v17  ;;  %v5163_v17 = vld [vmem:[%s7562_s1 + $0x364] sm:$0xf0] }
 0x29e   :  { %v1069_v20 = vadd.f32 %v1068_v36, %v6192_v33  ;;  %v1062_v33 = vadd.f32 %v6202_v44, %v6180_v0  ;;  %v4156_v36 = vld [vmem:[%s7562_s1 + $0x2e8] sm:$0xf0]  ;;  %v5144_v0 = vld [vmem:[%s7562_s1 + $0x2d4] sm:$0xf]  ;;  %v4148_v44 = vld [vmem:[%s7562_s1 + $0x2d8] sm:$0xf0] }
 0x29f   :  { %v4151_v12 = vor.u32 %v5144_v0, %v4148_v44  ;;  %v5157_v0 = vld [vmem:[%s7562_s1 + $0x334] sm:$0xf0] }
 0x2a0   :  { %1381 = vmatmul.bf16.vlgmr.msrb.gmra.mxu3 %v5497_v13 }
 0x2a1   :  { %v1351_v26 = vpop.f32.mrf.mxu0 }
 0x2a5   :  { %v1071_v28 = vpop.f32.mrf.mxu2 }
 0x2a6   :  { %v1072_v3 = vadd.f32 %v1071_v28, %v6196_v42 }
 0x2a9   :  { %v6258_v52 = vpop.f32.mrf.mxu0 }
 0x2ad   :  { %v1073_v24 = vpop.f32.mrf.mxu2 }
 0x2ae   :  { %v1074_v55 = vadd.f32 %v1073_v24, %v1040_v46  ;;  %v4164_v46 = vld [vmem:[%s7562_s1 + $0x2f8] sm:$0xf0] }
 0x2b0   :  { %1386 = vmatmul.bf16.gmra.mxu3 %v5519_v19 }
 0x2b1   :  { %v6262_v5 = vpop.f32.mrf.mxu0 }
 0x2b5   :  { %v1076_v63 = vpop.f32.mrf.mxu2 }
 0x2b6   :  { %v1077_v62 = vadd.f32 %v1076_v63, %v1043_v45 }
 0x2b9   :  { %v6278_v45 = vpop.f32.mrf.mxu0 }
 0x2bd   :  { %v1078_v29 = vpop.f32.mrf.mxu2 }
 0x2be   :  { %v1079_v53 = vadd.f32 %v1078_v29, %v1045_v40  ;;  %v5148_v40 = vld [vmem:[%s7562_s1 + $0x2f4] sm:$0xf] }
 0x2c0   :  { %1391 = vmatmul.bf16.gmra.mxu3 %v5559_v34 }
 0x2c1   :  { %v6296_v15 = vpop.f32.mrf.mxu0 }
 0x2c5   :  { %v1081_v32 = vpop.f32.mrf.mxu2 }
 0x2c6   :  { %v1082_v35 = vadd.f32 %v1081_v32, %v1048_v37  ;;  %v1067_v37 = vadd.f32 %v1066_v38, %v6187_v10  ;;  %v4167_v10 = vor.u32 %v5148_v40, %v4164_v46  ;;  %v5146_v38 = vld [vmem:[%s7562_s1 + $0x2e4] sm:$0xf]  ;;  %v5159_v40 = vld [vmem:[%s7562_s1 + $0x344] sm:$0xf0]  ;;  %v4295_v46 = vld [vmem:[%s7562_s1 + $0x3a0] sm:$0xf] }
 0x2c7   :  { %v4159_v28 = vor.u32 %v5146_v38, %v4156_v36 }
 0x2c8   :  { %4044 = vmatpush.msk.msra.mxu1 %vm389_vm1, %v1082_v35 }
 0x2c9   :  { %v1364_v60 = vpop.f32.mrf.mxu0 }
 0x2ca   :  { %1138 = vmatpush.msra.mxu1 %v1079_v53  ;;  %v4255_v53 = vld [vmem:[%s7562_s1 + $0x350] sm:$0xf] }
 0x2cc   :  { %1139 = vmatpush.msra.mxu1 %v1077_v62  ;;  %v5161_v62 = vld [vmem:[%s7562_s1 + $0x354] sm:$0xf0] }
 0x2cd   :  { %v1083_v2 = vpop.f32.mrf.mxu2 }
 0x2ce   :  { %1140 = vmatpush.msra.mxu1 %v1074_v55  ;;  %v4256_v55 = vor.u32 %v5161_v62, %v4255_v53  ;;  %v4303_v2 = vld [vmem:[%s7562_s1 + $0x3b0] sm:$0xf]  ;;  %v5153_v62 = vld [vmem:[%s7562_s1 + $0x314] sm:$0xf0] }
 0x2cf   :  { %v4223_v53 = vld [vmem:[%s7562_s1 + $0x310] sm:$0xf] }
 0x2d0   :  { %1141 = vmatpush.msra.mxu1 %v1072_v3  ;;  %1396 = vmatmul.bf16.gmra.mxu3 %v5632_v1  ;;  %v5173_v3 = vld [vmem:[%s7562_s1 + $0x3b4] sm:$0xf0] }
 0x2d1   :  { %v1366_v57 = vpop.f32.mrf.mxu0 }
 0x2d2   :  { %1142 = vmatpush.msra.mxu1 %v1069_v20  ;;  %v4247_v20 = vld [vmem:[%s7562_s1 + $0x340] sm:$0xf] }
 0x2d4   :  { %1143 = vmatpush.msra.mxu1 %v1067_v37  ;;  %v4304_v37 = vor.u32 %v5173_v3, %v4303_v2  ;;  %v4224_v2 = vor.u32 %v5153_v62, %v4223_v53  ;;  %v4215_v3 = vld [vmem:[%s7562_s1 + $0x300] sm:$0xf]  ;;  %v5160_v62 = vld [vmem:[%s7562_s1 + $0x354] sm:$0xf] }
 0x2d5   :  { %v6273_v42 = vpop.f32.mrf.mxu2 }
 0x2d6   :  { %1144 = vmatpush.msra.mxu1 %v6204_v11  ;;  %1698 = vmatpush.bf16.msra.mxu3 %v4304_v37 }
 0x2d8   :  { %1145 = vmatpush.msra.mxu1 %v1062_v33  ;;  %v5171_v33 = vld [vmem:[%s7562_s1 + $0x3a4] sm:$0xf0] }
 0x2d9   :  { %4045 = vmatmul.msk.f32.vlgmr.msra.gmra.mxu1 %vm379_vm2, %v6147_v54  ;;  %v5142_v54 = vld [vmem:[%s7562_s1 + $0x2c4] sm:$0xf]  ;;  %v1369_v58 = vpop.f32.mrf.mxu0  ;;  %v4296_v38 = vor.u32 %v5171_v33, %v4295_v46 }
 0x2da   :  { %1410 = vmatpush.bf16.msrb.mxu1 %v4167_v10  ;;  %v4143_v63 = vor.u32 %v5142_v54, %v4140_v8  ;;  %v4248_v10 = vor.u32 %v5159_v40, %v4247_v20  ;;  %v4231_v54 = vld [vmem:[%s7562_s1 + $0x320] sm:$0xf] }
 0x2db   :  { %1699 = vmatpush.bf16.msra.mxu3 %v4296_v38 }
 0x2dd   :  { %v1318_v11 = vpop.f32.mrf.mxu2 }
 0x2de   :  { %v6294_v24 = vadd.f32 %v1351_v26, %v1318_v11  ;;  %1411 = vmatpush.bf16.msrb.mxu1 %v4159_v28  ;;  %v4263_v26 = vld [vmem:[%s7562_s1 + $0x360] sm:$0xf]  ;;  %v4239_v28 = vld [vmem:[%s7562_s1 + $0x330] sm:$0xf] }
 0x2df   :  { %v4264_v32 = vor.u32 %v5163_v17, %v4263_v26  ;;  %v4240_v44 = vor.u32 %v5157_v0, %v4239_v28  ;;  %v4287_v11 = vld [vmem:[%s7562_s1 + $0x390] sm:$0xf] }
 0x2e0   :  { %1401 = vmatmul.bf16.gmra.mxu3 %v5648_v9 }
 0x2e1   :  { %4046 = vmatmul.msk.f32.gmra.mxu1 %vm379_vm2, %v6156_v47  ;;  %v1371_v29 = vpop.f32.mrf.mxu0 }
 0x2e2   :  { %1412 = vmatpush.bf16.msrb.mxu1 %v4151_v12  ;;  %v5169_v12 = vld [vmem:[%s7562_s1 + $0x394] sm:$0xf0]  ;;  %v4279_v29 = vld [vmem:[%s7562_s1 + $0x380] sm:$0xf] }
 0x2e3   :  { %v4288_v8 = vor.u32 %v5169_v12, %v4287_v11 }
 0x2e5   :  { %v6307_v25 = vpop.f32.mrf.mxu2  ;;  %1700 = vmatpush.bf16.msra.mxu3 %v4288_v8 }
 0x2e6   :  { %1413 = vmatpush.bf16.msrb.mxu1 %v4143_v63  ;;  %v5155_v63 = vld [vmem:[%s7562_s1 + $0x324] sm:$0xf0]  ;;  %v1355_v40 = vadd.f32 %v6258_v52, %v6307_v25  ;;  %v6417_v52 = vpop.f32.mrf.mxu3 }
 0x2e9   :  { %4047 = vmatmul.msk.f32.gmra.mxu1 %vm379_vm2, %v6167_v51  ;;  %v5165_v51 = vld [vmem:[%s7562_s1 + $0x374] sm:$0xf0] }
 0x2ea   :  { %v4272_v21 = vor.u32 %v5165_v51, %v4271_v49  ;;  %v5167_v49 = vld [vmem:[%s7562_s1 + $0x384] sm:$0xf0]  ;;  %v4232_v51 = vor.u32 %v5155_v63, %v4231_v54 }
 0x2ec   :  { %1661 = vmatpush.bf16.msra.mxu1 %v4272_v21  ;;  %v4280_v21 = vor.u32 %v5167_v49, %v4279_v29  ;;  %v4273_v49 = vld [vmem:[%s7562_s1 + $0x378] sm:$0xf0] }
 0x2ed   :  { %v6311_v61 = vpop.f32.mrf.mxu2 }
 0x2ee   :  { %1701 = vmatpush.bf16.msra.mxu3 %v4280_v21  ;;  %v1357_v37 = vadd.f32 %v6262_v5, %v6311_v61  ;;  %v6413_v5 = vld [vmem:[%s7564_s2 + $0x48] sm:$0xff] }
 0x2f0   :  { %1662 = vmatpush.bf16.msra.mxu1 %v4264_v32 }
 0x2f1   :  { %4173 = vmatmul.msk.bf16.vlgmr.msrb.gmra.mxu1 %vm228_vm0, %v5461_v59  ;;  %4309 = vmatmul.msk.bf16.vlgmr.msra.gmra.mxu3 %vm228_vm0, %v5461_v59 }
 0x2f4   :  { %1663 = vmatpush.bf16.msra.mxu1 %v4256_v55 }
 0x2f5   :  { %v6316_v47 = vpop.f32.mrf.mxu2 }
 0x2f8   :  { %1664 = vmatpush.bf16.msra.mxu1 %v4248_v10 }
 0x2fc   :  { %1665 = vmatpush.bf16.msra.mxu1 %v4240_v44 }
 0x2fd   :  { %v1328_v6 = vpop.f32.mrf.mxu2 }
 0x300   :  { %1666 = vmatpush.bf16.msra.mxu1 %v4232_v51 }
 0x301   :  { %4174 = vmatmul.msk.bf16.gmra.mxu1 %vm228_vm0, %v5506_v16  ;;  %4310 = vmatmul.msk.bf16.gmra.mxu3 %vm228_vm0, %v5506_v16 }
 0x304   :  { %1667 = vmatpush.bf16.msra.mxu1 %v4224_v2 }
 0x305   :  { %v1331_v35 = vpop.f32.mrf.mxu2 }
 0x306   :  { %v1365_v55 = vadd.f32 %v1364_v60, %v1331_v35  ;;  %v1360_v60 = vadd.f32 %v6278_v45, %v6316_v47  ;;  %v6435_v45 = vld [vmem:[%s7564_s2 + $0x58] sm:$0xf] }
 0x30d   :  { %v1333_v36 = vpop.f32.mrf.mxu2 }
 0x30e   :  { %v1367_v17 = vadd.f32 %v1366_v57, %v1333_v36  ;;  %v5151_v57 = vld [vmem:[%s7562_s1 + $0x304] sm:$0xf0] }
 0x30f   :  { %v4216_v20 = vor.u32 %v5151_v57, %v4215_v3  ;;  %v5158_v57 = vld [vmem:[%s7562_s1 + $0x344] sm:$0xf] }
 0x311   :  { %4175 = vmatmul.msk.bf16.gmra.mxu1 %vm228_vm0, %v5528_v22  ;;  %4311 = vmatmul.msk.bf16.gmra.mxu3 %vm228_vm0, %v5528_v22 }
 0x312   :  { %1668 = vmatpush.bf16.msra.mxu1 %v4216_v20 }
 0x315   :  { %v1336_v26 = vpop.f32.mrf.mxu2 }
 0x316   :  { %v1370_v32 = vadd.f32 %v1369_v58, %v1336_v26  ;;  %v1362_v58 = vadd.f32 %v6296_v15, %v1328_v6  ;;  %v1350_v15 = vadd.f32 %v6237_v18, %v6273_v42  ;;  %v6424_v18 = vld [vmem:[%s7564_s2 + $0x50] sm:$0xff]  ;;  %v6430_v42 = vpop.f32.mrf.mxu3 }
 0x318   :  { %4181 = vmatpush.msk.msrb.mxu2 %vm389_vm1, %v1370_v32  ;;  %v4265_v32 = vld [vmem:[%s7562_s1 + $0x368] sm:$0xf0] }
 0x31a   :  { %1466 = vmatpush.msrb.mxu2 %v1367_v17  ;;  %v5162_v17 = vld [vmem:[%s7562_s1 + $0x364] sm:$0xf] }
 0x31b   :  { %v4268_v53 = vor.u32 %v5162_v17, %v4265_v32  ;;  %v5150_v32 = vld [vmem:[%s7562_s1 + $0x304] sm:$0xf] }
 0x31c   :  { %1467 = vmatpush.msrb.mxu2 %v1365_v55  ;;  %v4257_v55 = vld [vmem:[%s7562_s1 + $0x358] sm:$0xf0] }
 0x31d   :  { %v1338_v35 = vpop.f32.mrf.mxu2  ;;  %v4260_v2 = vor.u32 %v5160_v62, %v4257_v55 }
 0x31e   :  { %1468 = vmatpush.msrb.mxu2 %v1362_v58  ;;  %v4249_v58 = vld [vmem:[%s7562_s1 + $0x348] sm:$0xf0]  ;;  %v4241_v35 = vld [vmem:[%s7562_s1 + $0x338] sm:$0xf0] }
 0x31f   :  { %v4252_v20 = vor.u32 %v5158_v57, %v4249_v58 }
 0x320   :  { %1469 = vmatpush.msrb.mxu2 %v1360_v60  ;;  %v5156_v60 = vld [vmem:[%s7562_s1 + $0x334] sm:$0xf] }
 0x321   :  { %4176 = vmatmul.msk.bf16.gmra.mxu1 %vm228_vm0, %v5574_v39  ;;  %4312 = vmatmul.msk.bf16.gmra.mxu3 %vm228_vm0, %v5574_v39 }
 0x322   :  { %1470 = vmatpush.msrb.mxu2 %v1357_v37  ;;  %v4244_v37 = vor.u32 %v5156_v60, %v4241_v35 }
 0x324   :  { %1471 = vmatpush.msrb.mxu2 %v1355_v40 }
 0x326   :  { %1472 = vmatpush.msrb.mxu2 %v6294_v24  ;;  %v6441_v24 = vpop.f32.mrf.mxu3 }
 0x328   :  { %1473 = vmatpush.msrb.mxu2 %v1350_v15 }
 0x329   :  { %4182 = vmatmul.msk.f32.vlgmr.msrb.gmra.mxu2 %vm379_vm2, %v6413_v5 }
 0x32e   :  { %v6444_v25 = vpop.f32.mrf.mxu3 }
 0x331   :  { %4177 = vmatmul.msk.bf16.gmra.mxu1 %vm228_vm0, %v5635_v4  ;;  %4183 = vmatmul.msk.f32.gmra.mxu2 %vm379_vm2, %v6424_v18 }
 0x332   :  { %4313 = vmatmul.msk.bf16.gmra.mxu3 %vm228_vm0, %v5635_v4 }
 0x336   :  { %v1384_v61 = vpop.f32.mrf.mxu3 }
 0x339   :  { %4184 = vmatmul.msk.f32.gmra.mxu2 %vm379_vm2, %v6435_v45 }
 0x33e   :  { %v6451_v6 = vpop.f32.mrf.mxu3 }
 0x341   :  { %1669 = vmatmul.bf16.vlgmr.msra.gmra.mxu1 %v5497_v13 }
 0x346   :  { %v6457_v33 = vpop.f32.mrf.mxu3 }
 0x34e   :  { %v6460_v38 = vpop.f32.mrf.mxu3 }
 0x351   :  { %1674 = vmatmul.bf16.gmra.mxu1 %v5519_v19 }
 0x356   :  { %v6449_v47 = vpop.f32.mrf.mxu1  ;;  %v1394_v0 = vpop.f32.mrf.mxu3 }
 0x357   :  { %7571 = vst [vmem:[#allocation3_spill] sm:$0xff] %v6449_v47 }
 0x35e   :  { %v6455_v46 = vpop.f32.mrf.mxu1  ;;  %v1397_v11 = vpop.f32.mrf.mxu3 }
 0x361   :  { %1679 = vmatmul.bf16.gmra.mxu1 %v5559_v34 }
 0x366   :  { %v1153_v10 = vpop.f32.mrf.mxu1  ;;  %v1399_v8 = vpop.f32.mrf.mxu3 }
 0x367   :  { %v6463_v36 = vadd.f32 %v1153_v10, %v6199_v43  ;;  %v5164_v43 = vld [vmem:[%s7562_s1 + $0x374] sm:$0xf]  ;;  %v4233_v10 = vld [vmem:[%s7562_s1 + $0x328] sm:$0xf0] }
 0x368   :  { %v4276_v51 = vor.u32 %v5164_v43, %v4273_v49  ;;  %v5152_v43 = vld [vmem:[%s7562_s1 + $0x314] sm:$0xf]  ;;  %v4225_v49 = vld [vmem:[%s7562_s1 + $0x318] sm:$0xf0] }
 0x36a   :  { %1727 = vmatpush.bf16.msra.mxu2 %v4276_v51  ;;  %v4228_v51 = vor.u32 %v5152_v43, %v4225_v49  ;;  %v4281_v43 = vld [vmem:[%s7562_s1 + $0x388] sm:$0xf0] }
 0x36e   :  { %v6465_v28 = vpop.f32.mrf.mxu1  ;;  %v1402_v29 = vpop.f32.mrf.mxu3  ;;  %1728 = vmatpush.bf16.msra.mxu2 %v4268_v53  ;;  %v4217_v53 = vld [vmem:[%s7562_s1 + $0x308] sm:$0xf0] }
 0x36f   :  { %v4220_v62 = vor.u32 %v5150_v32, %v4217_v53 }
 0x371   :  { %1684 = vmatmul.bf16.gmra.mxu1 %v5632_v1 }
 0x372   :  { %1729 = vmatpush.bf16.msra.mxu2 %v4260_v2 }
 0x376   :  { %v1417_v44 = vpop.f32.mrf.mxu1  ;;  %v1404_v26 = vpop.f32.mrf.mxu3  ;;  %1730 = vmatpush.bf16.msra.mxu2 %v4252_v20 }
 0x377   :  { %v6468_v12 = vadd.f32 %v1417_v44, %v1384_v61  ;;  %v5154_v61 = vld [vmem:[%s7562_s1 + $0x324] sm:$0xf] }
 0x378   :  { %v4236_v44 = vor.u32 %v5154_v61, %v4233_v10 }
 0x37a   :  { %1731 = vmatpush.bf16.msra.mxu2 %v4244_v37 }
 0x37e   :  { %v1420_v54 = vpop.f32.mrf.mxu1  ;;  %v6501_v15 = vpop.f32.mrf.mxu3  ;;  %1732 = vmatpush.bf16.msra.mxu2 %v4236_v44 }
 0x37f   :  { %v1421_v44 = vadd.f32 %v1420_v54, %v6451_v6  ;;  %v5170_v54 = vld [vmem:[%s7562_s1 + $0x3a4] sm:$0xf] }
 0x381   :  { %1689 = vmatmul.bf16.gmra.mxu1 %v5648_v9 }
 0x382   :  { %1733 = vmatpush.bf16.msra.mxu2 %v4228_v51 }
 0x386   :  { %v1422_v63 = vpop.f32.mrf.mxu1  ;;  %v1705_v17 = vpop.f32.mrf.mxu3  ;;  %1734 = vmatpush.bf16.msra.mxu2 %v4220_v62 }
 0x387   :  { %v1423_v10 = vadd.f32 %v1422_v63, %v6457_v33  ;;  %v1416_v33 = vadd.f32 %v6465_v28, %v6444_v25  ;;  %v4297_v63 = vld [vmem:[%s7562_s1 + $0x3a8] sm:$0xf0]  ;;  %v5168_v25 = vld [vmem:[%s7562_s1 + $0x394] sm:$0xf]  ;;  %v4289_v28 = vld [vmem:[%s7562_s1 + $0x398] sm:$0xf0] }
 0x389   :  { %1735 = vmatmul.bf16.vlgmr.msra.gmra.mxu2 %v5497_v13 }
 0x38e   :  { %v1425_v21 = vpop.f32.mrf.mxu1  ;;  %v6522_v2 = vpop.f32.mrf.mxu3 }
 0x38f   :  { %v1426_v61 = vadd.f32 %v1425_v21, %v6460_v38 }
 0x396   :  { %v1427_v3 = vpop.f32.mrf.mxu1  ;;  %v6525_v37 = vpop.f32.mrf.mxu3 }
 0x397   :  { %v1428_v60 = vadd.f32 %v1427_v3, %v1394_v0  ;;  %v4305_v0 = vld [vmem:[%s7562_s1 + $0x3b8] sm:$0xf0] }
 0x399   :  { %1740 = vmatmul.bf16.gmra.mxu2 %v5519_v19 }
 0x39e   :  { %v1430_v40 = vpop.f32.mrf.mxu1  ;;  %v6539_v38 = vpop.f32.mrf.mxu3 }
 0x39f   :  { %v1431_v20 = vadd.f32 %v1430_v40, %v1397_v11  ;;  %v4292_v40 = vor.u32 %v5168_v25, %v4289_v28  ;;  %v5195_v25 = vld [vmem:[%s7562_s1 + $0x464] sm:$0xf0] }
 0x3a6   :  { %v1432_v26 = vpop.f32.mrf.mxu1  ;;  %v6558_v21 = vpop.f32.mrf.mxu3 }
 0x3a7   :  { %v1433_v58 = vadd.f32 %v1432_v26, %v1399_v8  ;;  %v5172_v8 = vld [vmem:[%s7562_s1 + $0x3b4] sm:$0xf] }
 0x3a8   :  { %v4308_v6 = vor.u32 %v5172_v8, %v4305_v0  ;;  %v4444_v0 = vld [vmem:[%s7562_s1 + $0x470] sm:$0xf] }
 0x3a9   :  { %1745 = vmatmul.bf16.gmra.mxu2 %v5559_v34 }
 0x3ae   :  { %v1435_v55 = vpop.f32.mrf.mxu1  ;;  %v1718_v26 = vpop.f32.mrf.mxu3 }
 0x3af   :  { %v1436_v57 = vadd.f32 %v1435_v55, %v1402_v29  ;;  %v4300_v29 = vor.u32 %v5170_v54, %v4297_v63  ;;  %v5183_v63 = vld [vmem:[%s7562_s1 + $0x404] sm:$0xf0] }
 0x3b1   :  { %4185 = vmatpush.msk.msrb.mxu0 %vm389_vm1, %v1436_v57  ;;  %v4412_v57 = vld [vmem:[%s7562_s1 + $0x430] sm:$0xf] }
 0x3b3   :  { %1492 = vmatpush.msrb.mxu0 %v1433_v58 }
 0x3b5   :  { %1493 = vmatpush.msrb.mxu0 %v1431_v20  ;;  %v4404_v20 = vld [vmem:[%s7562_s1 + $0x420] sm:$0xf] }
 0x3b6   :  { %v1437_v35 = vpop.f32.mrf.mxu1  ;;  %v1720_v32 = vpop.f32.mrf.mxu3 }
 0x3b7   :  { %1494 = vmatpush.msrb.mxu0 %v1428_v60  ;;  %v5187_v60 = vld [vmem:[%s7562_s1 + $0x424] sm:$0xf0] }
 0x3b8   :  { %v4405_v35 = vor.u32 %v5187_v60, %v4404_v20  ;;  %v5179_v20 = vld [vmem:[%s7562_s1 + $0x3e4] sm:$0xf0]  ;;  %v4420_v60 = vld [vmem:[%s7562_s1 + $0x440] sm:$0xf] }
 0x3b9   :  { %1495 = vmatpush.msrb.mxu0 %v1426_v61  ;;  %1750 = vmatmul.bf16.gmra.mxu2 %v5632_v1 }
 0x3bb   :  { %1496 = vmatpush.msrb.mxu0 %v1423_v10  ;;  %v4396_v10 = vld [vmem:[%s7562_s1 + $0x410] sm:$0xf] }
 0x3bd   :  { %1497 = vmatpush.msrb.mxu0 %v1421_v44  ;;  %v5185_v44 = vld [vmem:[%s7562_s1 + $0x414] sm:$0xf0] }
 0x3be   :  { %v6537_v11 = vpop.f32.mrf.mxu1  ;;  %v1723_v53 = vpop.f32.mrf.mxu3  ;;  %v4397_v8 = vor.u32 %v5185_v44, %v4396_v10 }
 0x3bf   :  { %1498 = vmatpush.msrb.mxu0 %v6468_v12 }
 0x3c1   :  { %1499 = vmatpush.msrb.mxu0 %v1416_v33  ;;  %v5197_v33 = vld [vmem:[%s7562_s1 + $0x474] sm:$0xf0] }
 0x3c2   :  { %4186 = vmatmul.msk.f32.vlgmr.msrb.gmra.mxu0 %vm379_vm2, %v6413_v5  ;;  %v5166_v5 = vld [vmem:[%s7562_s1 + $0x384] sm:$0xf]  ;;  %v4445_v54 = vor.u32 %v5197_v33, %v4444_v0 }
 0x3c3   :  { %1764 = vmatpush.bf16.msra.mxu0 %v4308_v6  ;;  %v4284_v49 = vor.u32 %v5166_v5, %v4281_v43  ;;  %v4388_v6 = vld [vmem:[%s7562_s1 + $0x400] sm:$0xf]  ;;  %v4380_v5 = vld [vmem:[%s7562_s1 + $0x3f0] sm:$0xf]  ;;  %v5181_v43 = vld [vmem:[%s7562_s1 + $0x3f4] sm:$0xf0] }
 0x3c4   :  { %v4389_v28 = vor.u32 %v5183_v63, %v4388_v6  ;;  %2052 = vmatpush.bf16.msrb.mxu2 %v4445_v54  ;;  %v4364_v6 = vld [vmem:[%s7562_s1 + $0x3d0] sm:$0xf]  ;;  %v5177_v54 = vld [vmem:[%s7562_s1 + $0x3d4] sm:$0xf0] }
 0x3c6   :  { %v1672_v12 = vpop.f32.mrf.mxu1  ;;  %v1725_v55 = vpop.f32.mrf.mxu3 }
 0x3c7   :  { %v6560_v3 = vadd.f32 %v1705_v17, %v1672_v12  ;;  %1765 = vmatpush.bf16.msra.mxu0 %v4300_v29  ;;  %v4436_v29 = vld [vmem:[%s7562_s1 + $0x460] sm:$0xf]  ;;  %v4428_v55 = vld [vmem:[%s7562_s1 + $0x450] sm:$0xf] }
 0x3c8   :  { %v4437_v12 = vor.u32 %v5195_v25, %v4436_v29  ;;  %v4365_v29 = vor.u32 %v5177_v54, %v4364_v6  ;;  %v4356_v25 = vld [vmem:[%s7562_s1 + $0x3c0] sm:$0xf] }
 0x3c9   :  { %1755 = vmatmul.bf16.gmra.mxu2 %v5648_v9 }
 0x3ca   :  { %4187 = vmatmul.msk.f32.gmra.mxu0 %vm379_vm2, %v6424_v18  ;;  %2053 = vmatpush.bf16.msrb.mxu2 %v4437_v12 }
 0x3cb   :  { %1766 = vmatpush.bf16.msra.mxu0 %v4292_v40 }
 0x3ce   :  { %v6571_v51 = vpop.f32.mrf.mxu1 }
 0x3cf   :  { %1767 = vmatpush.bf16.msra.mxu0 %v4284_v49  ;;  %v4381_v49 = vor.u32 %v5181_v43, %v4380_v5 }
 0x3d2   :  { %4188 = vmatmul.msk.f32.gmra.mxu0 %vm379_vm2, %v6435_v45  ;;  %v5189_v45 = vld [vmem:[%s7562_s1 + $0x434] sm:$0xf0] }
 0x3d3   :  { %v4413_v58 = vor.u32 %v5189_v45, %v4412_v57  ;;  %v5193_v57 = vld [vmem:[%s7562_s1 + $0x454] sm:$0xf0]  ;;  %v4372_v45 = vld [vmem:[%s7562_s1 + $0x3e0] sm:$0xf] }
 0x3d4   :  { %v4373_v10 = vor.u32 %v5179_v20, %v4372_v45 }
 0x3d5   :  { %2015 = vmatpush.bf16.msrb.mxu0 %v4413_v58  ;;  %v4429_v58 = vor.u32 %v5193_v57, %v4428_v55 }
 0x3d6   :  { %v6575_v17 = vpop.f32.mrf.mxu1 }
 0x3d7   :  { %2054 = vmatpush.bf16.msrb.mxu2 %v4429_v58  ;;  %v1711_v12 = vadd.f32 %v6525_v37, %v6575_v17  ;;  %v6677_v37 = vld [vmem:[%s7564_s2 + $0x60] sm:$0xff] }
 0x3d9   :  { %2016 = vmatpush.bf16.msrb.mxu0 %v4405_v35  ;;  %v5191_v35 = vld [vmem:[%s7562_s1 + $0x444] sm:$0xf0] }
 0x3da   :  { %4314 = vmatmul.msk.bf16.vlgmr.msra.gmra.mxu0 %vm228_vm0, %v5461_v59  ;;  %v4421_v44 = vor.u32 %v5191_v35, %v4420_v60 }
 0x3dc   :  { %2055 = vmatpush.bf16.msrb.mxu2 %v4421_v44 }
 0x3dd   :  { %2017 = vmatpush.bf16.msrb.mxu0 %v4397_v8 }
 0x3de   :  { %v6580_v18 = vpop.f32.mrf.mxu1 }
 0x3df   :  { %4450 = vmatmul.msk.bf16.vlgmr.msrb.gmra.mxu2 %vm228_vm0, %v5461_v59 }
 0x3e1   :  { %2018 = vmatpush.bf16.msrb.mxu0 %v4389_v28 }
 0x3e5   :  { %2019 = vmatpush.bf16.msrb.mxu0 %v4381_v49 }
 0x3e6   :  { %v1682_v62 = vpop.f32.mrf.mxu1 }
 0x3e9   :  { %2020 = vmatpush.bf16.msrb.mxu0 %v4373_v10 }
 0x3ea   :  { %4315 = vmatmul.msk.bf16.gmra.mxu0 %vm228_vm0, %v5506_v16 }
 0x3ed   :  { %2021 = vmatpush.bf16.msrb.mxu0 %v4365_v29 }
 0x3ee   :  { %v1685_v61 = vpop.f32.mrf.mxu1 }
 0x3ef   :  { %v1719_v63 = vadd.f32 %v1718_v26, %v1685_v61  ;;  %v1714_v26 = vadd.f32 %v6539_v38, %v6580_v18  ;;  %4451 = vmatmul.msk.bf16.gmra.mxu2 %vm228_vm0, %v5506_v16  ;;  %v6699_v38 = vld [vmem:[%s7564_s2 + $0x70] sm:$0xf] }
 0x3f6   :  { %v1687_v40 = vpop.f32.mrf.mxu1 }
 0x3f7   :  { %v1721_v0 = vadd.f32 %v1720_v32, %v1687_v40  ;;  %v5175_v32 = vld [vmem:[%s7562_s1 + $0x3c4] sm:$0xf0]  ;;  %v1709_v40 = vadd.f32 %v6522_v2, %v6571_v51  ;;  %v6681_v2 = vpop.f32.mrf.mxu2 }
 0x3f8   :  { %v4357_v28 = vor.u32 %v5175_v32, %v4356_v25  ;;  %v5186_v25 = vld [vmem:[%s7562_s1 + $0x424] sm:$0xf]  ;;  %v4406_v32 = vld [vmem:[%s7562_s1 + $0x428] sm:$0xf0] }
 0x3fa   :  { %4316 = vmatmul.msk.bf16.gmra.mxu0 %vm228_vm0, %v5528_v22 }
 0x3fb   :  { %2022 = vmatpush.bf16.msrb.mxu0 %v4357_v28 }
 0x3fe   :  { %v1690_v8 = vpop.f32.mrf.mxu1 }
 0x3ff   :  { %v1724_v33 = vadd.f32 %v1723_v53, %v1690_v8  ;;  %v1716_v53 = vadd.f32 %v6558_v21, %v1682_v62  ;;  %v1704_v21 = vadd.f32 %v6501_v15, %v6537_v11  ;;  %v6688_v15 = vld [vmem:[%s7564_s2 + $0x68] sm:$0xff]  ;;  %v6694_v11 = vpop.f32.mrf.mxu2  ;;  %4452 = vmatmul.msk.bf16.gmra.mxu2 %vm228_vm0, %v5528_v22 }
 0x401   :  { %4322 = vmatpush.msk.msrb.mxu1 %vm389_vm1, %v1724_v33 }
 0x403   :  { %1820 = vmatpush.msrb.mxu1 %v1721_v0 }
 0x405   :  { %1821 = vmatpush.msrb.mxu1 %v1719_v63  ;;  %v4414_v63 = vld [vmem:[%s7562_s1 + $0x438] sm:$0xf0] }
 0x406   :  { %v1692_v61 = vpop.f32.mrf.mxu1 }
 0x407   :  { %1822 = vmatpush.msrb.mxu1 %v1716_v53  ;;  %v4409_v53 = vor.u32 %v5186_v25, %v4406_v32  ;;  %v5184_v61 = vld [vmem:[%s7562_s1 + $0x414] sm:$0xf]  ;;  %v5178_v25 = vld [vmem:[%s7562_s1 + $0x3e4] sm:$0xf]  ;;  %v4374_v32 = vld [vmem:[%s7562_s1 + $0x3e8] sm:$0xf0] }
 0x409   :  { %1823 = vmatpush.msrb.mxu1 %v1714_v26 }
 0x40a   :  { %4317 = vmatmul.msk.bf16.gmra.mxu0 %vm228_vm0, %v5574_v39 }
 0x40b   :  { %1824 = vmatpush.msrb.mxu1 %v1711_v12  ;;  %v4398_v12 = vld [vmem:[%s7562_s1 + $0x418] sm:$0xf0] }
 0x40d   :  { %1825 = vmatpush.msrb.mxu1 %v1709_v40  ;;  %v4401_v40 = vor.u32 %v5184_v61, %v4398_v12  ;;  %v5176_v12 = vld [vmem:[%s7562_s1 + $0x3d4] sm:$0xf] }
 0x40f   :  { %1826 = vmatpush.msrb.mxu1 %v6560_v3  ;;  %v6705_v3 = vpop.f32.mrf.mxu2  ;;  %4453 = vmatmul.msk.bf16.gmra.mxu2 %vm228_vm0, %v5574_v39 }
 0x411   :  { %1827 = vmatpush.msrb.mxu1 %v1704_v21  ;;  %v5182_v21 = vld [vmem:[%s7562_s1 + $0x404] sm:$0xf] }
 0x412   :  { %4323 = vmatmul.msk.f32.vlgmr.msrb.gmra.mxu1 %vm379_vm2, %v6677_v37 }
 0x417   :  { %v6708_v51 = vpop.f32.mrf.mxu2 }
 0x41a   :  { %4318 = vmatmul.msk.bf16.gmra.mxu0 %vm228_vm0, %v5635_v4  ;;  %4324 = vmatmul.msk.f32.gmra.mxu1 %vm379_vm2, %v6688_v15 }
 0x41f   :  { %v1738_v17 = vpop.f32.mrf.mxu2  ;;  %4454 = vmatmul.msk.bf16.gmra.mxu2 %vm228_vm0, %v5635_v4 }
 0x422   :  { %4325 = vmatmul.msk.f32.gmra.mxu1 %vm379_vm2, %v6699_v38 }
 0x427   :  { %v6715_v62 = vpop.f32.mrf.mxu2 }
 0x42a   :  { %2023 = vmatmul.bf16.vlgmr.msrb.gmra.mxu0 %v5497_v13 }
 0x42f   :  { %v6721_v43 = vpop.f32.mrf.mxu2 }
 0x437   :  { %v1746_v55 = vpop.f32.mrf.mxu2 }
 0x43a   :  { %2028 = vmatmul.bf16.gmra.mxu0 %v5519_v19 }
 0x43f   :  { %v6713_v18 = vpop.f32.mrf.mxu0  ;;  %v1748_v58 = vpop.f32.mrf.mxu2 }
 0x440   :  { %7572 = vst [vmem:[#allocation4_spill] sm:$0xff] %v6713_v18 }
 0x447   :  { %v6719_v5 = vpop.f32.mrf.mxu0  ;;  %v1751_v60 = vpop.f32.mrf.mxu2 }
 0x44a   :  { %2033 = vmatmul.bf16.gmra.mxu0 %v5559_v34 }
 0x44f   :  { %v1507_v49 = vpop.f32.mrf.mxu0  ;;  %v1753_v44 = vpop.f32.mrf.mxu2 }
 0x450   :  { %v6725_v57 = vadd.f32 %v1507_v49, %v6463_v36  ;;  %v5188_v36 = vld [vmem:[%s7562_s1 + $0x434] sm:$0xf] }
 0x451   :  { %v4417_v29 = vor.u32 %v5188_v36, %v4414_v63  ;;  %v4382_v36 = vld [vmem:[%s7562_s1 + $0x3f8] sm:$0xf0] }
 0x453   :  { %2081 = vmatpush.bf16.msra.mxu1 %v4417_v29 }
 0x457   :  { %v6727_v45 = vpop.f32.mrf.mxu0  ;;  %v1756_v0 = vpop.f32.mrf.mxu2  ;;  %2082 = vmatpush.bf16.msra.mxu1 %v4409_v53  ;;  %v4377_v53 = vor.u32 %v5178_v25, %v4374_v32 }
 0x45a   :  { %2038 = vmatmul.bf16.gmra.mxu0 %v5632_v1 }
 0x45b   :  { %2083 = vmatpush.bf16.msra.mxu1 %v4401_v40  ;;  %v4366_v40 = vld [vmem:[%s7562_s1 + $0x3d8] sm:$0xf0] }
 0x45f   :  { %v1771_v20 = vpop.f32.mrf.mxu0  ;;  %v1758_v6 = vpop.f32.mrf.mxu2 }
 0x460   :  { %v6730_v35 = vadd.f32 %v1771_v20, %v1738_v17  ;;  %v4390_v17 = vld [vmem:[%s7562_s1 + $0x408] sm:$0xf0]  ;;  %v5180_v6 = vld [vmem:[%s7562_s1 + $0x3f4] sm:$0xf] }
 0x461   :  { %v4393_v49 = vor.u32 %v5182_v21, %v4390_v17  ;;  %v4385_v29 = vor.u32 %v5180_v6, %v4382_v36  ;;  %v5174_v36 = vld [vmem:[%s7562_s1 + $0x3c4] sm:$0xf] }
 0x463   :  { %2084 = vmatpush.bf16.msra.mxu1 %v4393_v49  ;;  %v4369_v49 = vor.u32 %v5176_v12, %v4366_v40 }
 0x467   :  { %v1774_v10 = vpop.f32.mrf.mxu0  ;;  %v6745_v26 = vpop.f32.mrf.mxu2  ;;  %2085 = vmatpush.bf16.msra.mxu1 %v4385_v29  ;;  %v4358_v29 = vld [vmem:[%s7562_s1 + $0x3c8] sm:$0xf0] }
 0x468   :  { %v4361_v32 = vor.u32 %v5174_v36, %v4358_v29  ;;  %v1775_v12 = vadd.f32 %v1774_v10, %v6715_v62  ;;  %v5194_v62 = vld [vmem:[%s7562_s1 + $0x464] sm:$0xf]  ;;  %v4438_v10 = vld [vmem:[%s7562_s1 + $0x468] sm:$0xf0] }
 0x46a   :  { %2043 = vmatmul.bf16.gmra.mxu0 %v5648_v9 }
 0x46b   :  { %2086 = vmatpush.bf16.msra.mxu1 %v4377_v53 }
 0x46f   :  { %v1776_v8 = vpop.f32.mrf.mxu0  ;;  %v2059_v63 = vpop.f32.mrf.mxu2  ;;  %2087 = vmatpush.bf16.msra.mxu1 %v4369_v49  ;;  %v4422_v49 = vld [vmem:[%s7562_s1 + $0x448] sm:$0xf0] }
 0x473   :  { %2088 = vmatpush.bf16.msra.mxu1 %v4361_v32 }
 0x476   :  { %2089 = vmatmul.bf16.vlgmr.msra.gmra.mxu1 %v5497_v13 }
 0x477   :  { %v1779_v33 = vpop.f32.mrf.mxu0  ;;  %v6777_v17 = vpop.f32.mrf.mxu2 }
 0x47f   :  { %v1781_v54 = vpop.f32.mrf.mxu0 }
 0x480   :  { %v1782_v53 = vadd.f32 %v1781_v54, %v1748_v58  ;;  %v4446_v58 = vld [vmem:[%s7562_s1 + $0x478] sm:$0xf0]  ;;  %v4441_v54 = vor.u32 %v5194_v62, %v4438_v10  ;;  %v5209_v62 = vld [vmem:[%s7562_s1 + $0x4d4] sm:$0xf0] }
 0x486   :  { %2094 = vmatmul.bf16.gmra.mxu1 %v5519_v19 }
 0x487   :  { %v1784_v28 = vpop.f32.mrf.mxu0 }
 0x488   :  { %v1785_v25 = vadd.f32 %v1784_v28, %v1751_v60  ;;  %v5196_v60 = vld [vmem:[%s7562_s1 + $0x474] sm:$0xf] }
 0x48f   :  { %v1786_v20 = vpop.f32.mrf.mxu0 }
 0x490   :  { %v1787_v6 = vadd.f32 %v1786_v20, %v1753_v44  ;;  %v6786_v44 = vpop.f32.mrf.mxu2  ;;  %v1777_v20 = vadd.f32 %v1776_v8, %v6721_v43  ;;  %v4449_v43 = vor.u32 %v5196_v60, %v4446_v58  ;;  %v5211_v60 = vld [vmem:[%s7562_s1 + $0x4e4] sm:$0xf0] }
 0x496   :  { %2099 = vmatmul.bf16.gmra.mxu1 %v5559_v34 }
 0x497   :  { %v1789_v61 = vpop.f32.mrf.mxu0 }
 0x498   :  { %v1790_v21 = vadd.f32 %v1789_v61, %v1756_v0  ;;  %v1780_v61 = vadd.f32 %v1779_v33, %v1746_v55  ;;  %v1770_v33 = vadd.f32 %v6727_v45, %v6708_v51  ;;  %v6802_v8 = vpop.f32.mrf.mxu2  ;;  %v5192_v51 = vld [vmem:[%s7562_s1 + $0x454] sm:$0xf]  ;;  %v4430_v45 = vld [vmem:[%s7562_s1 + $0x458] sm:$0xf0] }
 0x499   :  { %v4433_v40 = vor.u32 %v5192_v51, %v4430_v45  ;;  %v5207_v51 = vld [vmem:[%s7562_s1 + $0x4c4] sm:$0xf0] }
 0x49a   :  { %4326 = vmatpush.msk.msrb.mxu3 %vm389_vm1, %v1790_v21 }
 0x49c   :  { %1846 = vmatpush.msrb.mxu3 %v1787_v6 }
 0x49e   :  { %1847 = vmatpush.msrb.mxu3 %v1785_v25 }
 0x49f   :  { %v1791_v0 = vpop.f32.mrf.mxu0 }
 0x4a0   :  { %1848 = vmatpush.msrb.mxu3 %v1782_v53  ;;  %v6820_v21 = vpop.f32.mrf.mxu2 }
 0x4a2   :  { %1849 = vmatpush.msrb.mxu3 %v1780_v61  ;;  %v4553_v61 = vld [vmem:[%s7562_s1 + $0x4f0] sm:$0xf] }
 0x4a4   :  { %1850 = vmatpush.msrb.mxu3 %v1777_v20 }
 0x4a6   :  { %1851 = vmatpush.msrb.mxu3 %v1775_v12  ;;  %2104 = vmatmul.bf16.gmra.mxu1 %v5632_v1  ;;  %v4545_v12 = vld [vmem:[%s7562_s1 + $0x4e0] sm:$0xf] }
 0x4a7   :  { %v6797_v55 = vpop.f32.mrf.mxu0  ;;  %v4546_v58 = vor.u32 %v5211_v60, %v4545_v12 }
 0x4a8   :  { %1852 = vmatpush.msrb.mxu3 %v6730_v35  ;;  %v2072_v36 = vpop.f32.mrf.mxu2 }
 0x4aa   :  { %1853 = vmatpush.msrb.mxu3 %v1770_v33 }
 0x4ab   :  { %4327 = vmatmul.msk.f32.vlgmr.msrb.gmra.mxu3 %vm379_vm2, %v6677_v37  ;;  %v5190_v37 = vld [vmem:[%s7562_s1 + $0x444] sm:$0xf] }
 0x4ac   :  { %2118 = vmatpush.bf16.msra.mxu3 %v4449_v43  ;;  %v4537_v43 = vld [vmem:[%s7562_s1 + $0x4d0] sm:$0xf] }
 0x4ad   :  { %v4538_v10 = vor.u32 %v5209_v62, %v4537_v43  ;;  %v4505_v62 = vld [vmem:[%s7562_s1 + $0x490] sm:$0xf] }
 0x4af   :  { %v2026_v35 = vpop.f32.mrf.mxu0 }
 0x4b0   :  { %v6818_v28 = vadd.f32 %v2059_v63, %v2026_v35  ;;  %2119 = vmatpush.bf16.msra.mxu3 %v4441_v54  ;;  %v4425_v63 = vor.u32 %v5190_v37, %v4422_v49  ;;  %v2074_v25 = vpop.f32.mrf.mxu2  ;;  %v4529_v54 = vld [vmem:[%s7562_s1 + $0x4c0] sm:$0xf]  ;;  %v5205_v37 = vld [vmem:[%s7562_s1 + $0x4b4] sm:$0xf0] }
 0x4b1   :  { %v4530_v45 = vor.u32 %v5207_v51, %v4529_v54 }
 0x4b3   :  { %4328 = vmatmul.msk.f32.gmra.mxu3 %vm379_vm2, %v6688_v15 }
 0x4b4   :  { %2120 = vmatpush.bf16.msra.mxu3 %v4433_v40  ;;  %v4521_v40 = vld [vmem:[%s7562_s1 + $0x4b0] sm:$0xf] }
 0x4b5   :  { %v4522_v49 = vor.u32 %v5205_v37, %v4521_v40  ;;  %v4569_v40 = vld [vmem:[%s7562_s1 + $0x510] sm:$0xf]  ;;  %v5217_v37 = vld [vmem:[%s7562_s1 + $0x514] sm:$0xf0] }
 0x4b6   :  { %2109 = vmatmul.bf16.gmra.mxu1 %v5648_v9 }
 0x4b7   :  { %v6831_v6 = vpop.f32.mrf.mxu0 }
 0x4b8   :  { %2121 = vmatpush.bf16.msra.mxu3 %v4425_v63  ;;  %v2077_v53 = vpop.f32.mrf.mxu2  ;;  %v4513_v63 = vld [vmem:[%s7562_s1 + $0x4a0] sm:$0xf] }
 0x4bb   :  { %4329 = vmatmul.msk.f32.gmra.mxu3 %vm379_vm2, %v6699_v38  ;;  %v5213_v38 = vld [vmem:[%s7562_s1 + $0x4f4] sm:$0xf0] }
 0x4bc   :  { %v4554_v20 = vor.u32 %v5213_v38, %v4553_v61  ;;  %v4585_v61 = vld [vmem:[%s7562_s1 + $0x530] sm:$0xf] }
 0x4be   :  { %2369 = vmatpush.bf16.msrb.mxu3 %v4554_v20  ;;  %v5221_v20 = vld [vmem:[%s7562_s1 + $0x534] sm:$0xf0] }
 0x4bf   :  { %v6835_v29 = vpop.f32.mrf.mxu0  ;;  %v4586_v12 = vor.u32 %v5221_v20, %v4585_v61  ;;  %v2063_v61 = vadd.f32 %v6777_v17, %v6831_v6  ;;  %v6933_v17 = vld [vmem:[%s7564_s2 + $0x78] sm:$0xff] }
 0x4c0   :  { %v2079_v0 = vpop.f32.mrf.mxu2 }
 0x4c1   :  { %v5203_v0 = vld [vmem:[%s7562_s1 + $0x4a4] sm:$0xf0]  ;;  %2406 = vmatpush.bf16.msrb.mxu1 %v4586_v12 }
 0x4c2   :  { %2370 = vmatpush.bf16.msrb.mxu3 %v4546_v58  ;;  %v4514_v38 = vor.u32 %v5203_v0, %v4513_v63  ;;  %v2065_v0 = vadd.f32 %v6786_v44, %v6835_v29  ;;  %v2058_v29 = vadd.f32 %v6745_v26, %v6797_v55  ;;  %v6942_v26 = vld [vmem:[%s7564_s2 + $0x80] sm:$0xff]  ;;  %v6944_v55 = vpop.f32.mrf.mxu1 }
 0x4c3   :  { %4455 = vmatmul.msk.bf16.vlgmr.msra.gmra.mxu3 %vm228_vm0, %v5461_v59 }
 0x4c6   :  { %2371 = vmatpush.bf16.msrb.mxu3 %v4538_v10  ;;  %v5201_v10 = vld [vmem:[%s7562_s1 + $0x494] sm:$0xf0] }
 0x4c7   :  { %v2034_v32 = vpop.f32.mrf.mxu0  ;;  %v4506_v51 = vor.u32 %v5201_v10, %v4505_v62 }
 0x4c8   :  { %v2068_v63 = vadd.f32 %v6802_v8, %v2034_v32  ;;  %v4561_v8 = vld [vmem:[%s7562_s1 + $0x500] sm:$0xf]  ;;  %v5215_v32 = vld [vmem:[%s7562_s1 + $0x504] sm:$0xf0] }
 0x4c9   :  { %v4562_v44 = vor.u32 %v5215_v32, %v4561_v8  ;;  %v5210_v8 = vld [vmem:[%s7562_s1 + $0x4e4] sm:$0xf]  ;;  %v4547_v32 = vld [vmem:[%s7562_s1 + $0x4e8] sm:$0xf0] }
 0x4ca   :  { %2372 = vmatpush.bf16.msrb.mxu3 %v4530_v45  ;;  %v4577_v45 = vld [vmem:[%s7562_s1 + $0x520] sm:$0xf]  ;;  %v6959_v6 = vpop.f32.mrf.mxu1 }
 0x4ce   :  { %2373 = vmatpush.bf16.msrb.mxu3 %v4522_v49 }
 0x4cf   :  { %v2036_v15 = vpop.f32.mrf.mxu0 }
 0x4d2   :  { %2374 = vmatpush.bf16.msrb.mxu3 %v4514_v38  ;;  %v6962_v38 = vpop.f32.mrf.mxu1 }
 0x4d3   :  { %4456 = vmatmul.msk.bf16.gmra.mxu3 %vm228_vm0, %v5506_v16 }
 0x4d6   :  { %2375 = vmatpush.bf16.msrb.mxu3 %v4506_v51 }
 0x4d7   :  { %v2039_v33 = vpop.f32.mrf.mxu0 }
 0x4d8   :  { %v2073_v54 = vadd.f32 %v2072_v36, %v2039_v33  ;;  %v5199_v33 = vld [vmem:[%s7562_s1 + $0x484] sm:$0xf0] }
 0x4df   :  { %v2041_v35 = vpop.f32.mrf.mxu0 }
 0x4e0   :  { %v2075_v58 = vadd.f32 %v2074_v25, %v2041_v35  ;;  %v5219_v25 = vld [vmem:[%s7562_s1 + $0x524] sm:$0xf0]  ;;  %v2070_v35 = vadd.f32 %v6820_v21, %v2036_v15  ;;  %v4570_v21 = vor.u32 %v5217_v37, %v4569_v40 }
 0x4e1   :  { %v4578_v36 = vor.u32 %v5219_v25, %v4577_v45 }
 0x4e3   :  { %4457 = vmatmul.msk.bf16.gmra.mxu3 %vm228_vm0, %v5528_v22  ;;  %2407 = vmatpush.bf16.msrb.mxu1 %v4578_v36 }
 0x4e7   :  { %v2044_v60 = vpop.f32.mrf.mxu0  ;;  %2408 = vmatpush.bf16.msrb.mxu1 %v4570_v21 }
 0x4e8   :  { %v2078_v43 = vadd.f32 %v2077_v53, %v2044_v60  ;;  %v4497_v53 = vld [vmem:[%s7562_s1 + $0x480] sm:$0xf] }
 0x4e9   :  { %v4498_v49 = vor.u32 %v5199_v33, %v4497_v53 }
 0x4ea   :  { %4463 = vmatpush.msk.msra.mxu0 %vm389_vm1, %v2078_v43 }
 0x4eb   :  { %2376 = vmatpush.bf16.msrb.mxu3 %v4498_v49  ;;  %2409 = vmatpush.bf16.msrb.mxu1 %v4562_v44  ;;  %v4550_v44 = vor.u32 %v5210_v8, %v4547_v32 }
 0x4ec   :  { %2174 = vmatpush.msra.mxu0 %v2075_v58 }
 0x4ee   :  { %2175 = vmatpush.msra.mxu0 %v2073_v54  ;;  %4591 = vmatmul.msk.bf16.vlgmr.msrb.gmra.mxu1 %vm228_vm0, %v5461_v59 }
 0x4ef   :  { %v2046_v15 = vpop.f32.mrf.mxu0 }
 0x4f0   :  { %2176 = vmatpush.msra.mxu0 %v2070_v35 }
 0x4f2   :  { %2177 = vmatpush.msra.mxu0 %v2068_v63 }
 0x4f3   :  { %4458 = vmatmul.msk.bf16.gmra.mxu3 %vm228_vm0, %v5574_v39  ;;  %v6966_v20 = vpop.f32.mrf.mxu1 }
 0x4f4   :  { %2178 = vmatpush.msra.mxu0 %v2065_v0  ;;  %v4555_v0 = vld [vmem:[%s7562_s1 + $0x4f8] sm:$0xf0] }
 0x4f6   :  { %2179 = vmatpush.msra.mxu0 %v2063_v61 }
 0x4f8   :  { %2180 = vmatpush.msra.mxu0 %v6818_v28  ;;  %v6953_v28 = vld [vmem:[%s7564_s2 + $0x88] sm:$0xf] }
 0x4fa   :  { %2181 = vmatpush.msra.mxu0 %v2058_v29 }
 0x4fb   :  { %4464 = vmatmul.msk.f32.vlgmr.msra.gmra.mxu0 %vm379_vm2, %v6933_v17  ;;  %v2092_v12 = vpop.f32.mrf.mxu1 }
 0x4fe   :  { %4592 = vmatmul.msk.bf16.gmra.mxu1 %vm228_vm0, %v5506_v16 }
 0x503   :  { %4459 = vmatmul.msk.bf16.gmra.mxu3 %vm228_vm0, %v5635_v4  ;;  %4465 = vmatmul.msk.f32.gmra.mxu0 %vm379_vm2, %v6942_v26  ;;  %v6973_v58 = vpop.f32.mrf.mxu1 }
 0x50b   :  { %4466 = vmatmul.msk.f32.gmra.mxu0 %vm379_vm2, %v6953_v28  ;;  %v6978_v62 = vpop.f32.mrf.mxu1 }
 0x50e   :  { %4593 = vmatmul.msk.bf16.gmra.mxu1 %vm228_vm0, %v5528_v22 }
 0x513   :  { %2377 = vmatmul.bf16.vlgmr.msrb.gmra.mxu3 %v5497_v13  ;;  %v6982_v54 = vpop.f32.mrf.mxu1 }
 0x51b   :  { %v2102_v25 = vpop.f32.mrf.mxu1 }
 0x51e   :  { %4594 = vmatmul.msk.bf16.gmra.mxu1 %vm228_vm0, %v5574_v39 }
 0x523   :  { %2382 = vmatmul.bf16.gmra.mxu3 %v5519_v19  ;;  %v2105_v35 = vpop.f32.mrf.mxu1 }
 0x52b   :  { %v2107_v40 = vpop.f32.mrf.mxu1 }
 0x52e   :  { %v6971_v60 = vpop.f32.mrf.mxu3  ;;  %4595 = vmatmul.msk.bf16.gmra.mxu1 %vm228_vm0, %v5635_v4 }
 0x52f   :  { %7573 = vst [vmem:[#allocation5_spill] sm:$0xff] %v6971_v60  ;;  %v5200_v60 = vld [vmem:[%s7562_s1 + $0x494] sm:$0xf] }
 0x533   :  { %2387 = vmatmul.bf16.gmra.mxu3 %v5559_v34  ;;  %v2110_v49 = vpop.f32.mrf.mxu1 }
 0x536   :  { %v6976_v43 = vpop.f32.mrf.mxu3 }
 0x53b   :  { %v2112_v21 = vpop.f32.mrf.mxu1 }
 0x53e   :  { %v1861_v10 = vpop.f32.mrf.mxu3 }
 0x53f   :  { %v6985_v51 = vadd.f32 %v1861_v10, %v6725_v57  ;;  %v5212_v57 = vld [vmem:[%s7562_s1 + $0x4f4] sm:$0xf] }
 0x540   :  { %v4558_v61 = vor.u32 %v5212_v57, %v4555_v0  ;;  %v5208_v10 = vld [vmem:[%s7562_s1 + $0x4d4] sm:$0xf]  ;;  %v5206_v57 = vld [vmem:[%s7562_s1 + $0x4c4] sm:$0xf]  ;;  %v4531_v0 = vld [vmem:[%s7562_s1 + $0x4c8] sm:$0xf0] }
 0x541   :  { %7574 = vst [vmem:[#allocation6_spill] sm:$0xff] %v6985_v51 }
 0x542   :  { %2435 = vmatpush.bf16.msrb.mxu0 %v4558_v61  ;;  %v4534_v61 = vor.u32 %v5206_v57, %v4531_v0  ;;  %v4515_v57 = vld [vmem:[%s7562_s1 + $0x4a8] sm:$0xf0] }
 0x543   :  { %2392 = vmatmul.bf16.gmra.mxu3 %v5632_v1 }
 0x546   :  { %v6988_v45 = vpop.f32.mrf.mxu3  ;;  %2436 = vmatpush.bf16.msrb.mxu0 %v4550_v44  ;;  %v5204_v44 = vld [vmem:[%s7562_s1 + $0x4b4] sm:$0xf] }
 0x54e   :  { %v2125_v53 = vpop.f32.mrf.mxu3 }
 0x54f   :  { %v6990_v36 = vadd.f32 %v2125_v53, %v2092_v12  ;;  %v4539_v53 = vld [vmem:[%s7562_s1 + $0x4d8] sm:$0xf0] }
 0x550   :  { %v4542_v21 = vor.u32 %v5208_v10, %v4539_v53  ;;  %v4523_v10 = vld [vmem:[%s7562_s1 + $0x4b8] sm:$0xf0] }
 0x551   :  { %v4526_v53 = vor.u32 %v5204_v44, %v4523_v10  ;;  %v4507_v44 = vld [vmem:[%s7562_s1 + $0x498] sm:$0xf0] }
 0x552   :  { %2437 = vmatpush.bf16.msrb.mxu0 %v4542_v21  ;;  %v5202_v21 = vld [vmem:[%s7562_s1 + $0x4a4] sm:$0xf] }
 0x553   :  { %2397 = vmatmul.bf16.gmra.mxu3 %v5648_v9  ;;  %v4518_v0 = vor.u32 %v5202_v21, %v4515_v57  ;;  %v5198_v21 = vld [vmem:[%s7562_s1 + $0x484] sm:$0xf]  ;;  %v4499_v57 = vld [vmem:[%s7562_s1 + $0x488] sm:$0xf0] }
 0x554   :  { %v4502_v47 = vor.u32 %v5198_v21, %v4499_v57 }
 0x556   :  { %v2128_v33 = vpop.f32.mrf.mxu3  ;;  %2438 = vmatpush.bf16.msrb.mxu0 %v4534_v61 }
 0x55a   :  { %2439 = vmatpush.bf16.msrb.mxu0 %v4526_v53  ;;  %v4510_v53 = vor.u32 %v5200_v60, %v4507_v44 }
 0x55e   :  { %v2130_v37 = vpop.f32.mrf.mxu3  ;;  %2440 = vmatpush.bf16.msrb.mxu0 %v4518_v0 }
 0x562   :  { %2441 = vmatpush.bf16.msrb.mxu0 %v4510_v53 }
 0x566   :  { %v2133_v63 = vpop.f32.mrf.mxu3  ;;  %2442 = vmatpush.bf16.msrb.mxu0 %v4502_v47  ;;  %v4587_v47 = vld [vmem:[%s7562_s1 + $0x538] sm:$0xf0] }
 0x569   :  { %2443 = vmatmul.bf16.vlgmr.msrb.gmra.mxu0 %v5497_v13  ;;  %v2124_v13 = vadd.f32 %v6988_v45, %v6966_v20  ;;  %v5216_v20 = vld [vmem:[%s7562_s1 + $0x514] sm:$0xf]  ;;  %v4571_v45 = vld [vmem:[%s7562_s1 + $0x518] sm:$0xf0] }
 0x56b   :  { %v7005_v12 = vpop.f32.mrf.mxu1 }
 0x56e   :  { %v2135_v15 = vpop.f32.mrf.mxu3 }
 0x56f   :  { %v2136_v50 = vadd.f32 %v2135_v15, %v2102_v25 }
 0x573   :  { %v7019_v32 = vpop.f32.mrf.mxu1 }
 0x576   :  { %v2138_v29 = vpop.f32.mrf.mxu3 }
 0x577   :  { %v2139_v0 = vadd.f32 %v2138_v29, %v2105_v35 }
 0x579   :  { %2448 = vmatmul.bf16.gmra.mxu0 %v5519_v19 }
 0x57b   :  { %v7033_v51 = vpop.f32.mrf.mxu1 }
 0x57e   :  { %v2140_v8 = vpop.f32.mrf.mxu3 }
 0x57f   :  { %v2141_v18 = vadd.f32 %v2140_v8, %v2107_v40  ;;  %v2134_v40 = vadd.f32 %v2133_v63, %v6982_v54  ;;  %v2131_v8 = vadd.f32 %v2130_v37, %v6978_v62  ;;  %v4579_v62 = vld [vmem:[%s7562_s1 + $0x528] sm:$0xf0]  ;;  %v4574_v37 = vor.u32 %v5216_v20, %v4571_v45  ;;  %v5214_v63 = vld [vmem:[%s7562_s1 + $0x504] sm:$0xf] }
 0x583   :  { %v2418_v60 = vpop.f32.mrf.mxu1 }
 0x586   :  { %v2143_v61 = vpop.f32.mrf.mxu3 }
 0x587   :  { %v2144_v10 = vadd.f32 %v2143_v61, %v2110_v49  ;;  %v2129_v61 = vadd.f32 %v2128_v33, %v6973_v58  ;;  %v5218_v58 = vld [vmem:[%s7562_s1 + $0x524] sm:$0xf] }
 0x588   :  { %v4582_v35 = vor.u32 %v5218_v58, %v4579_v62 }
 0x589   :  { %4467 = vmatpush.msk.msra.mxu2 %vm389_vm1, %v2144_v10  ;;  %2453 = vmatmul.bf16.gmra.mxu0 %v5559_v34 }
 0x58b   :  { %2200 = vmatpush.msra.mxu2 %v2141_v18  ;;  %v5220_v18 = vld [vmem:[%s7562_s1 + $0x534] sm:$0xf]  ;;  %v2421_v54 = vpop.f32.mrf.mxu1 }
 0x58d   :  { %2201 = vmatpush.msra.mxu2 %v2139_v0 }
 0x58e   :  { %v2145_v49 = vpop.f32.mrf.mxu3 }
 0x58f   :  { %2202 = vmatpush.msra.mxu2 %v2136_v50  ;;  %v4590_v50 = vor.u32 %v5220_v18, %v4587_v47  ;;  %v7104_v47 = vld [vmem:[%s7564_s2 + $0x90] sm:$0xff] }
 0x591   :  { %2203 = vmatpush.msra.mxu2 %v2134_v40 }
 0x593   :  { %2204 = vmatpush.msra.mxu2 %v2131_v8  ;;  %v2423_v33 = vpop.f32.mrf.mxu1 }
 0x595   :  { %2205 = vmatpush.msra.mxu2 %v2129_v61 }
 0x596   :  { %v2378_v25 = vpop.f32.mrf.mxu3 }
 0x597   :  { %2206 = vmatpush.msra.mxu2 %v6990_v36 }
 0x599   :  { %2207 = vmatpush.msra.mxu2 %v2124_v13  ;;  %2458 = vmatmul.bf16.gmra.mxu0 %v5632_v1 }
 0x59a   :  { %4468 = vmatmul.msk.f32.vlgmr.msra.gmra.mxu2 %vm379_vm2, %v6933_v17  ;;  %v4563_v17 = vld [vmem:[%s7562_s1 + $0x508] sm:$0xf0] }
 0x59b   :  { %2472 = vmatpush.bf16.msrb.mxu2 %v4590_v50  ;;  %v4566_v15 = vor.u32 %v5214_v63, %v4563_v17  ;;  %v2426_v44 = vpop.f32.mrf.mxu1 }
 0x59e   :  { %v2380_v36 = vpop.f32.mrf.mxu3 }
 0x59f   :  { %2473 = vmatpush.bf16.msrb.mxu2 %v4582_v35 }
 0x5a2   :  { %4469 = vmatmul.msk.f32.gmra.mxu2 %vm379_vm2, %v6942_v26 }
 0x5a3   :  { %2474 = vmatpush.bf16.msrb.mxu2 %v4574_v37  ;;  %v2428_v53 = vpop.f32.mrf.mxu1 }
 0x5a6   :  { %v2383_v29 = vpop.f32.mrf.mxu3 }
 0x5a7   :  { %2475 = vmatpush.bf16.msrb.mxu2 %v4566_v15 }
 0x5a9   :  { %2463 = vmatmul.bf16.gmra.mxu0 %v5648_v9  ;;  %v2412_v9 = vadd.f32 %v7005_v12, %v2378_v25  ;;  %v7122_v12 = vld [vmem:[%s7564_s2 + $0xa0] sm:$0xf] }
 0x5aa   :  { %4470 = vmatmul.msk.f32.gmra.mxu2 %vm379_vm2, %v6953_v28 }
 0x5ab   :  { %v2431_v19 = vpop.f32.mrf.mxu1 }
 0x5ae   :  { %v2385_v10 = vpop.f32.mrf.mxu3 }
 0x5af   :  { %v2419_v18 = vadd.f32 %v2418_v60, %v2385_v10  ;;  %v5238_v10 = vld [vmem:[%s7566_s4 + $0x80] sm:$0xff] }
 0x5b2   :  { %4596 = vmatmul.msk.bf16.vlgmr.msrb.gmra.mxu2 %vm228_vm0, %v5461_v59 }
 0x5b3   :  { %v2433_v0 = vpop.f32.mrf.mxu1 }
 0x5b4   :  { %v5226_v0 = vld [vmem:[%s7566_s4 + $0x20] sm:$0xff] }
 0x5b6   :  { %v2388_v21 = vpop.f32.mrf.mxu3 }
 0x5b7   :  { %v2422_v61 = vadd.f32 %v2421_v54, %v2388_v21  ;;  %v5237_v21 = vld [vmem:[%s7566_s4 + $0x78] sm:$0xff] }
 0x5be   :  { %v2390_v57 = vpop.f32.mrf.mxu3 }
 0x5bf   :  { %v2424_v8 = vadd.f32 %v2423_v33, %v2390_v57 }
 0x5c2   :  { %4597 = vmatmul.msk.bf16.gmra.mxu2 %vm228_vm0, %v5506_v16  ;;  %v2417_v16 = vadd.f32 %v7033_v51, %v2383_v29  ;;  %v7113_v51 = vpop.f32.mrf.mxu0 }
 0x5c6   :  { %v2393_v26 = vpop.f32.mrf.mxu3 }
 0x5c7   :  { %v2427_v59 = vadd.f32 %v2426_v44, %v2393_v26  ;;  %v5228_v44 = vld [vmem:[%s7566_s4 + $0x30] sm:$0xff] }
 0x5c8   :  { %v5236_v26 = vld [vmem:[%s7566_s4 + $0x70] sm:$0xff] }
 0x5ce   :  { %v2395_v49 = vpop.f32.mrf.mxu3 }
 0x5cf   :  { %v2429_v28 = vadd.f32 %v2428_v53, %v2395_v49  ;;  %v5227_v53 = vld [vmem:[%s7566_s4 + $0x28] sm:$0xff]  ;;  %v5225_v49 = vld [vmem:[%s7566_s4 + $0x18] sm:$0xff] }
 0x5d2   :  { %4598 = vmatmul.msk.bf16.gmra.mxu2 %vm228_vm0, %v5528_v22  ;;  %v2414_v22 = vadd.f32 %v7019_v32, %v2380_v36  ;;  %v7126_v32 = vpop.f32.mrf.mxu0 }
 0x5d6   :  { %v2398_v34 = vpop.f32.mrf.mxu3 }
 0x5d7   :  { %v2432_v40 = vadd.f32 %v2431_v19, %v2398_v34  ;;  %v5235_v34 = vld [vmem:[%s7566_s4 + $0x68] sm:$0xff] }
 0x5d9   :  { %4604 = vmatpush.msk.msra.mxu3 %vm389_vm1, %v2432_v40 }
 0x5da   :  { %v7128_v60 = vpop.f32.mrf.mxu0 }
 0x5db   :  { %2528 = vmatpush.msra.mxu3 %v2429_v28 }
 0x5dd   :  { %2529 = vmatpush.msra.mxu3 %v2427_v59  ;;  %v5224_v59 = vld [vmem:[%s7566_s4 + $0x10] sm:$0xff] }
 0x5de   :  { %v2400_v1 = vpop.f32.mrf.mxu3 }
 0x5df   :  { %2530 = vmatpush.msra.mxu3 %v2424_v8  ;;  %v5234_v8 = vld [vmem:[%s7566_s4 + $0x60] sm:$0xff]  ;;  %v5233_v1 = vld [vmem:[%s7566_s4 + $0x58] sm:$0xff] }
 0x5e1   :  { %2531 = vmatpush.msra.mxu3 %v2422_v61  ;;  %v5223_v61 = vld [vmem:[%s7566_s4 + $0x8] sm:$0xff] }
 0x5e2   :  { %4599 = vmatmul.msk.bf16.gmra.mxu2 %vm228_vm0, %v5574_v39  ;;  %v7111_v39 = vld [vmem:[%s7564_s2 + $0x98] sm:$0xff] }
 0x5e3   :  { %2532 = vmatpush.msra.mxu3 %v2419_v18 }
 0x5e5   :  { %2533 = vmatpush.msra.mxu3 %v2417_v16 }
 0x5e6   :  { %v2444_v25 = vpop.f32.mrf.mxu0 }
 0x5e7   :  { %2534 = vmatpush.msra.mxu3 %v2414_v22  ;;  %v5222_v22 = vld [vmem:[%s7566_s4] sm:$0xff] }
 0x5e9   :  { %2535 = vmatpush.msra.mxu3 %v2412_v9  ;;  %v5232_v9 = vld [vmem:[%s7566_s4 + $0x50] sm:$0xff] }
 0x5ea   :  { %4605 = vmatmul.msk.f32.vlgmr.msra.gmra.mxu3 %vm379_vm2, %v7104_v47 }
 0x5ee   :  { %v7130_v54 = vpop.f32.mrf.mxu0 }
 0x5f2   :  { %4600 = vmatmul.msk.bf16.gmra.mxu2 %vm228_vm0, %v5635_v4  ;;  %4606 = vmatmul.msk.f32.gmra.mxu3 %vm379_vm2, %v7111_v39  ;;  %v39_v4 = vld [vmem:[%s7565_s3 + $0x18] sm:$0xff] }
 0x5f3   :  { %v451_v13 = vadd.f32 %v5931_v30, %v39_v4 }
 0x5f5   :  { %v805_v62 = vadd.f32 %v6190_v14, %v451_v13  ;;  %v5229_v14 = vld [vmem:[%s7566_s4 + $0x38] sm:$0xff]  ;;  %v5258_v13 = vld [vmem:[%s7566_s4 + $0x120] sm:$0xff] }
 0x5f6   :  { %v7138_v58 = vpop.f32.mrf.mxu0  ;;  %2669 = vmatpush.bf16.msra.mxu2 %v5229_v14 }
 0x5f7   :  { %v1159_v35 = vadd.f32 %v6455_v46, %v805_v62  ;;  %v5239_v46 = vld [vmem:[%s7566_s4 + $0x88] sm:$0xff]  ;;  %v5257_v62 = vld [vmem:[%s7566_s4 + $0x118] sm:$0xff] }
 0x5f8   :  { %2787 = vmatpush.bf16.msrb.mxu3 %v5239_v46  ;;  %v5255_v46 = vld [vmem:[%s7566_s4 + $0x108] sm:$0xff] }
 0x5f9   :  { %v1513_v20 = vadd.f32 %v6719_v5, %v1159_v35 }
 0x5fa   :  { %4607 = vmatmul.msk.f32.gmra.mxu3 %vm379_vm2, %v7122_v12  ;;  %2670 = vmatpush.bf16.msra.mxu2 %v5228_v44 }
 0x5fb   :  { %v1867_v45 = vadd.f32 %v6976_v43, %v1513_v20  ;;  %v5256_v20 = vld [vmem:[%s7566_s4 + $0x110] sm:$0xff] }
 0x5fc   :  { %2788 = vmatpush.bf16.msrb.mxu3 %v5238_v10 }
 0x5fe   :  { %v7144_v33 = vpop.f32.mrf.mxu0  ;;  %2671 = vmatpush.bf16.msra.mxu2 %v5227_v53  ;;  %v5254_v53 = vld [vmem:[%s7566_s4 + $0x100] sm:$0xff] }
 0x600   :  { %2789 = vmatpush.bf16.msrb.mxu3 %v5237_v21 }
 0x602   :  { %2672 = vmatpush.bf16.msra.mxu2 %v5226_v0 }
 0x604   :  { %2790 = vmatpush.bf16.msrb.mxu3 %v5236_v26 }
 0x606   :  { %v7150_v30 = vpop.f32.mrf.mxu0  ;;  %2673 = vmatpush.bf16.msra.mxu2 %v5225_v49 }
 0x608   :  { %2791 = vmatpush.bf16.msrb.mxu3 %v5235_v34 }
 0x60a   :  { %2674 = vmatpush.bf16.msra.mxu2 %v5224_v59 }
 0x60c   :  { %2792 = vmatpush.bf16.msrb.mxu3 %v5234_v8 }
 0x60e   :  { %v7152_v15 = vpop.f32.mrf.mxu0  ;;  %2675 = vmatpush.bf16.msra.mxu2 %v5223_v61 }
 0x610   :  { %2793 = vmatpush.bf16.msrb.mxu3 %v5233_v1 }
 0x612   :  { %2676 = vmatpush.bf16.msra.mxu2 %v5222_v22 }
 0x614   :  { %2794 = vmatpush.bf16.msrb.mxu3 %v5232_v9 }
 0x616   :  { %v7164_v43 = vpop.f32.mrf.mxu0 }
 0x61d   :  { %v7136_v50 = vpop.f32.mrf.mxu2 }
 0x61e   :  { %v7180_v57 = vpop.f32.mrf.mxu0 }
 0x625   :  { %v2212_v36 = vpop.f32.mrf.mxu2 }
 0x626   :  { %v7146_v37 = vadd.f32 %v2212_v36, %v1867_v45  ;;  %v2464_v40 = vpop.f32.mrf.mxu0  ;;  %v36_v45 = vld [vmem:[%s7565_s3] sm:$0xff]  ;;  %v38_v36 = vld [vmem:[%s7565_s3 + $0x10] sm:$0xff] }
 0x627   :  { %v450_v14 = vadd.f32 %v5924_v48, %v38_v36 }
 0x629   :  { %v804_v10 = vadd.f32 %v6173_v56, %v450_v14  ;;  %v7576_v14 = vld [vmem:[#allocation3_spill] sm:$0xff] }
 0x62d   :  { %v7148_v63 = vpop.f32.mrf.mxu2 }
 0x62e   :  { %v2466_v16 = vpop.f32.mrf.mxu0 }
 0x635   :  { %v2477_v17 = vpop.f32.mrf.mxu2 }
 0x636   :  { %v7154_v29 = vadd.f32 %v2477_v17, %v2444_v25  ;;  %v5259_v25 = vld [vmem:[%s7566_s4 + $0x128] sm:$0xff]  ;;  %v448_v17 = vadd.f32 %v5919_v23, %v36_v45  ;;  %v1158_v23 = vadd.f32 %v6430_v42, %v804_v10  ;;  %v40_v42 = vld [vmem:[%s7565_s3 + $0x20] sm:$0xf] }
 0x637   :  { %3105 = vmatpush.bf16.msra.mxu3 %v5259_v25  ;;  %v5243_v10 = vld [vmem:[%s7566_s4 + $0xa8] sm:$0xff] }
 0x638   :  { %v802_v44 = vadd.f32 %v6158_v41, %v448_v17  ;;  %v1512_v49 = vadd.f32 %v6694_v11, %v1158_v23  ;;  %v5253_v41 = vld [vmem:[%s7566_s4 + $0xf8] sm:$0xff]  ;;  %v5244_v17 = vld [vmem:[%s7566_s4 + $0xb0] sm:$0xff] }
 0x63a   :  { %v1156_v26 = vadd.f32 %v6417_v52, %v802_v44  ;;  %v1866_v34 = vadd.f32 %v6959_v6, %v1512_v49  ;;  %v5252_v52 = vld [vmem:[%s7566_s4 + $0xf0] sm:$0xff]  ;;  %v452_v6 = vadd.f32 %v5933_v31, %v40_v42  ;;  %v5242_v49 = vld [vmem:[%s7566_s4 + $0xa0] sm:$0xff] }
 0x63b   :  { %3106 = vmatpush.bf16.msra.mxu3 %v5258_v13  ;;  %v7577_v44 = vld [vmem:[#allocation4_spill] sm:$0xff] }
 0x63c   :  { %v1510_v48 = vadd.f32 %v6681_v2, %v1156_v26  ;;  %v2220_v8 = vadd.f32 %v7126_v32, %v1866_v34  ;;  %v806_v32 = vadd.f32 %v6176_v7, %v452_v6 }
 0x63d   :  { %v7162_v5 = vpop.f32.mrf.mxu2 }
 0x63e   :  { %v1864_v56 = vadd.f32 %v6944_v55, %v1510_v48 }
 0x63f   :  { %3107 = vmatpush.bf16.msra.mxu3 %v5257_v62 }
 0x640   :  { %v2218_v59 = vadd.f32 %v7113_v51, %v1864_v56 }
 0x643   :  { %3108 = vmatpush.bf16.msra.mxu3 %v5256_v20 }
 0x645   :  { %v7178_v19 = vpop.f32.mrf.mxu2 }
 0x647   :  { %3109 = vmatpush.bf16.msra.mxu3 %v5255_v46 }
 0x64b   :  { %3110 = vmatpush.bf16.msra.mxu3 %v5254_v53  ;;  %v7578_v53 = vld [vmem:[#allocation5_spill] sm:$0xff] }
 0x64d   :  { %v7194_v28 = vpop.f32.mrf.mxu2 }
 0x64f   :  { %3111 = vmatpush.bf16.msra.mxu3 %v5253_v41 }
 0x653   :  { %3112 = vmatpush.bf16.msra.mxu3 %v5252_v52  ;;  %v5267_v52 = vld [vmem:[%s7566_s4 + $0x168] sm:$0xff] }
 0x655   :  { %v2487_v18 = vpop.f32.mrf.mxu2 }
 0x656   :  { %v2488_v25 = vadd.f32 %v2487_v18, %v7150_v30  ;;  %v5245_v18 = vld [vmem:[%s7566_s4 + $0xb8] sm:$0xff] }
 0x65d   :  { %v2489_v4 = vpop.f32.mrf.mxu2 }
 0x65e   :  { %v2490_v31 = vadd.f32 %v2489_v4, %v7152_v15  ;;  %v2480_v15 = vadd.f32 %v7162_v5, %v7130_v54  ;;  %v5248_v54 = vld [vmem:[%s7566_s4 + $0xd0] sm:$0xff]  ;;  %v5246_v5 = vld [vmem:[%s7566_s4 + $0xc0] sm:$0xff] }
 0x65f   :  { %v7575_v4 = vld [vmem:[#allocation2_spill] sm:$0xff] }
 0x665   :  { %v2492_v35 = vpop.f32.mrf.mxu2 }
 0x666   :  { %v2493_v22 = vadd.f32 %v2492_v35, %v7164_v43  ;;  %v2485_v43 = vadd.f32 %v7194_v28, %v7144_v33 }
 0x66d   :  { %v2494_v21 = vpop.f32.mrf.mxu2  ;;  %v2537_v0 = vpop.f32.mrf.mxu3 }
 0x66e   :  { %v2572_v61 = vadd.f32 %v2537_v0, %v2218_v59  ;;  %v2495_v51 = vadd.f32 %v2494_v21, %v7180_v57 }
 0x675   :  { %v2497_v2 = vpop.f32.mrf.mxu2  ;;  %v2540_v11 = vpop.f32.mrf.mxu3 }
 0x676   :  { %v2498_v1 = vadd.f32 %v2497_v2, %v2464_v40  ;;  %v2574_v55 = vadd.f32 %v2540_v11, %v2220_v8  ;;  %v1160_v40 = vadd.f32 %v6441_v24, %v806_v32  ;;  %v2483_v24 = vadd.f32 %v7178_v19, %v7138_v58  ;;  %v5247_v58 = vld [vmem:[%s7566_s4 + $0xc8] sm:$0xff]  ;;  %v7579_v2 = vld [vmem:[#allocation6_spill] sm:$0xff] }
 0x677   :  { %v37_v19 = vld [vmem:[%s7565_s3 + $0x8] sm:$0xff]  ;;  %v2223_v11 = vadd.f32 %v7148_v63, %v7579_v2  ;;  %v5265_v63 = vld [vmem:[%s7566_s4 + $0x158] sm:$0xff] }
 0x678   :  { %v7261_v16 = vpack.c.bf16 %v2574_v55, %v2572_v61  ;;  %4608 = vmatpush.msk.msra.mxu1 %vm389_vm1, %v2498_v1  ;;  %v1514_v9 = vadd.f32 %v6705_v3, %v1160_v40  ;;  %v449_v28 = vadd.f32 %v5926_v27, %v37_v19  ;;  %v5266_v1 = vld [vmem:[%s7566_s4 + $0x160] sm:$0xff] }
 0x679   :  { %v5262_v40 = vld [vmem:[%s7566_s4 + $0x140] sm:$0xff] }
 0x67a   :  { %2554 = vmatpush.msra.mxu1 %v2495_v51  ;;  %2677 = vmatmul.bf16.vlgmr.msra.gmra.mxu2 %v7261_v16  ;;  %v1868_v7 = vadd.f32 %v6962_v38, %v1514_v9  ;;  %v5231_v38 = vld [vmem:[%s7566_s4 + $0x48] sm:$0xff]  ;;  %v803_v35 = vadd.f32 %v7575_v4, %v449_v28  ;;  %v5264_v51 = vld [vmem:[%s7566_s4 + $0x150] sm:$0xff] }
 0x67b   :  { %2795 = vmatmul.bf16.vlgmr.msrb.gmra.mxu3 %v7261_v16  ;;  %2693 = vmatpush.bf16.msra.mxu0 %v5231_v38 }
 0x67c   :  { %2555 = vmatpush.msra.mxu1 %v2493_v22  ;;  %v2222_v62 = vadd.f32 %v7128_v60, %v1868_v7  ;;  %v5249_v60 = vld [vmem:[%s7566_s4 + $0xd8] sm:$0xff]  ;;  %v1157_v46 = vadd.f32 %v7576_v14, %v803_v35  ;;  %v5263_v22 = vld [vmem:[%s7566_s4 + $0x148] sm:$0xff] }
 0x67d   :  { %v2499_v57 = vpop.f32.mrf.mxu2  ;;  %v2543_v13 = vpop.f32.mrf.mxu3 }
 0x67e   :  { %2556 = vmatpush.msra.mxu1 %v2490_v31  ;;  %v2576_v3 = vadd.f32 %v2543_v13, %v2222_v62  ;;  %v1511_v27 = vadd.f32 %v7577_v44, %v1157_v46 }
 0x680   :  { %2557 = vmatpush.msra.mxu1 %v2488_v25  ;;  %v7280_v30 = vpack.c.bf16 %v2576_v3, %v2576_v3  ;;  %v1865_v21 = vadd.f32 %v7578_v53, %v1511_v27  ;;  %v4783_v53 = vld [vmem:[%s7567_s5 + $0x8] sm:$0xf] }
 0x682   :  { %2558 = vmatpush.msra.mxu1 %v2485_v43  ;;  %v2219_v0 = vadd.f32 %v7136_v50, %v1865_v21  ;;  %v5269_v50 = vld [vmem:[%s7566_s4 + $0x178] sm:$0xff] }
 0x683   :  { %v5261_v21 = vld [vmem:[%s7566_s4 + $0x138] sm:$0xff] }
 0x684   :  { %2559 = vmatpush.msra.mxu1 %v2483_v24 }
 0x686   :  { %2560 = vmatpush.msra.mxu1 %v2480_v15 }
 0x688   :  { %2561 = vmatpush.msra.mxu1 %v7154_v29 }
 0x689   :  { %4609 = vmatmul.msk.f32.vlgmr.msra.gmra.mxu1 %vm379_vm2, %v7104_v47  ;;  %v5241_v47 = vld [vmem:[%s7566_s4 + $0x98] sm:$0xff] }
 0x68a   :  { %2682 = vmatmul.bf16.gmra.mxu2 %v7280_v30  ;;  %2811 = vmatpush.bf16.msrb.mxu1 %v5241_v47 }
 0x68b   :  { %2800 = vmatmul.bf16.gmra.mxu3 %v7280_v30 }
 0x691   :  { %4610 = vmatmul.msk.f32.gmra.mxu1 %vm379_vm2, %v7111_v39  ;;  %v5230_v39 = vld [vmem:[%s7566_s4 + $0x40] sm:$0xff] }
 0x692   :  { %2694 = vmatpush.bf16.msra.mxu0 %v5230_v39 }
 0x699   :  { %4611 = vmatmul.msk.f32.gmra.mxu1 %vm379_vm2, %v7122_v12  ;;  %v5240_v12 = vld [vmem:[%s7566_s4 + $0x90] sm:$0xff] }
 0x69a   :  { %2812 = vmatpush.bf16.msrb.mxu1 %v5240_v12  ;;  %v4716_v12 = vld [vmem:[%s7567_s5 + $0x4] sm:$0xf] }
 0x69b   :  { %3113 = vmatmul.bf16.vlgmr.msra.gmra.mxu3 %v7261_v16 }
 0x69e   :  { %2959 = vmatpush.bf16.msra.mxu1 %v5249_v60  ;;  %v5251_v60 = vld [vmem:[%s7566_s4 + $0xe8] sm:$0xff] }
 0x6a2   :  { %2960 = vmatpush.bf16.msra.mxu1 %v5248_v54  ;;  %v2705_v54 = vld [vmem:[%s7567_s5] sm:$0xf] }
 0x6a6   :  { %2961 = vmatpush.bf16.msra.mxu1 %v5247_v58 }
 0x6aa   :  { %2962 = vmatpush.bf16.msra.mxu1 %v5246_v5 }
 0x6ab   :  { %3118 = vmatmul.bf16.gmra.mxu3 %v7280_v30 }
 0x6ae   :  { %2963 = vmatpush.bf16.msra.mxu1 %v5245_v18 }
 0x6b2   :  { %2964 = vmatpush.bf16.msra.mxu1 %v5244_v17 }
 0x6b6   :  { %2965 = vmatpush.bf16.msra.mxu1 %v5243_v10 }
 0x6ba   :  { %2966 = vmatpush.bf16.msra.mxu1 %v5242_v49  ;;  %v5277_v49 = vld [vmem:[%s7566_s4 + $0x1b8] sm:$0xff] }
 0x6fd   :  { %v7314_v33 = vpop.f32.mrf.mxu2 }
 0x6fe   :  { %v7316_v29 = vpop.f32.mrf.mxu3 }
 0x705   :  { %v7329_v20 = vpop.f32.mrf.mxu2 }
 0x706   :  { %v7331_v45 = vpop.f32.mrf.mxu3  ;;  %v2563_v36 = vpop.f32.mrf.mxu1 }
 0x707   :  { %v2573_v41 = vadd.f32 %v2563_v36, %v2219_v0 }
 0x70d   :  { %v2683_v26 = vpop.f32.mrf.mxu2 }
 0x70e   :  { %v2801_v23 = vpop.f32.mrf.mxu3  ;;  %v2566_v48 = vpop.f32.mrf.mxu1 }
 0x70f   :  { %v2575_v56 = vadd.f32 %v2566_v48, %v7146_v37  ;;  %v5268_v37 = vld [vmem:[%s7566_s4 + $0x170] sm:$0xff]  ;;  %v5278_v48 = vld [vmem:[%s7566_s4 + $0x1c0] sm:$0xff] }
 0x711   :  { %v7347_v34 = vpack.c.bf16 %v2575_v56, %v2573_v41  ;;  %v5276_v41 = vld [vmem:[%s7566_s4 + $0x1b0] sm:$0xff]  ;;  %v5275_v56 = vld [vmem:[%s7566_s4 + $0x1a8] sm:$0xff] }
 0x713   :  { %4652 = vmatmul.msk.bf16.vlgmr.msra.gmra.mxu0 %vm2662_vm3, %v7347_v34  ;;  %4714 = vmatmul.msk.bf16.vlgmr.msrb.gmra.mxu1 %vm2662_vm3, %v7347_v34 }
 0x714   :  { %3251 = vmatpush.bf16.msrb.mxu1 %v5269_v50  ;;  %v5274_v50 = vld [vmem:[%s7566_s4 + $0x1a0] sm:$0xff] }
 0x715   :  { %v2685_v59 = vpop.f32.mrf.mxu2 }
 0x716   :  { %v2803_v8 = vpop.f32.mrf.mxu3  ;;  %v2569_v42 = vpop.f32.mrf.mxu1  ;;  %v5273_v59 = vld [vmem:[%s7566_s4 + $0x198] sm:$0xff] }
 0x717   :  { %v2577_v61 = vadd.f32 %v2569_v42, %v2223_v11  ;;  %v5272_v8 = vld [vmem:[%s7566_s4 + $0x190] sm:$0xff] }
 0x718   :  { %3252 = vmatpush.bf16.msrb.mxu1 %v5268_v37  ;;  %v7467_v37 = vld [vmem:[%s7566_s4 + $0x228] sm:$0xff] }
 0x719   :  { %v7369_v6 = vpack.c.bf16 %v2577_v61, %v2577_v61 }
 0x71c   :  { %3253 = vmatpush.bf16.msrb.mxu1 %v5267_v52  ;;  %v7473_v52 = vld [vmem:[%s7566_s4 + $0x220] sm:$0xff] }
 0x71e   :  { %v7367_v55 = vpop.f32.mrf.mxu3 }
 0x720   :  { %3254 = vmatpush.bf16.msrb.mxu1 %v5266_v1 }
 0x723   :  { %4653 = vmatmul.msk.bf16.gmra.mxu0 %vm2662_vm3, %v7369_v6  ;;  %4715 = vmatmul.msk.bf16.gmra.mxu1 %vm2662_vm3, %v7369_v6 }
 0x724   :  { %3255 = vmatpush.bf16.msrb.mxu1 %v5265_v63 }
 0x726   :  { %v7381_v32 = vpop.f32.mrf.mxu3 }
 0x728   :  { %3256 = vmatpush.bf16.msrb.mxu1 %v5264_v51 }
 0x72c   :  { %3257 = vmatpush.bf16.msrb.mxu1 %v5263_v22 }
 0x72e   :  { %v7389_v31 = vpop.f32.mrf.mxu3 }
 0x730   :  { %3258 = vmatpush.bf16.msrb.mxu1 %v5262_v40 }
 0x733   :  { %2967 = vmatmul.bf16.vlgmr.msra.gmra.mxu1 %v7261_v16 }
 0x736   :  { %v3121_v57 = vpop.f32.mrf.mxu3 }
 0x743   :  { %2972 = vmatmul.bf16.gmra.mxu1 %v7280_v30 }
 0x753   :  { %3259 = vmatmul.bf16.vlgmr.msrb.gmra.mxu1 %v7261_v16 }
 0x763   :  { %3264 = vmatmul.bf16.gmra.mxu1 %v7280_v30 }
 0x790   :  { %v2696_v9 = vpop.f32.mrf.mxu0  ;;  %v2814_v25 = vpop.f32.mrf.mxu1 }
 0x791   :  { %v2697_v47 = vadd.f32 %v2696_v9, %v7314_v33  ;;  %v2815_v39 = vadd.f32 %v2814_v25, %v7316_v29  ;;  %v5250_v29 = vld [vmem:[%s7566_s4 + $0xe0] sm:$0xff]  ;;  %v4848_v9 = vld [vmem:[%s7567_s5 + $0xc] sm:$0xf] }
 0x792   :  { %v5271_v25 = vld [vmem:[%s7566_s4 + $0x188] sm:$0xff] }
 0x798   :  { %v2698_v7 = vpop.f32.mrf.mxu0  ;;  %v2816_v43 = vpop.f32.mrf.mxu1 }
 0x799   :  { %v2699_v3 = vadd.f32 %v2698_v7, %v7329_v20  ;;  %v2817_v38 = vadd.f32 %v2816_v43, %v7331_v45 }
 0x7a0   :  { %v2701_v13 = vpop.f32.mrf.mxu0  ;;  %v2819_v62 = vpop.f32.mrf.mxu1 }
 0x7a1   :  { %v2702_v24 = vadd.f32 %v2701_v13, %v2683_v26  ;;  %v2820_v15 = vadd.f32 %v2819_v62, %v2801_v23  ;;  %v5260_v26 = vld [vmem:[%s7566_s4 + $0x130] sm:$0xff]  ;;  %v5279_v23 = vld [vmem:[%s7566_s4 + $0x1c8] sm:$0xff]  ;;  %v5286_v62 = vld [vmem:[%s7566_s4 + $0x200] sm:$0xff] }
 0x7a2   :  { %v5287_v13 = vld [vmem:[%s7566_s4 + $0x208] sm:$0xff] }
 0x7a3   :  { %4717 = vmatpush.msk.msrb.mxu2 %vm389_vm1, %v2820_v15  ;;  %4719 = vmatpush.msk.msrb.mxu0 %vm389_vm1, %v2702_v24  ;;  %v5285_v15 = vld [vmem:[%s7566_s4 + $0x1f8] sm:$0xff] }
 0x7a5   :  { %2846 = vmatpush.msrb.mxu2 %v2817_v38  ;;  %2872 = vmatpush.msrb.mxu0 %v2699_v3  ;;  %v5284_v3 = vld [vmem:[%s7566_s4 + $0x1f0] sm:$0xff] }
 0x7a7   :  { %2847 = vmatpush.msrb.mxu2 %v2815_v39  ;;  %2873 = vmatpush.msrb.mxu0 %v2697_v47  ;;  %v5283_v47 = vld [vmem:[%s7566_s4 + $0x1e8] sm:$0xff]  ;;  %v5282_v39 = vld [vmem:[%s7566_s4 + $0x1e0] sm:$0xff] }
 0x7a8   :  { %v2703_v58 = vpop.f32.mrf.mxu0  ;;  %v2821_v33 = vpop.f32.mrf.mxu1  ;;  %4718 = vmatmul.msk.f32.vlgmr.msrb.gmra.mxu2 %vm2825_vm4, %v4716_v12  ;;  %4720 = vmatmul.msk.f32.vlgmr.msrb.gmra.mxu0 %vm2825_vm4, %v2705_v54 }
 0x7a9   :  { %2983 = vmatpush.bf16.msra.mxu2 %v5251_v60 }
 0x7ad   :  { %2984 = vmatpush.bf16.msra.mxu2 %v5250_v29 }
 0x7b0   :  { %v2968_v5 = vpop.f32.mrf.mxu1  ;;  %4781 = vmatmul.msk.bf16.vlgmr.msra.gmra.mxu2 %vm2662_vm3, %v7347_v34 }
 0x7b8   :  { %v2970_v19 = vpop.f32.mrf.mxu1 }
 0x7c0   :  { %v2973_v28 = vpop.f32.mrf.mxu1  ;;  %4782 = vmatmul.msk.bf16.gmra.mxu2 %vm2662_vm3, %v7369_v6 }
 0x7c8   :  { %v2975_v18 = vpop.f32.mrf.mxu1 }
 0x7d0   :  { %v7419_v4 = vpop.f32.mrf.mxu1 }
 0x7d8   :  { %v7421_v35 = vpop.f32.mrf.mxu1 }
 0x7e0   :  { %v7423_v20 = vpop.f32.mrf.mxu1 }
 0x7e8   :  { %v3267_v45 = vpop.f32.mrf.mxu1 }
 0x825   :  { %v2875_v42 = vpop.f32.mrf.mxu0 }
 0x82b   :  { %v2849_v36 = vpop.f32.mrf.mxu2 }
 0x82c   :  { %v2876_v2 = vadd.f32 %v2875_v42, %v2849_v36 }
 0x833   :  { %v2986_v17 = vpop.f32.mrf.mxu2 }
 0x834   :  { %v2987_v10 = vadd.f32 %v2986_v17, %v2968_v5 }
 0x83b   :  { %v2988_v14 = vpop.f32.mrf.mxu2 }
 0x83c   :  { %v2989_v27 = vadd.f32 %v2988_v14, %v2970_v19 }
 0x843   :  { %v2991_v46 = vpop.f32.mrf.mxu2 }
 0x844   :  { %v2992_v44 = vadd.f32 %v2991_v46, %v2973_v28 }
 0x846   :  { %4784 = vmatpush.msk.msra.mxu0 %vm389_vm1, %v2992_v44 }
 0x848   :  { %3017 = vmatpush.msra.mxu0 %v2989_v27 }
 0x84a   :  { %3018 = vmatpush.msra.mxu0 %v2987_v10 }
 0x84b   :  { %v2993_v0 = vpop.f32.mrf.mxu2  ;;  %4785 = vmatmul.msk.f32.vlgmr.msra.gmra.mxu0 %vm2825_vm4, %v4783_v53 }
 0x84c   :  { %3129 = vmatpush.bf16.msrb.mxu0 %v5261_v21  ;;  %v4978_v21 = vld [vmem:[%s7567_s5 + $0x14] sm:$0xf] }
 0x850   :  { %3130 = vmatpush.bf16.msrb.mxu0 %v5260_v26 }
 0x853   :  { %4846 = vmatmul.msk.bf16.vlgmr.msrb.gmra.mxu0 %vm2662_vm3, %v7347_v34 }
 0x854   :  { %3397 = vmatpush.bf16.msra.mxu0 %v5279_v23 }
 0x858   :  { %3398 = vmatpush.bf16.msra.mxu0 %v5278_v48 }
 0x85c   :  { %3399 = vmatpush.bf16.msra.mxu0 %v5277_v49 }
 0x860   :  { %3400 = vmatpush.bf16.msra.mxu0 %v5276_v41 }
 0x863   :  { %4847 = vmatmul.msk.bf16.gmra.mxu0 %vm2662_vm3, %v7369_v6 }
 0x864   :  { %3401 = vmatpush.bf16.msra.mxu0 %v5275_v56  ;;  %v5043_v56 = vld [vmem:[%s7567_s5 + $0x18] sm:$0xf] }
 0x868   :  { %3402 = vmatpush.bf16.msra.mxu0 %v5274_v50 }
 0x86c   :  { %3403 = vmatpush.bf16.msra.mxu0 %v5273_v59 }
 0x870   :  { %3404 = vmatpush.bf16.msra.mxu0 %v5272_v8 }
 0x873   :  { %3405 = vmatmul.bf16.vlgmr.msra.gmra.mxu0 %v7261_v16 }
 0x874   :  { %3567 = vmatpush.bf16.msrb.mxu0 %v7467_v37 }
 0x878   :  { %3568 = vmatpush.bf16.msrb.mxu0 %v7473_v52 }
 0x883   :  { %3410 = vmatmul.bf16.gmra.mxu0 %v7280_v30 }
 0x893   :  { %5041 = vmatmul.msk.bf16.vlgmr.msrb.gmra.mxu0 %vm2662_vm3, %v7347_v34 }
 0x8c8   :  { %v3020_v11 = vpop.f32.mrf.mxu0 }
 0x8c9   :  { %v3023_v61 = vadd.f32 %v3020_v11, %v2876_v2 }
 0x8d0   :  { %v3132_v1 = vpop.f32.mrf.mxu0 }
 0x8d1   :  { %v3133_v57 = vadd.f32 %v3132_v1, %v7367_v55  ;;  %v5289_v55 = vld [vmem:[%s7566_s4 + $0x218] sm:$0xff] }
 0x8d8   :  { %v3134_v63 = vpop.f32.mrf.mxu0 }
 0x8d9   :  { %v3135_v40 = vadd.f32 %v3134_v63, %v7381_v32  ;;  %v5270_v32 = vld [vmem:[%s7566_s4 + $0x180] sm:$0xff] }
 0x8e0   :  { %v3137_v51 = vpop.f32.mrf.mxu0 }
 0x8e1   :  { %v3138_v22 = vadd.f32 %v3137_v51, %v7389_v31  ;;  %v5288_v31 = vld [vmem:[%s7566_s4 + $0x210] sm:$0xff] }
 0x8e3   :  { %4849 = vmatpush.msk.msrb.mxu2 %vm389_vm1, %v3138_v22 }
 0x8e5   :  { %3163 = vmatpush.msrb.mxu2 %v3135_v40 }
 0x8e7   :  { %3164 = vmatpush.msrb.mxu2 %v3133_v57 }
 0x8e8   :  { %v3139_v7 = vpop.f32.mrf.mxu0  ;;  %4850 = vmatmul.msk.f32.vlgmr.msrb.gmra.mxu2 %vm2825_vm4, %v4848_v9 }
 0x8e9   :  { %3275 = vmatpush.bf16.msra.mxu2 %v5271_v25 }
 0x8ed   :  { %3276 = vmatpush.bf16.msra.mxu2 %v5270_v32 }
 0x8f0   :  { %4911 = vmatmul.msk.bf16.vlgmr.msra.gmra.mxu2 %vm2662_vm3, %v7347_v34  ;;  %v3406_v43 = vpop.f32.mrf.mxu0 }
 0x8f1   :  { %3543 = vmatpush.bf16.msrb.mxu2 %v5289_v55 }
 0x8f5   :  { %3544 = vmatpush.bf16.msrb.mxu2 %v5288_v31 }
 0x8f8   :  { %v3408_v24 = vpop.f32.mrf.mxu0 }
 0x8f9   :  { %3545 = vmatpush.bf16.msrb.mxu2 %v5287_v13 }
 0x8fd   :  { %3546 = vmatpush.bf16.msrb.mxu2 %v5286_v62 }
 0x900   :  { %4912 = vmatmul.msk.bf16.gmra.mxu2 %vm2662_vm3, %v7369_v6  ;;  %v3411_v38 = vpop.f32.mrf.mxu0 }
 0x901   :  { %3547 = vmatpush.bf16.msrb.mxu2 %v5285_v15 }
 0x905   :  { %3548 = vmatpush.bf16.msrb.mxu2 %v5284_v3 }
 0x908   :  { %v3413_v12 = vpop.f32.mrf.mxu0 }
 0x909   :  { %3549 = vmatpush.bf16.msrb.mxu2 %v5283_v47 }
 0x90d   :  { %3550 = vmatpush.bf16.msrb.mxu2 %v5282_v39 }
 0x910   :  { %3551 = vmatmul.bf16.vlgmr.msrb.gmra.mxu2 %v7261_v16  ;;  %v4913_v16 = vld [vmem:[%s7567_s5 + $0x10] sm:$0xf]  ;;  %v3570_v0 = vpop.f32.mrf.mxu0 }
 0x918   :  { %v3572_v48 = vpop.f32.mrf.mxu0 }
 0x920   :  { %3556 = vmatmul.bf16.gmra.mxu2 %v7280_v30  ;;  %v5281_v30 = vld [vmem:[%s7566_s4 + $0x1d8] sm:$0xff] }
 0x96b   :  { %v3166_v60 = vpop.f32.mrf.mxu2 }
 0x96c   :  { %v3169_v54 = vadd.f32 %v3166_v60, %v3023_v61 }
 0x973   :  { %v3278_v58 = vpop.f32.mrf.mxu2 }
 0x974   :  { %v3279_v28 = vadd.f32 %v3278_v58, %v7419_v4 }
 0x97b   :  { %v3280_v33 = vpop.f32.mrf.mxu2 }
 0x97c   :  { %v3281_v19 = vadd.f32 %v3280_v33, %v7421_v35  ;;  %v5280_v35 = vld [vmem:[%s7566_s4 + $0x1d0] sm:$0xff] }
 0x983   :  { %v3283_v29 = vpop.f32.mrf.mxu2 }
 0x984   :  { %v3284_v5 = vadd.f32 %v3283_v29, %v7423_v20 }
 0x986   :  { %4914 = vmatpush.msk.msrb.mxu3 %vm389_vm1, %v3284_v5 }
 0x988   :  { %3309 = vmatpush.msrb.mxu3 %v3281_v19 }
 0x98a   :  { %3310 = vmatpush.msrb.mxu3 %v3279_v28 }
 0x98b   :  { %v3285_v18 = vpop.f32.mrf.mxu2  ;;  %4915 = vmatmul.msk.f32.vlgmr.msrb.gmra.mxu3 %vm2825_vm4, %v4913_v16 }
 0x98c   :  { %3421 = vmatpush.bf16.msra.mxu3 %v5281_v30 }
 0x990   :  { %3422 = vmatpush.bf16.msra.mxu3 %v5280_v35 }
 0x993   :  { %4976 = vmatmul.msk.bf16.vlgmr.msra.gmra.mxu3 %vm2662_vm3, %v7347_v34  ;;  %v3552_v4 = vpop.f32.mrf.mxu2 }
 0x994   :  { %5292 = vmatpush.bf16.msrb.mxu3 %v7467_v37  ;;  %v3571_v41 = vadd.f32 %v3570_v0, %v3552_v4  ;;  %v5294_v37 = vld [vmem:[%s7568_s6] ss:$0 sm:$0xff] }
 0x998   :  { %5293 = vmatpush.bf16.msrb.mxu3 %v7473_v52 }
 0x99b   :  { %v3554_v20 = vpop.f32.mrf.mxu2 }
 0x99c   :  { %v3573_v49 = vadd.f32 %v3572_v48, %v3554_v20 }
 0x9a3   :  { %4977 = vmatmul.msk.bf16.gmra.mxu3 %vm2662_vm3, %v7369_v6  ;;  %v3557_v45 = vpop.f32.mrf.mxu2 }
 0x9ab   :  { %v3559_v36 = vpop.f32.mrf.mxu2 }
 0x9b3   :  { %5042 = vmatmul.msk.bf16.vlgmr.msrb.gmra.mxu3 %vm2662_vm3, %v7369_v6 }
 0xa0e   :  { %v3312_v17 = vpop.f32.mrf.mxu3 }
 0xa0f   :  { %v3315_v14 = vadd.f32 %v3312_v17, %v3169_v54 }
 0xa16   :  { %v3424_v46 = vpop.f32.mrf.mxu3 }
 0xa17   :  { %v3425_v34 = vadd.f32 %v3424_v46, %v3406_v43 }
 0xa1e   :  { %v3426_v44 = vpop.f32.mrf.mxu3 }
 0xa1f   :  { %v3427_v53 = vadd.f32 %v3426_v44, %v3408_v24 }
 0xa26   :  { %v3429_v27 = vpop.f32.mrf.mxu3 }
 0xa27   :  { %v3430_v10 = vadd.f32 %v3429_v27, %v3411_v38 }
 0xa29   :  { %4979 = vmatpush.msk.msra.mxu1 %vm389_vm1, %v3430_v10 }
 0xa2b   :  { %3455 = vmatpush.msra.mxu1 %v3427_v53 }
 0xa2d   :  { %3456 = vmatpush.msra.mxu1 %v3425_v34 }
 0xa2e   :  { %v3431_v26 = vpop.f32.mrf.mxu3  ;;  %4980 = vmatmul.msk.f32.vlgmr.msra.gmra.mxu1 %vm2825_vm4, %v4978_v21 }
 0xa36   :  { %v3575_v6 = vpop.f32.mrf.mxu3 }
 0xa37   :  { %v3576_v23 = vadd.f32 %v3575_v6, %v3557_v45 }
 0xa39   :  { %5044 = vmatpush.msk.msrb.mxu1 %vm389_vm1, %v3576_v23 }
 0xa3b   :  { %3601 = vmatpush.msrb.mxu1 %v3573_v49 }
 0xa3d   :  { %3602 = vmatpush.msrb.mxu1 %v3571_v41 }
 0xa3e   :  { %v3577_v50 = vpop.f32.mrf.mxu3  ;;  %5045 = vmatmul.msk.f32.vlgmr.msrb.gmra.mxu1 %vm2825_vm4, %v5043_v56 }
 0xaab   :  { %v3458_v59 = vpop.f32.mrf.mxu1 }
 0xaac   :  { %v3461_v8 = vadd.f32 %v3458_v59, %v3315_v14 }
 0xabb   :  { %v3604_v52 = vpop.f32.mrf.mxu1 }
 0xabc   :  { %v3607_v42 = vadd.f32 %v3604_v52, %v3461_v8 }
 0xabe   :  { %v3612_v2 = vadd.f32 %v5294_v37, %v3607_v42 }
 0xac0   :  { %v3613_v11 = vmax.f32 %v3612_v2, 0.0 }
 0xac2   :  { %3615 = vst.msk [vmem:[%s7569_s7] sm:$0xf] %vm3614_vm5, %v3613_v11 }

</bundles_post_ra>
